<compile_context>
chip_gen: v7x
topology: tpu7x:2x2x1
jax: 0.10.0
libtpu: 0.0.40
codegen_flags: <defaults>
</compile_context>

<pallas_src>
import functools

import jax
import jax.numpy as jnp
import numpy as np
from jax.experimental import pallas as pl
from jax.experimental.pallas import tpu as pltpu

TIME = 12  # fixed by the module (pool_num has 12 rows, bias has 12 rows, eye(12) chain)
PREC = jax.lax.Precision.HIGHEST  # explicit per-op precision for the tiny glue math


# ----------------------------- Pallas kernel --------------------------------
def timegcn_kernel(x_ref, w_ref, b_ref, o_ref):
    # x_ref : (1, ntg, G*T*Ci)   bf16  node-group rows of one batch element
    # w_ref : (T, G*T*Ci, G*Co)  bf16  per-output-time block-diagonal folded weights
    # b_ref : (T, 1, G*Co)       f32   per-output-time lane-tiled bias
    # o_ref : (1, T, ntg, G*Co)  bf16  native-layout output block (dense lane stores)
    for t in range(TIME):  # static unroll: 12 MXU matmuls
        # Re-read the LHS from VMEM each step (cheap vld slots have slack); avoids
        # keeping it live across all 12 unrolled dots and spilling vregs.
        y = jnp.dot(x_ref[0], w_ref[t], preferred_element_type=jnp.float32)
        # f32 accumulation; downcast to bf16 only at the store.
        o_ref[0, t] = (y + b_ref[t]).astype(o_ref.dtype)


# ------------------------------ tiling helpers --------------------------------
def _pick_group(ci, co, weight_cap_bytes=8 << 20):
    """Smallest G with G*Co a multiple of 256 lanes (fills the v6e/v7x MXU and keeps
    output stores dense); fall back to 128-lane alignment if the block-diagonal
    folded weight 12*(G*T*Ci)*(G*Co)*2B would eat too much VMEM (v7x has 64 MiB)."""
    for lanes in (256, 128):
        g = lanes // int(np.gcd(int(co), lanes))
        if TIME * (g * TIME * ci) * (g * co) * 2 <= weight_cap_bytes:
            return g
    # TODO(synk): for very large Ci*Co, split the folded weight over a K grid axis
    # instead of dropping to masked (sub-128-lane) stores.
    return 1


def _pick_node_tile(n_groups, batch, max_groups):
    """Largest divisor of n_groups <= max_groups (prefer multiples of 16, then 8),
    then split further if needed so the grid has >= 2 parallel steps (v7x: 2 TCs)."""
    target = max(1, int(min(max_groups, 2048, n_groups)))
    if n_groups <= target:
        ntg = n_groups
    else:
        ntg = None
        for mult in (16, 8, 1):
            for d in range(target, mult - 1, -1):
                if n_groups % d == 0 and d % mult == 0:
                    ntg = d
                    break
            if ntg is not None:
                break
        if ntg is None:
            ntg = n_groups
    if batch * (n_groups // ntg) < 2:  # give both v7x TensorCores work
        for d in range(max(ntg // 2, 1), 0, -1):
            if n_groups % d == 0:
                ntg = d
                break
    return ntg


# ------------------------------- wrapper -------------------------------------
@functools.partial(jax.jit, static_argnums=(5,))
def timegcn_forward(params, x, time_embeddings, eyes, trans, cheb_k):
    B, T, N, Ci = x.shape
    assert T == TIME
    Co = params["weights"].shape[-1]

    # ---- parameter-only glue (12x12-scale math), plain JAX ----
    su = jax.nn.relu(params["gate"] * trans + eyes)                    # (11, 12, 12)
    f = jnp.eye(TIME, dtype=x.dtype)
    for i in range(11):
        f = jnp.matmul(f, su[i], precision=PREC)
    supports = f                                                        # (12, 12)

    w_pool = jnp.einsum("tn,nkio->tkio", params["pool_num"], params["weights"],
                        precision=PREC)                                 # (12, K, Ci, Co)
    T_supports = jax.nn.softmax(
        jax.nn.relu(jnp.matmul(time_embeddings, time_embeddings.T, precision=PREC)),
        axis=1)                                                         # (12, 12)

    def cheb(S):
        sets = [jnp.eye(TIME, dtype=S.dtype), S]
        for _ in range(2, cheb_k):
            sets.append(2.0 * jnp.matmul(S, sets[-1], precision=PREC) + sets[-2])
        return jnp.stack(sets, axis=0)                                  # (K, 12, 12)

    sup_all = jnp.stack([cheb(supports), cheb(T_supports)], axis=0)     # (2, K, 12, 12)

    candidate = jnp.concatenate([supports, T_supports], axis=-1)        # (12, 24)
    g1 = jnp.matmul(candidate, params["g"], precision=PREC)             # (12, 1)
    gmix = jnp.concatenate([g1, 1.0 - g1], axis=1)                      # (12, 2)
    w_gated = jnp.einsum("ts,tkio->tksio", gmix, w_pool, precision=PREC)

    # Fold supports into weights:
    #   out[b,t,n,o] = sum_{p,i} x[b,p,n,i] * Wcomb[t,p,i,o] + bias[t,o]
    w_comb = jnp.einsum("skpt,tksio->tpio", sup_all, w_gated,
                        precision=PREC)                                 # (12, 12, Ci, Co)

    # ---- lane-pack G nodes per row; pad N so the dense-store fast path always holds
    G = _pick_group(Ci, Co)
    Npad = ((N + G - 1) // G) * G
    NG = Npad // G
    GK, GCo = G * TIME * Ci, G * Co

    # VMEM budget -> node-tile size (groups per block) and explicit vmem limit.
    fixed_bytes = 4 * TIME * GK * GCo + 8 * TIME * GCo       # weight + bias (2 bufs each)
    per_group_bytes = 4 * GK + 4 * TIME * GCo + 4 * GCo      # x + out (2 bufs) + f32 dot temp
    budget = 26 << 20                                        # safe for v7x's 64 MiB VMEM
    max_groups = max(8, (budget - fixed_bytes) // per_group_bytes)
    ntg = _pick_node_tile(NG, B, max_groups)
    vmem_limit = int(min(48 << 20,
                         max(32 << 20, (fixed_bytes + per_group_bytes * ntg) * 5 // 4)))

    # per-output-time block-diagonal weights: (T, G*T*Ci, G*Co), bf16 (f32 accumulate)
    eye_g = jnp.eye(G, dtype=w_comb.dtype)
    w_bd = jnp.einsum("jk,tpio->tjpiko", eye_g, w_comb,
                      precision=PREC).reshape(TIME, GK, GCo).astype(jnp.bfloat16)
    b_bd = jnp.tile(params["bias"], (1, G)).reshape(TIME, 1, GCo).astype(jnp.float32)

    # x: (B,T,N,Ci) -> pad nodes -> (B, Npad/G, G*T*Ci)  (one fused transpose+cast)
    x_pad = x if Npad == N else jnp.pad(x, ((0, 0), (0, 0), (0, Npad - N), (0, 0)))
    x_g = jnp.transpose(x_pad, (0, 2, 1, 3)).reshape(B, NG, GK).astype(jnp.bfloat16)

    out4 = pl.pallas_call(
        timegcn_kernel,
        out_shape=jax.ShapeDtypeStruct((B, TIME, NG, GCo), jnp.bfloat16),
        grid_spec=pltpu.PrefetchScalarGridSpec(
            num_scalar_prefetch=0,
            grid=(B, NG // ntg),
            in_specs=[
                pl.BlockSpec((1, ntg, GK), lambda b, n: (b, n, 0)),
                # constant index_map -> grid-invariant, never re-DMA'd across steps
                pl.BlockSpec((TIME, GK, GCo), lambda b, n: (0, 0, 0)),
                pl.BlockSpec((TIME, 1, GCo), lambda b, n: (0, 0, 0)),
            ],
            out_specs=pl.BlockSpec((1, TIME, ntg, GCo), lambda b, n: (b, 0, n, 0)),
        ),
        compiler_params=pltpu.CompilerParams(
            dimension_semantics=("parallel", "parallel"),
            vmem_limit_bytes=vmem_limit),
    )(x_g, w_bd, b_bd)

    # free reshape back to the PyTorch output layout (B, T=12, N, Co); drop pad rows
    out = out4.reshape(B, TIME, Npad, Co)
    if Npad != N:
        out = out[:, :, :N, :]
    return out


# ------------------------- pure-JAX reference (PyTorch order) ----------------
def timegcn_reference(params, x, time_embeddings, eyes, trans, cheb_k):
    su = jax.nn.relu(params["gate"] * trans + eyes)
    f = jnp.eye(TIME, dtype=x.dtype)
    for i in range(11):
        f = jnp.matmul(f, su[i], precision=PREC)
    supports = f
    weights = jnp.einsum("tn,nkio->tkio", params["pool_num"], params["weights"],
                         precision=PREC)
    time_num = x.shape[1]
    T_supports = jax.nn.softmax(
        jax.nn.relu(jnp.matmul(time_embeddings, time_embeddings.T, precision=PREC)),
        axis=1)

    support_set = [jnp.eye(time_num, dtype=x.dtype), supports]
    for _ in range(2, cheb_k):
        support_set.append(
            2.0 * jnp.matmul(supports, support_set[-1], precision=PREC) + support_set[-2])
    supports1 = jnp.stack(support_set, axis=0)

    candidate = jnp.concatenate([supports, T_supports], axis=-1)
    g1 = jnp.matmul(candidate, params["g"], precision=PREC)
    g = jnp.concatenate([g1, 1.0 - g1], axis=1)
    weights = jnp.einsum("ts,tkio->tksio", g, weights, precision=PREC)

    support_set = [jnp.eye(time_num, dtype=x.dtype), T_supports]
    for _ in range(2, cheb_k):
        support_set.append(
            2.0 * jnp.matmul(T_supports, support_set[-1], precision=PREC) + support_set[-2])
    supports2 = jnp.stack(support_set, axis=0)

    sup = jnp.stack([supports1, supports2], axis=0)
    x_g = jnp.einsum("sktp,btnc->bspknc", sup, x, precision=PREC)
    x_g = jnp.transpose(x_g, (0, 1, 2, 4, 3, 5))
    x_gconv = jnp.einsum("bstnki,tksio->btno", x_g, weights, precision=PREC)
    x_gconv = jnp.transpose(x_gconv, (0, 2, 1, 3)) + params["bias"]
    x_gconv = jnp.transpose(x_gconv, (0, 2, 1, 3))
    return x_gconv


# ------------------------------- setup ---------------------------------------
def init_params(key, dim_in, dim_out, cheb_k, t):
    ks = jax.random.split(key, 5)
    return {
        "weights": 0.1 * jax.random.normal(ks[0], (t, cheb_k, dim_in, dim_out), jnp.float32),
        "pool_num": 0.1 * jax.random.normal(ks[1], (TIME, t), jnp.float32),
        "pool_graph": 0.1 * jax.random.normal(ks[2], (TIME, 2), jnp.float32),  # unused in forward
        "gate": jnp.ones((11, 1, 1), jnp.float32),
        "bias": 0.1 * jax.random.normal(ks[3], (TIME, dim_out), jnp.float32),
        "g": 0.05 * jax.random.normal(ks[4], (2 * TIME, 1), jnp.float32),
    }


if __name__ == "__main__":
    key = jax.random.PRNGKey(0)
    B, N, Ci, Co = 2, 16, 4, 32
    cheb_k, t_pool, emb_dim = 3, 8, 8

    k_p, k_x, k_e, k_tr = jax.random.split(key, 4)
    params = init_params(k_p, Ci, Co, cheb_k, t_pool)
    x = jax.random.normal(k_x, (B, TIME, N, Ci), jnp.float32)
    time_embeddings = 0.5 * jax.random.normal(k_e, (TIME, emb_dim), jnp.float32)

    # synthetic replacements for the 'eye.pt' / 'transdown.pt' buffers
    eyes = jnp.broadcast_to(jnp.eye(TIME, dtype=jnp.float32), (11, TIME, TIME))
    trans = 0.02 * jax.random.normal(k_tr, (11, TIME, TIME), jnp.float32)

    out = jax.block_until_ready(
        timegcn_forward(params, x, time_embeddings, eyes, trans, cheb_k))
    ref = timegcn_reference(params, x, time_embeddings, eyes, trans, cheb_k)

    assert out.shape == (B, TIME, N, Co), out.shape
    # bf16 inputs/weights + bf16 output (f32 MXU accumulation) vs f32 reference
    np.testing.assert_allclose(np.asarray(out.astype(jnp.float32)), np.asarray(ref),
                               rtol=2e-2, atol=2e-2)
    print("KERNEL_OK")
</pallas_src>

<mosaic_0001>
module attributes {stable_mosaic.version = 11 : i64} {
  func.func @timegcn_kernel(%arg0: i32, %arg1: i32, %arg2: memref<1x2x384xbf16, #tpu.memory_space<vmem>>, %arg3: memref<12x384x256xbf16, #tpu.memory_space<vmem>>, %arg4: memref<12x1x256xf32, #tpu.memory_space<vmem>>, %arg5: memref<1x12x2x256xbf16, #tpu.memory_space<vmem>>) attributes {dimension_semantics = [#tpu.dimension_semantics<parallel>, #tpu.dimension_semantics<parallel>], iteration_bounds = array<i64: 2, 1>, scalar_prefetch = 0 : i64, scratch_operands = 0 : i64, tpu.core_type = #tpu.core_type<tc>, window_params = [{transform_indices = @transform_0, window_bounds = array<i64: 1, 2, 384>}, {pipeline_mode = #tpu.pipeline_mode<synchronous>, transform_indices = @transform_1, window_bounds = array<i64: 12, 384, 256>}, {pipeline_mode = #tpu.pipeline_mode<synchronous>, transform_indices = @transform_2, window_bounds = array<i64: 12, 1, 256>}, {transform_indices = @transform_3, window_bounds = array<i64: 1, 12, 2, 256>}]} {
    %c0 = arith.constant 0 : index
    %c0_0 = arith.constant 0 : index
    %c0_1 = arith.constant 0 : index
    %0 = vector.load %arg2[%c0, %c0_0, %c0_1] : memref<1x2x384xbf16, #tpu.memory_space<vmem>>, vector<1x2x384xbf16>
    %1 = vector.shape_cast %0 : vector<1x2x384xbf16> to vector<2x384xbf16>
    %c0_2 = arith.constant 0 : index
    %c0_3 = arith.constant 0 : index
    %c0_4 = arith.constant 0 : index
    %2 = vector.load %arg3[%c0_2, %c0_3, %c0_4] : memref<12x384x256xbf16, #tpu.memory_space<vmem>>, vector<1x384x256xbf16>
    %3 = vector.shape_cast %2 : vector<1x384x256xbf16> to vector<384x256xbf16>
    %cst = arith.constant dense<0.000000e+00> : vector<2x256xf32>
    %4 = tpu.matmul %1, %3, %cst {dimension_numbers = #tpu.dot_dimension_numbers<[1], [0], [0], [1], [0, 0, 1, 1], [], []>} : vector<2x384xbf16>, vector<384x256xbf16>, vector<2x256xf32> -> vector<2x256xf32>
    %c0_5 = arith.constant 0 : index
    %c0_6 = arith.constant 0 : index
    %c0_7 = arith.constant 0 : index
    %5 = vector.load %arg4[%c0_5, %c0_6, %c0_7] : memref<12x1x256xf32, #tpu.memory_space<vmem>>, vector<1x1x256xf32>
    %6 = vector.shape_cast %5 : vector<1x1x256xf32> to vector<1x256xf32>
    %7 = vector.broadcast %6 : vector<1x256xf32> to vector<2x256xf32>
    %8 = arith.addf %4, %7 : vector<2x256xf32>
    %9 = arith.truncf %8 : vector<2x256xf32> to vector<2x256xbf16>
    %c0_8 = arith.constant 0 : index
    %c0_9 = arith.constant 0 : index
    %c0_10 = arith.constant 0 : index
    %c0_11 = arith.constant 0 : index
    %10 = vector.load %arg5[%c0_8, %c0_9, %c0_10, %c0_11] : memref<1x12x2x256xbf16, #tpu.memory_space<vmem>>, vector<1x1x2x256xbf16>
    %11 = vector.shape_cast %10 : vector<1x1x2x256xbf16> to vector<2x256xbf16>
    %12 = vector.shape_cast %9 : vector<2x256xbf16> to vector<1x1x2x256xbf16>
    tpu.vector_store %arg5[%c0_8, %c0_9, %c0_10, %c0_11], %12 {strides = array<i32>} : memref<1x12x2x256xbf16, #tpu.memory_space<vmem>>, vector<1x1x2x256xbf16>,
    %c0_12 = arith.constant 0 : index
    %c0_13 = arith.constant 0 : index
    %c0_14 = arith.constant 0 : index
    %13 = vector.load %arg2[%c0_12, %c0_13, %c0_14] : memref<1x2x384xbf16, #tpu.memory_space<vmem>>, vector<1x2x384xbf16>
    %14 = vector.shape_cast %13 : vector<1x2x384xbf16> to vector<2x384xbf16>
    %c1 = arith.constant 1 : index
    %c0_15 = arith.constant 0 : index
    %c0_16 = arith.constant 0 : index
    %15 = vector.load %arg3[%c1, %c0_15, %c0_16] : memref<12x384x256xbf16, #tpu.memory_space<vmem>>, vector<1x384x256xbf16>
    %16 = vector.shape_cast %15 : vector<1x384x256xbf16> to vector<384x256xbf16>
    %cst_17 = arith.constant dense<0.000000e+00> : vector<2x256xf32>
    %17 = tpu.matmul %14, %16, %cst_17 {dimension_numbers = #tpu.dot_dimension_numbers<[1], [0], [0], [1], [0, 0, 1, 1], [], []>} : vector<2x384xbf16>, vector<384x256xbf16>, vector<2x256xf32> -> vector<2x256xf32>
    %c1_18 = arith.constant 1 : index
    %c0_19 = arith.constant 0 : index
    %c0_20 = arith.constant 0 : index
    %18 = vector.load %arg4[%c1_18, %c0_19, %c0_20] : memref<12x1x256xf32, #tpu.memory_space<vmem>>, vector<1x1x256xf32>
    %19 = vector.shape_cast %18 : vector<1x1x256xf32> to vector<1x256xf32>
    %20 = vector.broadcast %19 : vector<1x256xf32> to vector<2x256xf32>
    %21 = arith.addf %17, %20 : vector<2x256xf32>
    %22 = arith.truncf %21 : vector<2x256xf32> to vector<2x256xbf16>
    %c0_21 = arith.constant 0 : index
    %c1_22 = arith.constant 1 : index
    %c0_23 = arith.constant 0 : index
    %c0_24 = arith.constant 0 : index
    %23 = vector.load %arg5[%c0_21, %c1_22, %c0_23, %c0_24] : memref<1x12x2x256xbf16, #tpu.memory_space<vmem>>, vector<1x1x2x256xbf16>
    %24 = vector.shape_cast %23 : vector<1x1x2x256xbf16> to vector<2x256xbf16>
    %25 = vector.shape_cast %22 : vector<2x256xbf16> to vector<1x1x2x256xbf16>
    tpu.vector_store %arg5[%c0_21, %c1_22, %c0_23, %c0_24], %25 {strides = array<i32>} : memref<1x12x2x256xbf16, #tpu.memory_space<vmem>>, vector<1x1x2x256xbf16>,
    %c0_25 = arith.constant 0 : index
    %c0_26 = arith.constant 0 : index
    %c0_27 = arith.constant 0 : index
    %26 = vector.load %arg2[%c0_25, %c0_26, %c0_27] : memref<1x2x384xbf16, #tpu.memory_space<vmem>>, vector<1x2x384xbf16>
    %27 = vector.shape_cast %26 : vector<1x2x384xbf16> to vector<2x384xbf16>
    %c2 = arith.constant 2 : index
    %c0_28 = arith.constant 0 : index
    %c0_29 = arith.constant 0 : index
    %28 = vector.load %arg3[%c2, %c0_28, %c0_29] : memref<12x384x256xbf16, #tpu.memory_space<vmem>>, vector<1x384x256xbf16>
    %29 = vector.shape_cast %28 : vector<1x384x256xbf16> to vector<384x256xbf16>
    %cst_30 = arith.constant dense<0.000000e+00> : vector<2x256xf32>
    %30 = tpu.matmul %27, %29, %cst_30 {dimension_numbers = #tpu.dot_dimension_numbers<[1], [0], [0], [1], [0, 0, 1, 1], [], []>} : vector<2x384xbf16>, vector<384x256xbf16>, vector<2x256xf32> -> vector<2x256xf32>
    %c2_31 = arith.constant 2 : index
    %c0_32 = arith.constant 0 : index
    %c0_33 = arith.constant 0 : index
    %31 = vector.load %arg4[%c2_31, %c0_32, %c0_33] : memref<12x1x256xf32, #tpu.memory_space<vmem>>, vector<1x1x256xf32>
    %32 = vector.shape_cast %31 : vector<1x1x256xf32> to vector<1x256xf32>
    %33 = vector.broadcast %32 : vector<1x256xf32> to vector<2x256xf32>
    %34 = arith.addf %30, %33 : vector<2x256xf32>
    %35 = arith.truncf %34 : vector<2x256xf32> to vector<2x256xbf16>
    %c0_34 = arith.constant 0 : index
    %c2_35 = arith.constant 2 : index
    %c0_36 = arith.constant 0 : index
    %c0_37 = arith.constant 0 : index
    %36 = vector.load %arg5[%c0_34, %c2_35, %c0_36, %c0_37] : memref<1x12x2x256xbf16, #tpu.memory_space<vmem>>, vector<1x1x2x256xbf16>
    %37 = vector.shape_cast %36 : vector<1x1x2x256xbf16> to vector<2x256xbf16>
    %38 = vector.shape_cast %35 : vector<2x256xbf16> to vector<1x1x2x256xbf16>
    tpu.vector_store %arg5[%c0_34, %c2_35, %c0_36, %c0_37], %38 {strides = array<i32>} : memref<1x12x2x256xbf16, #tpu.memory_space<vmem>>, vector<1x1x2x256xbf16>,
    %c0_38 = arith.constant 0 : index
    %c0_39 = arith.constant 0 : index
    %c0_40 = arith.constant 0 : index
    %39 = vector.load %arg2[%c0_38, %c0_39, %c0_40] : memref<1x2x384xbf16, #tpu.memory_space<vmem>>, vector<1x2x384xbf16>
    %40 = vector.shape_cast %39 : vector<1x2x384xbf16> to vector<2x384xbf16>
    %c3 = arith.constant 3 : index
    %c0_41 = arith.constant 0 : index
    %c0_42 = arith.constant 0 : index
    %41 = vector.load %arg3[%c3, %c0_41, %c0_42] : memref<12x384x256xbf16, #tpu.memory_space<vmem>>, vector<1x384x256xbf16>
    %42 = vector.shape_cast %41 : vector<1x384x256xbf16> to vector<384x256xbf16>
    %cst_43 = arith.constant dense<0.000000e+00> : vector<2x256xf32>
    %43 = tpu.matmul %40, %42, %cst_43 {dimension_numbers = #tpu.dot_dimension_numbers<[1], [0], [0], [1], [0, 0, 1, 1], [], []>} : vector<2x384xbf16>, vector<384x256xbf16>, vector<2x256xf32> -> vector<2x256xf32>
    %c3_44 = arith.constant 3 : index
    %c0_45 = arith.constant 0 : index
    %c0_46 = arith.constant 0 : index
    %44 = vector.load %arg4[%c3_44, %c0_45, %c0_46] : memref<12x1x256xf32, #tpu.memory_space<vmem>>, vector<1x1x256xf32>
    %45 = vector.shape_cast %44 : vector<1x1x256xf32> to vector<1x256xf32>
    %46 = vector.broadcast %45 : vector<1x256xf32> to vector<2x256xf32>
    %47 = arith.addf %43, %46 : vector<2x256xf32>
    %48 = arith.truncf %47 : vector<2x256xf32> to vector<2x256xbf16>
    %c0_47 = arith.constant 0 : index
    %c3_48 = arith.constant 3 : index
    %c0_49 = arith.constant 0 : index
    %c0_50 = arith.constant 0 : index
    %49 = vector.load %arg5[%c0_47, %c3_48, %c0_49, %c0_50] : memref<1x12x2x256xbf16, #tpu.memory_space<vmem>>, vector<1x1x2x256xbf16>
    %50 = vector.shape_cast %49 : vector<1x1x2x256xbf16> to vector<2x256xbf16>
    %51 = vector.shape_cast %48 : vector<2x256xbf16> to vector<1x1x2x256xbf16>
    tpu.vector_store %arg5[%c0_47, %c3_48, %c0_49, %c0_50], %51 {strides = array<i32>} : memref<1x12x2x256xbf16, #tpu.memory_space<vmem>>, vector<1x1x2x256xbf16>,
    %c0_51 = arith.constant 0 : index
    %c0_52 = arith.constant 0 : index
    %c0_53 = arith.constant 0 : index
    %52 = vector.load %arg2[%c0_51, %c0_52, %c0_53] : memref<1x2x384xbf16, #tpu.memory_space<vmem>>, vector<1x2x384xbf16>
    %53 = vector.shape_cast %52 : vector<1x2x384xbf16> to vector<2x384xbf16>
    %c4 = arith.constant 4 : index
    %c0_54 = arith.constant 0 : index
    %c0_55 = arith.constant 0 : index
    %54 = vector.load %arg3[%c4, %c0_54, %c0_55] : memref<12x384x256xbf16, #tpu.memory_space<vmem>>, vector<1x384x256xbf16>
    %55 = vector.shape_cast %54 : vector<1x384x256xbf16> to vector<384x256xbf16>
    %cst_56 = arith.constant dense<0.000000e+00> : vector<2x256xf32>
    %56 = tpu.matmul %53, %55, %cst_56 {dimension_numbers = #tpu.dot_dimension_numbers<[1], [0], [0], [1], [0, 0, 1, 1], [], []>} : vector<2x384xbf16>, vector<384x256xbf16>, vector<2x256xf32> -> vector<2x256xf32>
    %c4_57 = arith.constant 4 : index
    %c0_58 = arith.constant 0 : index
    %c0_59 = arith.constant 0 : index
    %57 = vector.load %arg4[%c4_57, %c0_58, %c0_59] : memref<12x1x256xf32, #tpu.memory_space<vmem>>, vector<1x1x256xf32>
    %58 = vector.shape_cast %57 : vector<1x1x256xf32> to vector<1x256xf32>
    %59 = vector.broadcast %58 : vector<1x256xf32> to vector<2x256xf32>
    %60 = arith.addf %56, %59 : vector<2x256xf32>
    %61 = arith.truncf %60 : vector<2x256xf32> to vector<2x256xbf16>
    %c0_60 = arith.constant 0 : index
    %c4_61 = arith.constant 4 : index
    %c0_62 = arith.constant 0 : index
    %c0_63 = arith.constant 0 : index
    %62 = vector.load %arg5[%c0_60, %c4_61, %c0_62, %c0_63] : memref<1x12x2x256xbf16, #tpu.memory_space<vmem>>, vector<1x1x2x256xbf16>
    %63 = vector.shape_cast %62 : vector<1x1x2x256xbf16> to vector<2x256xbf16>
    %64 = vector.shape_cast %61 : vector<2x256xbf16> to vector<1x1x2x256xbf16>
    tpu.vector_store %arg5[%c0_60, %c4_61, %c0_62, %c0_63], %64 {strides = array<i32>} : memref<1x12x2x256xbf16, #tpu.memory_space<vmem>>, vector<1x1x2x256xbf16>,
    %c0_64 = arith.constant 0 : index
    %c0_65 = arith.constant 0 : index
    %c0_66 = arith.constant 0 : index
    %65 = vector.load %arg2[%c0_64, %c0_65, %c0_66] : memref<1x2x384xbf16, #tpu.memory_space<vmem>>, vector<1x2x384xbf16>
    %66 = vector.shape_cast %65 : vector<1x2x384xbf16> to vector<2x384xbf16>
    %c5 = arith.constant 5 : index
    %c0_67 = arith.constant 0 : index
    %c0_68 = arith.constant 0 : index
    %67 = vector.load %arg3[%c5, %c0_67, %c0_68] : memref<12x384x256xbf16, #tpu.memory_space<vmem>>, vector<1x384x256xbf16>
    %68 = vector.shape_cast %67 : vector<1x384x256xbf16> to vector<384x256xbf16>
    %cst_69 = arith.constant dense<0.000000e+00> : vector<2x256xf32>
    %69 = tpu.matmul %66, %68, %cst_69 {dimension_numbers = #tpu.dot_dimension_numbers<[1], [0], [0], [1], [0, 0, 1, 1], [], []>} : vector<2x384xbf16>, vector<384x256xbf16>, vector<2x256xf32> -> vector<2x256xf32>
    %c5_70 = arith.constant 5 : index
    %c0_71 = arith.constant 0 : index
    %c0_72 = arith.constant 0 : index
    %70 = vector.load %arg4[%c5_70, %c0_71, %c0_72] : memref<12x1x256xf32, #tpu.memory_space<vmem>>, vector<1x1x256xf32>
    %71 = vector.shape_cast %70 : vector<1x1x256xf32> to vector<1x256xf32>
    %72 = vector.broadcast %71 : vector<1x256xf32> to vector<2x256xf32>
    %73 = arith.addf %69, %72 : vector<2x256xf32>
    %74 = arith.truncf %73 : vector<2x256xf32> to vector<2x256xbf16>
    %c0_73 = arith.constant 0 : index
    %c5_74 = arith.constant 5 : index
    %c0_75 = arith.constant 0 : index
    %c0_76 = arith.constant 0 : index
    %75 = vector.load %arg5[%c0_73, %c5_74, %c0_75, %c0_76] : memref<1x12x2x256xbf16, #tpu.memory_space<vmem>>, vector<1x1x2x256xbf16>
    %76 = vector.shape_cast %75 : vector<1x1x2x256xbf16> to vector<2x256xbf16>
    %77 = vector.shape_cast %74 : vector<2x256xbf16> to vector<1x1x2x256xbf16>
    tpu.vector_store %arg5[%c0_73, %c5_74, %c0_75, %c0_76], %77 {strides = array<i32>} : memref<1x12x2x256xbf16, #tpu.memory_space<vmem>>, vector<1x1x2x256xbf16>,
    %c0_77 = arith.constant 0 : index
    %c0_78 = arith.constant 0 : index
    %c0_79 = arith.constant 0 : index
    %78 = vector.load %arg2[%c0_77, %c0_78, %c0_79] : memref<1x2x384xbf16, #tpu.memory_space<vmem>>, vector<1x2x384xbf16>
    %79 = vector.shape_cast %78 : vector<1x2x384xbf16> to vector<2x384xbf16>
    %c6 = arith.constant 6 : index
    %c0_80 = arith.constant 0 : index
    %c0_81 = arith.constant 0 : index
    %80 = vector.load %arg3[%c6, %c0_80, %c0_81] : memref<12x384x256xbf16, #tpu.memory_space<vmem>>, vector<1x384x256xbf16>
    %81 = vector.shape_cast %80 : vector<1x384x256xbf16> to vector<384x256xbf16>
    %cst_82 = arith.constant dense<0.000000e+00> : vector<2x256xf32>
    %82 = tpu.matmul %79, %81, %cst_82 {dimension_numbers = #tpu.dot_dimension_numbers<[1], [0], [0], [1], [0, 0, 1, 1], [], []>} : vector<2x384xbf16>, vector<384x256xbf16>, vector<2x256xf32> -> vector<2x256xf32>
    %c6_83 = arith.constant 6 : index
    %c0_84 = arith.constant 0 : index
    %c0_85 = arith.constant 0 : index
    %83 = vector.load %arg4[%c6_83, %c0_84, %c0_85] : memref<12x1x256xf32, #tpu.memory_space<vmem>>, vector<1x1x256xf32>
    %84 = vector.shape_cast %83 : vector<1x1x256xf32> to vector<1x256xf32>
    %85 = vector.broadcast %84 : vector<1x256xf32> to vector<2x256xf32>
    %86 = arith.addf %82, %85 : vector<2x256xf32>
    %87 = arith.truncf %86 : vector<2x256xf32> to vector<2x256xbf16>
    %c0_86 = arith.constant 0 : index
    %c6_87 = arith.constant 6 : index
    %c0_88 = arith.constant 0 : index
    %c0_89 = arith.constant 0 : index
    %88 = vector.load %arg5[%c0_86, %c6_87, %c0_88, %c0_89] : memref<1x12x2x256xbf16, #tpu.memory_space<vmem>>, vector<1x1x2x256xbf16>
    %89 = vector.shape_cast %88 : vector<1x1x2x256xbf16> to vector<2x256xbf16>
    %90 = vector.shape_cast %87 : vector<2x256xbf16> to vector<1x1x2x256xbf16>
    tpu.vector_store %arg5[%c0_86, %c6_87, %c0_88, %c0_89], %90 {strides = array<i32>} : memref<1x12x2x256xbf16, #tpu.memory_space<vmem>>, vector<1x1x2x256xbf16>,
    %c0_90 = arith.constant 0 : index
    %c0_91 = arith.constant 0 : index
    %c0_92 = arith.constant 0 : index
    %91 = vector.load %arg2[%c0_90, %c0_91, %c0_92] : memref<1x2x384xbf16, #tpu.memory_space<vmem>>, vector<1x2x384xbf16>
    %92 = vector.shape_cast %91 : vector<1x2x384xbf16> to vector<2x384xbf16>
    %c7 = arith.constant 7 : index
    %c0_93 = arith.constant 0 : index
    %c0_94 = arith.constant 0 : index
    %93 = vector.load %arg3[%c7, %c0_93, %c0_94] : memref<12x384x256xbf16, #tpu.memory_space<vmem>>, vector<1x384x256xbf16>
    %94 = vector.shape_cast %93 : vector<1x384x256xbf16> to vector<384x256xbf16>
    %cst_95 = arith.constant dense<0.000000e+00> : vector<2x256xf32>
    %95 = tpu.matmul %92, %94, %cst_95 {dimension_numbers = #tpu.dot_dimension_numbers<[1], [0], [0], [1], [0, 0, 1, 1], [], []>} : vector<2x384xbf16>, vector<384x256xbf16>, vector<2x256xf32> -> vector<2x256xf32>
    %c7_96 = arith.constant 7 : index
    %c0_97 = arith.constant 0 : index
    %c0_98 = arith.constant 0 : index
    %96 = vector.load %arg4[%c7_96, %c0_97, %c0_98] : memref<12x1x256xf32, #tpu.memory_space<vmem>>, vector<1x1x256xf32>
    %97 = vector.shape_cast %96 : vector<1x1x256xf32> to vector<1x256xf32>
    %98 = vector.broadcast %97 : vector<1x256xf32> to vector<2x256xf32>
    %99 = arith.addf %95, %98 : vector<2x256xf32>
    %100 = arith.truncf %99 : vector<2x256xf32> to vector<2x256xbf16>
    %c0_99 = arith.constant 0 : index
    %c7_100 = arith.constant 7 : index
    %c0_101 = arith.constant 0 : index
    %c0_102 = arith.constant 0 : index
    %101 = vector.load %arg5[%c0_99, %c7_100, %c0_101, %c0_102] : memref<1x12x2x256xbf16, #tpu.memory_space<vmem>>, vector<1x1x2x256xbf16>
    %102 = vector.shape_cast %101 : vector<1x1x2x256xbf16> to vector<2x256xbf16>
    %103 = vector.shape_cast %100 : vector<2x256xbf16> to vector<1x1x2x256xbf16>
    tpu.vector_store %arg5[%c0_99, %c7_100, %c0_101, %c0_102], %103 {strides = array<i32>} : memref<1x12x2x256xbf16, #tpu.memory_space<vmem>>, vector<1x1x2x256xbf16>,
    %c0_103 = arith.constant 0 : index
    %c0_104 = arith.constant 0 : index
    %c0_105 = arith.constant 0 : index
    %104 = vector.load %arg2[%c0_103, %c0_104, %c0_105] : memref<1x2x384xbf16, #tpu.memory_space<vmem>>, vector<1x2x384xbf16>
    %105 = vector.shape_cast %104 : vector<1x2x384xbf16> to vector<2x384xbf16>
    %c8 = arith.constant 8 : index
    %c0_106 = arith.constant 0 : index
    %c0_107 = arith.constant 0 : index
    %106 = vector.load %arg3[%c8, %c0_106, %c0_107] : memref<12x384x256xbf16, #tpu.memory_space<vmem>>, vector<1x384x256xbf16>
    %107 = vector.shape_cast %106 : vector<1x384x256xbf16> to vector<384x256xbf16>
    %cst_108 = arith.constant dense<0.000000e+00> : vector<2x256xf32>
    %108 = tpu.matmul %105, %107, %cst_108 {dimension_numbers = #tpu.dot_dimension_numbers<[1], [0], [0], [1], [0, 0, 1, 1], [], []>} : vector<2x384xbf16>, vector<384x256xbf16>, vector<2x256xf32> -> vector<2x256xf32>
    %c8_109 = arith.constant 8 : index
    %c0_110 = arith.constant 0 : index
    %c0_111 = arith.constant 0 : index
    %109 = vector.load %arg4[%c8_109, %c0_110, %c0_111] : memref<12x1x256xf32, #tpu.memory_space<vmem>>, vector<1x1x256xf32>
    %110 = vector.shape_cast %109 : vector<1x1x256xf32> to vector<1x256xf32>
    %111 = vector.broadcast %110 : vector<1x256xf32> to vector<2x256xf32>
    %112 = arith.addf %108, %111 : vector<2x256xf32>
    %113 = arith.truncf %112 : vector<2x256xf32> to vector<2x256xbf16>
    %c0_112 = arith.constant 0 : index
    %c8_113 = arith.constant 8 : index
    %c0_114 = arith.constant 0 : index
    %c0_115 = arith.constant 0 : index
    %114 = vector.load %arg5[%c0_112, %c8_113, %c0_114, %c0_115] : memref<1x12x2x256xbf16, #tpu.memory_space<vmem>>, vector<1x1x2x256xbf16>
    %115 = vector.shape_cast %114 : vector<1x1x2x256xbf16> to vector<2x256xbf16>
    %116 = vector.shape_cast %113 : vector<2x256xbf16> to vector<1x1x2x256xbf16>
    tpu.vector_store %arg5[%c0_112, %c8_113, %c0_114, %c0_115], %116 {strides = array<i32>} : memref<1x12x2x256xbf16, #tpu.memory_space<vmem>>, vector<1x1x2x256xbf16>,
    %c0_116 = arith.constant 0 : index
    %c0_117 = arith.constant 0 : index
    %c0_118 = arith.constant 0 : index
    %117 = vector.load %arg2[%c0_116, %c0_117, %c0_118] : memref<1x2x384xbf16, #tpu.memory_space<vmem>>, vector<1x2x384xbf16>
    %118 = vector.shape_cast %117 : vector<1x2x384xbf16> to vector<2x384xbf16>
    %c9 = arith.constant 9 : index
    %c0_119 = arith.constant 0 : index
    %c0_120 = arith.constant 0 : index
    %119 = vector.load %arg3[%c9, %c0_119, %c0_120] : memref<12x384x256xbf16, #tpu.memory_space<vmem>>, vector<1x384x256xbf16>
    %120 = vector.shape_cast %119 : vector<1x384x256xbf16> to vector<384x256xbf16>
    %cst_121 = arith.constant dense<0.000000e+00> : vector<2x256xf32>
    %121 = tpu.matmul %118, %120, %cst_121 {dimension_numbers = #tpu.dot_dimension_numbers<[1], [0], [0], [1], [0, 0, 1, 1], [], []>} : vector<2x384xbf16>, vector<384x256xbf16>, vector<2x256xf32> -> vector<2x256xf32>
    %c9_122 = arith.constant 9 : index
    %c0_123 = arith.constant 0 : index
    %c0_124 = arith.constant 0 : index
    %122 = vector.load %arg4[%c9_122, %c0_123, %c0_124] : memref<12x1x256xf32, #tpu.memory_space<vmem>>, vector<1x1x256xf32>
    %123 = vector.shape_cast %122 : vector<1x1x256xf32> to vector<1x256xf32>
    %124 = vector.broadcast %123 : vector<1x256xf32> to vector<2x256xf32>
    %125 = arith.addf %121, %124 : vector<2x256xf32>
    %126 = arith.truncf %125 : vector<2x256xf32> to vector<2x256xbf16>
    %c0_125 = arith.constant 0 : index
    %c9_126 = arith.constant 9 : index
    %c0_127 = arith.constant 0 : index
    %c0_128 = arith.constant 0 : index
    %127 = vector.load %arg5[%c0_125, %c9_126, %c0_127, %c0_128] : memref<1x12x2x256xbf16, #tpu.memory_space<vmem>>, vector<1x1x2x256xbf16>
    %128 = vector.shape_cast %127 : vector<1x1x2x256xbf16> to vector<2x256xbf16>
    %129 = vector.shape_cast %126 : vector<2x256xbf16> to vector<1x1x2x256xbf16>
    tpu.vector_store %arg5[%c0_125, %c9_126, %c0_127, %c0_128], %129 {strides = array<i32>} : memref<1x12x2x256xbf16, #tpu.memory_space<vmem>>, vector<1x1x2x256xbf16>,
    %c0_129 = arith.constant 0 : index
    %c0_130 = arith.constant 0 : index
    %c0_131 = arith.constant 0 : index
    %130 = vector.load %arg2[%c0_129, %c0_130, %c0_131] : memref<1x2x384xbf16, #tpu.memory_space<vmem>>, vector<1x2x384xbf16>
    %131 = vector.shape_cast %130 : vector<1x2x384xbf16> to vector<2x384xbf16>
    %c10 = arith.constant 10 : index
    %c0_132 = arith.constant 0 : index
    %c0_133 = arith.constant 0 : index
    %132 = vector.load %arg3[%c10, %c0_132, %c0_133] : memref<12x384x256xbf16, #tpu.memory_space<vmem>>, vector<1x384x256xbf16>
    %133 = vector.shape_cast %132 : vector<1x384x256xbf16> to vector<384x256xbf16>
    %cst_134 = arith.constant dense<0.000000e+00> : vector<2x256xf32>
    %134 = tpu.matmul %131, %133, %cst_134 {dimension_numbers = #tpu.dot_dimension_numbers<[1], [0], [0], [1], [0, 0, 1, 1], [], []>} : vector<2x384xbf16>, vector<384x256xbf16>, vector<2x256xf32> -> vector<2x256xf32>
    %c10_135 = arith.constant 10 : index
    %c0_136 = arith.constant 0 : index
    %c0_137 = arith.constant 0 : index
    %135 = vector.load %arg4[%c10_135, %c0_136, %c0_137] : memref<12x1x256xf32, #tpu.memory_space<vmem>>, vector<1x1x256xf32>
    %136 = vector.shape_cast %135 : vector<1x1x256xf32> to vector<1x256xf32>
    %137 = vector.broadcast %136 : vector<1x256xf32> to vector<2x256xf32>
    %138 = arith.addf %134, %137 : vector<2x256xf32>
    %139 = arith.truncf %138 : vector<2x256xf32> to vector<2x256xbf16>
    %c0_138 = arith.constant 0 : index
    %c10_139 = arith.constant 10 : index
    %c0_140 = arith.constant 0 : index
    %c0_141 = arith.constant 0 : index
    %140 = vector.load %arg5[%c0_138, %c10_139, %c0_140, %c0_141] : memref<1x12x2x256xbf16, #tpu.memory_space<vmem>>, vector<1x1x2x256xbf16>
    %141 = vector.shape_cast %140 : vector<1x1x2x256xbf16> to vector<2x256xbf16>
    %142 = vector.shape_cast %139 : vector<2x256xbf16> to vector<1x1x2x256xbf16>
    tpu.vector_store %arg5[%c0_138, %c10_139, %c0_140, %c0_141], %142 {strides = array<i32>} : memref<1x12x2x256xbf16, #tpu.memory_space<vmem>>, vector<1x1x2x256xbf16>,
    %c0_142 = arith.constant 0 : index
    %c0_143 = arith.constant 0 : index
    %c0_144 = arith.constant 0 : index
    %143 = vector.load %arg2[%c0_142, %c0_143, %c0_144] : memref<1x2x384xbf16, #tpu.memory_space<vmem>>, vector<1x2x384xbf16>
    %144 = vector.shape_cast %143 : vector<1x2x384xbf16> to vector<2x384xbf16>
    %c11 = arith.constant 11 : index
    %c0_145 = arith.constant 0 : index
    %c0_146 = arith.constant 0 : index
    %145 = vector.load %arg3[%c11, %c0_145, %c0_146] : memref<12x384x256xbf16, #tpu.memory_space<vmem>>, vector<1x384x256xbf16>
    %146 = vector.shape_cast %145 : vector<1x384x256xbf16> to vector<384x256xbf16>
    %cst_147 = arith.constant dense<0.000000e+00> : vector<2x256xf32>
    %147 = tpu.matmul %144, %146, %cst_147 {dimension_numbers = #tpu.dot_dimension_numbers<[1], [0], [0], [1], [0, 0, 1, 1], [], []>} : vector<2x384xbf16>, vector<384x256xbf16>, vector<2x256xf32> -> vector<2x256xf32>
    %c11_148 = arith.constant 11 : index
    %c0_149 = arith.constant 0 : index
    %c0_150 = arith.constant 0 : index
    %148 = vector.load %arg4[%c11_148, %c0_149, %c0_150] : memref<12x1x256xf32, #tpu.memory_space<vmem>>, vector<1x1x256xf32>
    %149 = vector.shape_cast %148 : vector<1x1x256xf32> to vector<1x256xf32>
    %150 = vector.broadcast %149 : vector<1x256xf32> to vector<2x256xf32>
    %151 = arith.addf %147, %150 : vector<2x256xf32>
    %152 = arith.truncf %151 : vector<2x256xf32> to vector<2x256xbf16>
    %c0_151 = arith.constant 0 : index
    %c11_152 = arith.constant 11 : index
    %c0_153 = arith.constant 0 : index
    %c0_154 = arith.constant 0 : index
    %153 = vector.load %arg5[%c0_151, %c11_152, %c0_153, %c0_154] : memref<1x12x2x256xbf16, #tpu.memory_space<vmem>>, vector<1x1x2x256xbf16>
    %154 = vector.shape_cast %153 : vector<1x1x2x256xbf16> to vector<2x256xbf16>
    %155 = vector.shape_cast %152 : vector<2x256xbf16> to vector<1x1x2x256xbf16>
    tpu.vector_store %arg5[%c0_151, %c11_152, %c0_153, %c0_154], %155 {strides = array<i32>} : memref<1x12x2x256xbf16, #tpu.memory_space<vmem>>, vector<1x1x2x256xbf16>,
    return
  }
  func.func @transform_0(%arg0: i32, %arg1: i32) -> (i32, i32, i32) {
    %c0_i32 = arith.constant 0 : i32
    %c0_i32_0 = arith.constant 0 : i32
    return %arg0, %arg1, %c0_i32 : i32, i32, i32
  }
  func.func @transform_1(%arg0: i32, %arg1: i32) -> (i32, i32, i32) {
    %c0_i32 = arith.constant 0 : i32
    %c0_i32_0 = arith.constant 0 : i32
    %c0_i32_1 = arith.constant 0 : i32
    %c0_i32_2 = arith.constant 0 : i32
    return %c0_i32, %c0_i32_0, %c0_i32_1 : i32, i32, i32
  }
  func.func @transform_2(%arg0: i32, %arg1: i32) -> (i32, i32, i32) {
    %c0_i32 = arith.constant 0 : i32
    %c0_i32_0 = arith.constant 0 : i32
    %c0_i32_1 = arith.constant 0 : i32
    %c0_i32_2 = arith.constant 0 : i32
    return %c0_i32, %c0_i32_0, %c0_i32_1 : i32, i32, i32
  }
  func.func @transform_3(%arg0: i32, %arg1: i32) -> (i32, i32, i32, i32) {
    %c0_i32 = arith.constant 0 : i32
    %c0_i32_0 = arith.constant 0 : i32
    %c0_i32_1 = arith.constant 0 : i32
    return %arg0, %c0_i32, %arg1, %c0_i32_0 : i32, i32, i32, i32
  }
}

</mosaic_0001>

<bundles_post_ra>
// kernel: timegcn_forward.1
= control target key start
LH: loop header
LB: loop body
LE: loop exit
PB: predicated region body
PF: predicated region fallthrough
CT: control target
= control target key end

     0   :  { %s7670_s12 = smov 0   ;;  %s7672_s13 = smov 0   ;;  %s9629_s0 = inlined_call_operand.vmem [shape: bf16[2,2,384], index: 0, kind: input, shape index: {}]   ;;  %s9630_s1 = inlined_call_operand.vmem [shape: bf16[12,384,256], index: 1, kind: input, shape index: {}]   ;;  %s9631_s2 = inlined_call_operand.vmem [shape: f32[12,1,256], index: 2, kind: input, shape index: {}]   ;;  %s9632_s3 = inlined_call_operand.vmem [shape: bf16[2,12,2,256], index: 3, kind: output, shape index: {}]  }
   0x1   :  { %s7674_s14 = smov 0  }
   0x2 LB: > { %s25_s15 = sadd.s32 1, %s7642_s13  ;;  %p5495_p0 = scmp.ge.s32.totalorder %s7646_s14, 1  ;;  %s7646_s14 = sphi %s7674_s14, %s13_s14   ;;  %s7642_s13 = sphi %s7672_s13, %s9634_s13   ;;  %s7638_s12 = sphi %s7670_s12, %s9633_s12  }
   0x3   : > { %p27_p1 = scmp.ge.s32.totalorder %s25_s15, 2  ;;  %p156_p2 = scmp.lt.s32.totalorder %s7646_s14, 3 }
   0x5   : > { %s9636_s15 = smov (%p27_p1, %s25_s15), 0  ;;  %p157_p3 = pnand %p5495_p0, %p156_p2 }
   0x6   : > { %v6760_v0 = vld [vmem:[%s9630_s1 + $0x4] ss:$8 sps:$4 sm:$0xff] (!%p157_p3)   ;;  %v6764_v2 = vld [vmem:[%s9630_s1] ss:$8 sps:$4 sm:$0xff] (!%p157_p3)   ;;  %v6766_v4 = vld [vmem:[%s9630_s1 + $0x14] ss:$8 sps:$4 sm:$0xff] (!%p157_p3)   ;;  %v254_v38 = vlaneseq (!%p157_p3) }
   0x7   : > { %160 = sbr.rel (%p157_p3) target bundleno = 804 (0x324), region = 32  ;;  %v6762_v1 = vld [vmem:[%s9630_s1 + $0x184] ss:$8 sps:$4 sm:$0xff] (!%p157_p3)   ;;  %531 = vmatprep.subr.bf16.mxu0 (!%p157_p3), %v6760_v0  ;;  %v6765_v3 = vld [vmem:[%s9630_s1 + $0x180] ss:$8 sps:$4 sm:$0xff] (!%p157_p3)   ;;  %p186_p4 = scmp.lt.s32.totalorder (!%p157_p3), %s7638_s12, 1 }
   0x8   : > { %964 = vmatprep.subr.bf16.mxu1 (!%p157_p3), %v6762_v1  ;;  %532 = vmatpush1.bf16.msra.mxu0 (!%p157_p3), %v6764_v2  ;;  %v6768_v5 = vld [vmem:[%s9630_s1 + $0x194] ss:$8 sps:$4 sm:$0xff] (!%p157_p3)   ;;  %v6770_v6 = vld [vmem:[%s9630_s1 + $0x10] ss:$8 sps:$4 sm:$0xff] (!%p157_p3)   ;;  %v6772_v8 = vld [vmem:[%s9630_s1 + $0x24] ss:$8 sps:$4 sm:$0xff] (!%p157_p3)  }
   0x9   : > { %965 = vmatpush1.bf16.msra.mxu1 (!%p157_p3), %v6765_v3  ;;  %533 = vmatprep.subr.bf16.mxu0 (!%p157_p3), %v6766_v4  ;;  %v6771_v7 = vld [vmem:[%s9630_s1 + $0x190] ss:$8 sps:$4 sm:$0xff] (!%p157_p3)   ;;  %v6774_v9 = vld [vmem:[%s9630_s1 + $0x1a4] ss:$8 sps:$4 sm:$0xff] (!%p157_p3)   ;;  %v6776_v10 = vld [vmem:[%s9630_s1 + $0x20] ss:$8 sps:$4 sm:$0xff] (!%p157_p3)  }
   0xa   : > { %966 = vmatprep.subr.bf16.mxu1 (!%p157_p3), %v6768_v5  ;;  %v6777_v11 = vld [vmem:[%s9630_s1 + $0x1a0] ss:$8 sps:$4 sm:$0xff] (!%p157_p3)   ;;  %v6778_v12 = vld [vmem:[%s9630_s1 + $0x34] ss:$8 sps:$4 sm:$0xff] (!%p157_p3)   ;;  %v6782_v14 = vld [vmem:[%s9630_s1 + $0x30] ss:$8 sps:$4 sm:$0xff] (!%p157_p3)  }
   0xb   : > { %v6780_v13 = vld [vmem:[%s9630_s1 + $0x1b4] ss:$8 sps:$4 sm:$0xff] (!%p157_p3)   ;;  %v6783_v15 = vld [vmem:[%s9630_s1 + $0x1b0] ss:$8 sps:$4 sm:$0xff] (!%p157_p3)   ;;  %v6784_v16 = vld [vmem:[%s9630_s1 + $0x44] ss:$8 sps:$4 sm:$0xff] (!%p157_p3)  }
   0xc   : > { %534 = vmatpush1.bf16.msra.mxu0 (!%p157_p3), %v6770_v6  ;;  %v6786_v17 = vld [vmem:[%s9630_s1 + $0x1c4] ss:$8 sps:$4 sm:$0xff] (!%p157_p3)   ;;  %v6788_v18 = vld [vmem:[%s9630_s1 + $0x40] ss:$8 sps:$4 sm:$0xff] (!%p157_p3)   ;;  %v6790_v20 = vld [vmem:[%s9630_s1 + $0x54] ss:$8 sps:$4 sm:$0xff] (!%p157_p3)  }
   0xd   : > { %967 = vmatpush1.bf16.msra.mxu1 (!%p157_p3), %v6771_v7  ;;  %535 = vmatprep.subr.bf16.mxu0 (!%p157_p3), %v6772_v8  ;;  %v6789_v19 = vld [vmem:[%s9630_s1 + $0x1c0] ss:$8 sps:$4 sm:$0xff] (!%p157_p3)   ;;  %v6792_v21 = vld [vmem:[%s9630_s1 + $0x1d4] ss:$8 sps:$4 sm:$0xff] (!%p157_p3)   ;;  %v6794_v22 = vld [vmem:[%s9630_s1 + $0x50] ss:$8 sps:$4 sm:$0xff] (!%p157_p3)  }
   0xe   : > { %968 = vmatprep.subr.bf16.mxu1 %v6774_v9  ;;  %v6795_v23 = vld [vmem:[%s9630_s1 + $0x1d0] ss:$8 sps:$4 sm:$0xff]   ;;  %v6796_v24 = vld [vmem:[%s9630_s1 + $0x64] ss:$8 sps:$4 sm:$0xff]   ;;  %v6800_v26 = vld [vmem:[%s9630_s1 + $0x60] ss:$8 sps:$4 sm:$0xff]  }
   0xf   : > { %v6798_v25 = vld [vmem:[%s9630_s1 + $0x1e4] ss:$8 sps:$4 sm:$0xff]   ;;  %v6801_v27 = vld [vmem:[%s9630_s1 + $0x1e0] ss:$8 sps:$4 sm:$0xff]   ;;  %v6802_v28 = vld [vmem:[%s9630_s1 + $0x74] ss:$8 sps:$4 sm:$0xff]  }
  0x10   : > { %536 = vmatpush1.bf16.msra.mxu0 %v6776_v10  ;;  %v6804_v29 = vld [vmem:[%s9630_s1 + $0x1f4] ss:$8 sps:$4 sm:$0xff]   ;;  %v6806_v30 = vld [vmem:[%s9630_s1 + $0x70] ss:$8 sps:$4 sm:$0xff]   ;;  %v6808_v32 = vld [vmem:[%s9630_s1 + $0x84] ss:$8 sps:$4 sm:$0xff]  }
  0x11   : > { %969 = vmatpush1.bf16.msra.mxu1 %v6777_v11  ;;  %537 = vmatprep.subr.bf16.mxu0 %v6778_v12  ;;  %v6807_v31 = vld [vmem:[%s9630_s1 + $0x1f0] ss:$8 sps:$4 sm:$0xff]   ;;  %v6810_v33 = vld [vmem:[%s9630_s1 + $0x204] ss:$8 sps:$4 sm:$0xff]   ;;  %v6812_v34 = vld [vmem:[%s9630_s1 + $0x80] ss:$8 sps:$4 sm:$0xff]  }
  0x12   : > { %970 = vmatprep.subr.bf16.mxu1 %v6780_v13  ;;  %v6813_v35 = vld [vmem:[%s9630_s1 + $0x200] ss:$8 sps:$4 sm:$0xff]   ;;  %v6814_v36 = vld [vmem:[%s9630_s1 + $0x94] ss:$8 sps:$4 sm:$0xff]   ;;  %s9638_s12 = smov (!%p186_p4, %s7638_s12), 1  ;;  %v7821_v45 = vshrl.u32 %v254_v38, 7 }
  0x13   : > { %v6816_v37 = vld [vmem:[%s9630_s1 + $0x214] ss:$8 sps:$4 sm:$0xff]   ;;  %v7648_v39 = vmov 1966171168   ;;  %v6818_v41 = vld [vmem:[%s9630_s1 + $0x90] ss:$8 sps:$4 sm:$0xff]  }
  0x14   : > { %538 = vmatpush1.bf16.msra.mxu0 %v6782_v14  ;;  %v274_v40 = vunpack.c.l.s4 %v7648_v39  ;;  %v6819_v42 = vld [vmem:[%s9630_s1 + $0x210] ss:$8 sps:$4 sm:$0xff]   ;;  %v6820_v43 = vld [vmem:[%s9630_s1 + $0xa4] ss:$8 sps:$4 sm:$0xff]   ;;  %s6732_s29 = smul.u32 3, %s9638_s12 }
  0x15   : > { %971 = vmatpush1.bf16.msra.mxu1 %v6783_v15  ;;  %539 = vmatprep.subr.bf16.mxu0 %v6784_v16  ;;  %v6822_v44 = vld [vmem:[%s9630_s1 + $0x224] ss:$8 sps:$4 sm:$0xff]   ;;  %v6824_v47 = vld [vmem:[%s9630_s1 + $0xa0] ss:$8 sps:$4 sm:$0xff]   ;;  %v6826_v49 = vld [vmem:[%s9630_s1 + $0xb4] ss:$8 sps:$4 sm:$0xff]  }
  0x16   : > { %972 = vmatprep.subr.bf16.mxu1 %v6786_v17  ;;  %v275_v46 = vunpack.c.0.s8 %v274_v40  ;;  %v6825_v48 = vld [vmem:[%s9630_s1 + $0x220] ss:$8 sps:$4 sm:$0xff]   ;;  %s7835_s17 = scalar_lea.vmem %s9629_s0, %s6732_s29  ;;  %v6828_v50 = vld [vmem:[%s9630_s1 + $0x234] ss:$8 sps:$4 sm:$0xff]   ;;  %v6830_v53 = vld [vmem:[%s9630_s1 + $0xb0] ss:$8 sps:$4 sm:$0xff]  }
  0x17   : > { %v5496_v52 = vld.sshfl [vmem:[%s7835_s17] sm:$0x13 pattern:$0x75316420]  ;;  %v6831_v54 = vld [vmem:[%s9630_s1 + $0x230] ss:$8 sps:$4 sm:$0xff]  }
  0x18   : > { %540 = vmatpush1.bf16.msra.mxu0 %v6788_v18  ;;  %v7841_v51 = vsub.s32 %v275_v46, %v7821_v45  ;;  %v272_v55 = vcombine.high %v5496_v52, %v5496_v52  ;;  %v6832_v56 = vld [vmem:[%s9630_s1 + $0xc4] ss:$8 sps:$4 sm:$0xff]   ;;  %v6836_v59 = vld [vmem:[%s9630_s1 + $0xc0] ss:$8 sps:$4 sm:$0xff]   ;;  %v6838_v61 = vld [vmem:[%s9630_s1 + $0xd4] ss:$8 sps:$4 sm:$0xff]  }
  0x19   : > { %973 = vmatpush1.bf16.msra.mxu1 %v6789_v19  ;;  %541 = vmatprep.subr.bf16.mxu0 %v6790_v20  ;;  %v6834_v57 = vld [vmem:[%s9630_s1 + $0x244] ss:$8 sps:$4 sm:$0xff]   ;;  %v6837_v60 = vld [vmem:[%s9630_s1 + $0x240] ss:$8 sps:$4 sm:$0xff]   ;;  %v6840_v62 = vld [vmem:[%s9630_s1 + $0x254] ss:$8 sps:$4 sm:$0xff]  }
  0x1a   : > { %974 = vmatprep.subr.bf16.mxu1 %v6792_v21  ;;  %v7857_v58 = vrot.slane %v272_v55, %v7841_v51  ;;  %v6842_v63 = vld [vmem:[%s9630_s1 + $0xd0] ss:$8 sps:$4 sm:$0xff]   ;;  %v6844_v1 = vld [vmem:[%s9630_s1 + $0xe4] ss:$8 sps:$4 sm:$0xff]   ;;  %v6848_v3 = vld [vmem:[%s9630_s1 + $0xe0] ss:$8 sps:$4 sm:$0xff]   ;;  %v7913_v12 = vrot.slane %v5496_v52, %v7841_v51 }
  0x1b   : > { %v6843_v0 = vld [vmem:[%s9630_s1 + $0x250] ss:$8 sps:$4 sm:$0xff]   ;;  %v6846_v2 = vld [vmem:[%s9630_s1 + $0x264] ss:$8 sps:$4 sm:$0xff]   ;;  %v6849_v4 = vld [vmem:[%s9630_s1 + $0x260] ss:$8 sps:$4 sm:$0xff]  }
  0x1c   : > { %542 = vmatpush1.bf16.msra.mxu0 %v6794_v22  ;;  %563 = vmatprep.mubr.bf16.mxu0 %v7857_v58  ;;  %v6850_v5 = vld [vmem:[%s9630_s1 + $0xf4] ss:$8 sps:$4 sm:$0xff]   ;;  %v6854_v7 = vld [vmem:[%s9630_s1 + $0xf0] ss:$8 sps:$4 sm:$0xff]   ;;  %v6858_v9 = vld [vmem:[%s9630_s1 + $0x104] ss:$8 sps:$4 sm:$0xff]   ;;  %v8014_v46 = vcombine.high %v7913_v12, %v7913_v12 }
  0x1d   : > { %975 = vmatpush1.bf16.msra.mxu1 %v6795_v23  ;;  %543 = vmatprep.subr.bf16.mxu0 %v6796_v24  ;;  %v6852_v6 = vld [vmem:[%s9630_s1 + $0x274] ss:$8 sps:$4 sm:$0xff]   ;;  %v6855_v8 = vld [vmem:[%s9630_s1 + $0x270] ss:$8 sps:$4 sm:$0xff]   ;;  %v6861_v10 = vld [vmem:[%s9630_s1 + $0x284] ss:$8 sps:$4 sm:$0xff]  }
  0x1e   : > { %976 = vmatprep.subr.bf16.mxu1 %v6798_v25  ;;  %996 = vmatprep.mubr.bf16.mxu1 %v7857_v58  ;;  %v6856_v11 = vld [vmem:[%s9630_s1 + $0x100] ss:$8 sps:$4 sm:$0xff]   ;;  %v6864_v14 = vld [vmem:[%s9630_s1 + $0x114] ss:$8 sps:$4 sm:$0xff]   ;;  %v6862_v16 = vld [vmem:[%s9630_s1 + $0x110] ss:$8 sps:$4 sm:$0xff]  }
  0x1f   : > { %v6859_v13 = vld [vmem:[%s9630_s1 + $0x280] ss:$8 sps:$4 sm:$0xff]   ;;  %v6867_v15 = vld [vmem:[%s9630_s1 + $0x294] ss:$8 sps:$4 sm:$0xff]   ;;  %v6865_v17 = vld [vmem:[%s9630_s1 + $0x290] ss:$8 sps:$4 sm:$0xff]  }
  0x20   : > { %544 = vmatpush1.bf16.msra.mxu0 %v6800_v26  ;;  %v6870_v18 = vld [vmem:[%s9630_s1 + $0x124] ss:$8 sps:$4 sm:$0xff]   ;;  %v7649_v20 = vmov 0   ;;  %v6868_v21 = vld [vmem:[%s9630_s1 + $0x120] ss:$8 sps:$4 sm:$0xff]   ;;  %s6733_s5 = smul.u32 24, %s9638_s12 }
  0x21   : > { %977 = vmatpush1.bf16.msra.mxu1 %v6801_v27  ;;  %545 = vmatprep.subr.bf16.mxu0 %v6802_v28  ;;  %v6873_v19 = vld [vmem:[%s9630_s1 + $0x2a4] ss:$8 sps:$4 sm:$0xff]   ;;  %v6871_v22 = vld [vmem:[%s9630_s1 + $0x2a0] ss:$8 sps:$4 sm:$0xff]   ;;  %v6876_v23 = vld [vmem:[%s9630_s1 + $0x134] ss:$8 sps:$4 sm:$0xff]  }
  0x22   : > { %978 = vmatprep.subr.bf16.mxu1 %v6804_v29  ;;  %v6879_v24 = vld [vmem:[%s9630_s1 + $0x2b4] ss:$8 sps:$4 sm:$0xff]   ;;  %v6874_v25 = vld [vmem:[%s9630_s1 + $0x130] ss:$8 sps:$4 sm:$0xff]   ;;  %v6882_v27 = vld [vmem:[%s9630_s1 + $0x144] ss:$8 sps:$4 sm:$0xff]   ;;  %s8732_s20 = scalar_lea.vmem %s9632_s3, %s6733_s5 }
  0x23   : > { %v6877_v26 = vld [vmem:[%s9630_s1 + $0x2b0] ss:$8 sps:$4 sm:$0xff]   ;;  %v6885_v28 = vld [vmem:[%s9630_s1 + $0x2c4] ss:$8 sps:$4 sm:$0xff]   ;;  %v6880_v29 = vld [vmem:[%s9630_s1 + $0x140] ss:$8 sps:$4 sm:$0xff]  }
  0x24   : > { %546 = vmatpush1.bf16.msra.mxu0 %v6806_v30  ;;  %v6883_v30 = vld [vmem:[%s9630_s1 + $0x2c0] ss:$8 sps:$4 sm:$0xff]   ;;  %v6900_v39 = vld [vmem:[%s9630_s1 + $0x174] ss:$8 sps:$4 sm:$0xff]   ;;  %v6910_v52 = vld [vmem:[%s9630_s1 + $0x310] ss:$8 sps:$4 sm:$0xff]  }
  0x25   : > { %979 = vmatpush1.bf16.msra.mxu1 %v6807_v31  ;;  %547 = vmatprep.subr.bf16.mxu0 %v6808_v32  ;;  %v6888_v31 = vld [vmem:[%s9630_s1 + $0x154] ss:$8 sps:$4 sm:$0xff]   ;;  %v6895_v38 = vld [vmem:[%s9630_s1 + $0x2e0] ss:$8 sps:$4 sm:$0xff]   ;;  %v6921_v55 = vld [vmem:[%s9630_s1 + $0x4a4] ss:$8 sps:$4 sm:$0xff]  }
  0x26   : > { %980 = vmatprep.subr.bf16.mxu1 %v6810_v33  ;;  %v6891_v32 = vld [vmem:[%s9630_s1 + $0x2d4] ss:$8 sps:$4 sm:$0xff]   ;;  %v6886_v33 = vld [vmem:[%s9630_s1 + $0x150] ss:$8 sps:$4 sm:$0xff]  }
  0x27   : > { %v6903_v40 = vld [vmem:[%s9630_s1 + $0x2f4] ss:$8 sps:$4 sm:$0xff]  }
  0x28   : > { %548 = vmatpush1.bf16.msra.mxu0 %v6812_v34  ;;  %v6889_v34 = vld [vmem:[%s9630_s1 + $0x2d0] ss:$8 sps:$4 sm:$0xff]  }
  0x29   : > { %981 = vmatpush1.bf16.msra.mxu1 %v6813_v35  ;;  %549 = vmatprep.subr.bf16.mxu0 %v6814_v36  ;;  %v6894_v35 = vld [vmem:[%s9630_s1 + $0x164] ss:$8 sps:$4 sm:$0xff]  }
  0x2a   : > { %982 = vmatprep.subr.bf16.mxu1 %v6816_v37  ;;  %v6897_v36 = vld [vmem:[%s9630_s1 + $0x2e4] ss:$8 sps:$4 sm:$0xff]   ;;  %v6892_v37 = vld [vmem:[%s9630_s1 + $0x160] ss:$8 sps:$4 sm:$0xff]  }
  0x2c   : > { %550 = vmatpush1.bf16.msra.mxu0 %v6818_v41  ;;  %v6898_v41 = vld [vmem:[%s9630_s1 + $0x170] ss:$8 sps:$4 sm:$0xff]  }
  0x2d   : > { %983 = vmatpush1.bf16.msra.mxu1 %v6819_v42  ;;  %551 = vmatprep.subr.bf16.mxu0 %v6820_v43  ;;  %v6901_v42 = vld [vmem:[%s9630_s1 + $0x2f0] ss:$8 sps:$4 sm:$0xff]   ;;  %v6906_v43 = vld [vmem:[%s9630_s1 + $0x304] ss:$8 sps:$4 sm:$0xff]  }
  0x2e   : > { %984 = vmatprep.subr.bf16.mxu1 %v6822_v44  ;;  %v6909_v44 = vld [vmem:[%s9630_s1 + $0x484] ss:$8 sps:$4 sm:$0xff]  }
  0x30   : > { %552 = vmatpush1.bf16.msra.mxu0 %v6824_v47  ;;  %v6904_v47 = vld [vmem:[%s9630_s1 + $0x300] ss:$8 sps:$4 sm:$0xff]  }
  0x31   : > { %985 = vmatpush1.bf16.msra.mxu1 %v6825_v48  ;;  %553 = vmatprep.subr.bf16.mxu0 %v6826_v49  ;;  %v6907_v48 = vld [vmem:[%s9630_s1 + $0x480] ss:$8 sps:$4 sm:$0xff]   ;;  %v6912_v49 = vld [vmem:[%s9630_s1 + $0x314] ss:$8 sps:$4 sm:$0xff]  }
  0x32   : > { %986 = vmatprep.subr.bf16.mxu1 %v6828_v50  ;;  %v6915_v50 = vld [vmem:[%s9630_s1 + $0x494] ss:$8 sps:$4 sm:$0xff]  }
  0x34   : > { %554 = vmatpush1.bf16.msra.mxu0 %v6830_v53  ;;  %v6913_v53 = vld [vmem:[%s9630_s1 + $0x490] ss:$8 sps:$4 sm:$0xff]  }
  0x35   : > { %987 = vmatpush1.bf16.msra.mxu1 %v6831_v54  ;;  %555 = vmatprep.subr.bf16.mxu0 %v6832_v56  ;;  %v6918_v54 = vld [vmem:[%s9630_s1 + $0x324] ss:$8 sps:$4 sm:$0xff]   ;;  %v6916_v56 = vld [vmem:[%s9630_s1 + $0x320] ss:$8 sps:$4 sm:$0xff]  }
  0x36   : > { %988 = vmatprep.subr.bf16.mxu1 %v6834_v57  ;;  %v6919_v57 = vld [vmem:[%s9630_s1 + $0x4a0] ss:$8 sps:$4 sm:$0xff]  }
  0x38   : > { %556 = vmatpush1.bf16.msra.mxu0 %v6836_v59  ;;  %v6924_v59 = vld [vmem:[%s9630_s1 + $0x334] ss:$8 sps:$4 sm:$0xff]  }
  0x39   : > { %989 = vmatpush1.bf16.msra.mxu1 %v6837_v60  ;;  %557 = vmatprep.subr.bf16.mxu0 %v6838_v61  ;;  %v6922_v60 = vld [vmem:[%s9630_s1 + $0x330] ss:$8 sps:$4 sm:$0xff]  }
  0x3a   : > { %990 = vmatprep.subr.bf16.mxu1 %v6840_v62  ;;  %v6925_v61 = vld [vmem:[%s9630_s1 + $0x4b0] ss:$8 sps:$4 sm:$0xff]   ;;  %v6930_v62 = vld [vmem:[%s9630_s1 + $0x344] ss:$8 sps:$4 sm:$0xff]  }
  0x3c   : > { %558 = vmatpush1.bf16.msra.mxu0 %v6842_v63  ;;  %v6933_v63 = vld [vmem:[%s9630_s1 + $0x4c4] ss:$8 sps:$4 sm:$0xff]  }
  0x3d   : > { %991 = vmatpush1.bf16.msra.mxu1 %v6843_v0  ;;  %559 = vmatprep.subr.bf16.mxu0 %v6844_v1  ;;  %v6928_v0 = vld [vmem:[%s9630_s1 + $0x340] ss:$8 sps:$4 sm:$0xff]  }
  0x3e   : > { %992 = vmatprep.subr.bf16.mxu1 %v6846_v2  ;;  %v6931_v1 = vld [vmem:[%s9630_s1 + $0x4c0] ss:$8 sps:$4 sm:$0xff]   ;;  %v6936_v2 = vld [vmem:[%s9630_s1 + $0x354] ss:$8 sps:$4 sm:$0xff]  }
  0x40   : > { %560 = vmatpush1.bf16.msra.mxu0 %v6848_v3  ;;  %v6939_v3 = vld [vmem:[%s9630_s1 + $0x4d4] ss:$8 sps:$4 sm:$0xff]  }
  0x41   : > { %993 = vmatpush1.bf16.msra.mxu1 %v6849_v4  ;;  %561 = vmatprep.subr.bf16.mxu0 %v6850_v5  ;;  %v6934_v4 = vld [vmem:[%s9630_s1 + $0x350] ss:$8 sps:$4 sm:$0xff]  }
  0x42   : > { %994 = vmatprep.subr.bf16.mxu1 %v6852_v6  ;;  %v6937_v5 = vld [vmem:[%s9630_s1 + $0x4d0] ss:$8 sps:$4 sm:$0xff]   ;;  %v6942_v6 = vld [vmem:[%s9630_s1 + $0x364] ss:$8 sps:$4 sm:$0xff]  }
  0x44   : > { %562 = vmatpush1.bf16.msra.mxu0 %v6854_v7  ;;  %v6945_v7 = vld [vmem:[%s9630_s1 + $0x4e4] ss:$8 sps:$4 sm:$0xff]  }
  0x45   : > { %995 = vmatpush1.bf16.msra.mxu1 %v6855_v8  ;;  %572 = vmatprep.subr.bf16.mxu0 %v6858_v9  ;;  %v6940_v8 = vld [vmem:[%s9630_s1 + $0x360] ss:$8 sps:$4 sm:$0xff]  }
  0x46   : > { %1005 = vmatprep.subr.bf16.mxu1 %v6861_v10  ;;  %v6943_v9 = vld [vmem:[%s9630_s1 + $0x4e0] ss:$8 sps:$4 sm:$0xff]   ;;  %v6948_v10 = vld [vmem:[%s9630_s1 + $0x374] ss:$8 sps:$4 sm:$0xff]  }
  0x47   : > { %564 = vmatmul.mubr.bf16.vlgmr.msra.gmra.mrb[0].mxu0 %v7913_v12 }
  0x48   : > { %997 = vmatmul.mubr.bf16.vlgmr.msra.gmra.mrb[0].mxu1 %v7913_v12  ;;  %573 = vmatpush1.bf16.msra.mxu0 %v6856_v11  ;;  %v6951_v11 = vld [vmem:[%s9630_s1 + $0x4f4] ss:$8 sps:$4 sm:$0xff]  }
  0x49   : > { %1006 = vmatpush1.bf16.msra.mxu1 %v6859_v13  ;;  %574 = vmatprep.subr.bf16.mxu0 %v6864_v14  ;;  %v6946_v13 = vld [vmem:[%s9630_s1 + $0x370] ss:$8 sps:$4 sm:$0xff]  }
  0x4a   : > { %1007 = vmatprep.subr.bf16.mxu1 %v6867_v15  ;;  %604 = vmatprep.mubr.bf16.mxu0 %v7649_v20  ;;  %v6949_v14 = vld [vmem:[%s9630_s1 + $0x4f0] ss:$8 sps:$4 sm:$0xff]   ;;  %v6954_v15 = vld [vmem:[%s9630_s1 + $0x384] ss:$8 sps:$4 sm:$0xff]  }
  0x4b   : > { %1037 = vmatprep.mubr.bf16.mxu1 %v7649_v20 }
  0x4c   : > { %575 = vmatpush1.bf16.msra.mxu0 %v6862_v16  ;;  %v6957_v16 = vld [vmem:[%s9630_s1 + $0x504] ss:$8 sps:$4 sm:$0xff]  }
  0x4d   : > { %1008 = vmatpush1.bf16.msra.mxu1 %v6865_v17  ;;  %576 = vmatprep.subr.bf16.mxu0 %v6870_v18  ;;  %v6952_v17 = vld [vmem:[%s9630_s1 + $0x380] ss:$8 sps:$4 sm:$0xff]  }
  0x4e   : > { %1009 = vmatprep.subr.bf16.mxu1 %v6873_v19  ;;  %v6955_v18 = vld [vmem:[%s9630_s1 + $0x500] ss:$8 sps:$4 sm:$0xff]   ;;  %v6960_v19 = vld [vmem:[%s9630_s1 + $0x394] ss:$8 sps:$4 sm:$0xff]  }
  0x50   : > { %577 = vmatpush1.bf16.msra.mxu0 %v6868_v21  ;;  %v6963_v21 = vld [vmem:[%s9630_s1 + $0x514] ss:$8 sps:$4 sm:$0xff]  }
  0x51   : > { %1010 = vmatpush1.bf16.msra.mxu1 %v6871_v22  ;;  %578 = vmatprep.subr.bf16.mxu0 %v6876_v23  ;;  %v6958_v22 = vld [vmem:[%s9630_s1 + $0x390] ss:$8 sps:$4 sm:$0xff]  }
  0x52   : > { %1011 = vmatprep.subr.bf16.mxu1 %v6879_v24  ;;  %v6961_v23 = vld [vmem:[%s9630_s1 + $0x510] ss:$8 sps:$4 sm:$0xff]   ;;  %v6966_v24 = vld [vmem:[%s9630_s1 + $0x3a4] ss:$8 sps:$4 sm:$0xff]  }
  0x54   : > { %579 = vmatpush1.bf16.msra.mxu0 %v6874_v25  ;;  %v6969_v25 = vld [vmem:[%s9630_s1 + $0x524] ss:$8 sps:$4 sm:$0xff]  }
  0x55   : > { %1012 = vmatpush1.bf16.msra.mxu1 %v6877_v26  ;;  %580 = vmatprep.subr.bf16.mxu0 %v6882_v27  ;;  %v6964_v26 = vld [vmem:[%s9630_s1 + $0x3a0] ss:$8 sps:$4 sm:$0xff]  }
  0x56   : > { %1013 = vmatprep.subr.bf16.mxu1 %v6885_v28  ;;  %v6967_v27 = vld [vmem:[%s9630_s1 + $0x520] ss:$8 sps:$4 sm:$0xff]   ;;  %v6972_v28 = vld [vmem:[%s9630_s1 + $0x3b4] ss:$8 sps:$4 sm:$0xff]  }
  0x58   : > { %581 = vmatpush1.bf16.msra.mxu0 %v6880_v29  ;;  %v6975_v29 = vld [vmem:[%s9630_s1 + $0x534] ss:$8 sps:$4 sm:$0xff]  }
  0x59   : > { %1014 = vmatpush1.bf16.msra.mxu1 %v6883_v30  ;;  %582 = vmatprep.subr.bf16.mxu0 %v6888_v31  ;;  %v6970_v30 = vld [vmem:[%s9630_s1 + $0x3b0] ss:$8 sps:$4 sm:$0xff]  }
  0x5a   : > { %1015 = vmatprep.subr.bf16.mxu1 %v6891_v32  ;;  %v6973_v31 = vld [vmem:[%s9630_s1 + $0x530] ss:$8 sps:$4 sm:$0xff]   ;;  %v6978_v32 = vld [vmem:[%s9630_s1 + $0x3c4] ss:$8 sps:$4 sm:$0xff]  }
  0x5c   : > { %583 = vmatpush1.bf16.msra.mxu0 %v6886_v33  ;;  %v6981_v33 = vld [vmem:[%s9630_s1 + $0x544] ss:$8 sps:$4 sm:$0xff]  }
  0x5d   : > { %1016 = vmatpush1.bf16.msra.mxu1 %v6889_v34  ;;  %584 = vmatprep.subr.bf16.mxu0 %v6894_v35  ;;  %v6976_v34 = vld [vmem:[%s9630_s1 + $0x3c0] ss:$8 sps:$4 sm:$0xff]  }
  0x5e   : > { %1017 = vmatprep.subr.bf16.mxu1 %v6897_v36  ;;  %v6979_v35 = vld [vmem:[%s9630_s1 + $0x540] ss:$8 sps:$4 sm:$0xff]   ;;  %v6984_v36 = vld [vmem:[%s9630_s1 + $0x3d4] ss:$8 sps:$4 sm:$0xff]  }
  0x60   : > { %585 = vmatpush1.bf16.msra.mxu0 %v6892_v37  ;;  %v6987_v37 = vld [vmem:[%s9630_s1 + $0x554] ss:$8 sps:$4 sm:$0xff]  }
  0x61   : > { %1018 = vmatpush1.bf16.msra.mxu1 %v6895_v38  ;;  %586 = vmatprep.subr.bf16.mxu0 %v6900_v39  ;;  %v6982_v38 = vld [vmem:[%s9630_s1 + $0x3d0] ss:$8 sps:$4 sm:$0xff]  }
  0x62   : > { %1019 = vmatprep.subr.bf16.mxu1 %v6903_v40  ;;  %v6985_v39 = vld [vmem:[%s9630_s1 + $0x550] ss:$8 sps:$4 sm:$0xff]   ;;  %v6990_v40 = vld [vmem:[%s9630_s1 + $0x3e4] ss:$8 sps:$4 sm:$0xff]  }
  0x64   : > { %587 = vmatpush1.bf16.msra.mxu0 %v6898_v41  ;;  %v6993_v41 = vld [vmem:[%s9630_s1 + $0x564] ss:$8 sps:$4 sm:$0xff]  }
  0x65   : > { %1020 = vmatpush1.bf16.msra.mxu1 %v6901_v42  ;;  %1398 = vmatprep.subr.bf16.mxu0 %v6906_v43  ;;  %v6988_v42 = vld [vmem:[%s9630_s1 + $0x3e0] ss:$8 sps:$4 sm:$0xff]  }
  0x66   : > { %1832 = vmatprep.subr.bf16.mxu1 %v6909_v44  ;;  %v6991_v43 = vld [vmem:[%s9630_s1 + $0x560] ss:$8 sps:$4 sm:$0xff]   ;;  %v6996_v44 = vld [vmem:[%s9630_s1 + $0x3f4] ss:$8 sps:$4 sm:$0xff]  }
  0x67   : > { %605 = vmatmul.mubr.bf16.vlgmr.msra.gmra.mrb[0].mxu0 %v8014_v46 }
  0x68   : > { %1038 = vmatmul.mubr.bf16.vlgmr.msra.gmra.mrb[0].mxu1 %v8014_v46  ;;  %1399 = vmatpush1.bf16.msra.mxu0 %v6904_v47  ;;  %v6999_v47 = vld [vmem:[%s9630_s1 + $0x574] ss:$8 sps:$4 sm:$0xff]  }
  0x69   : > { %1833 = vmatpush1.bf16.msra.mxu1 %v6907_v48  ;;  %1400 = vmatprep.subr.bf16.mxu0 %v6912_v49  ;;  %v6994_v48 = vld [vmem:[%s9630_s1 + $0x3f0] ss:$8 sps:$4 sm:$0xff]  }
  0x6a   : > { %1834 = vmatprep.subr.bf16.mxu1 %v6915_v50  ;;  %1430 = vmatprep.mubr.bf16.mxu0 %v7857_v58  ;;  %v6997_v49 = vld [vmem:[%s9630_s1 + $0x570] ss:$8 sps:$4 sm:$0xff]   ;;  %v7002_v50 = vld [vmem:[%s9630_s1 + $0x404] ss:$8 sps:$4 sm:$0xff]  }
  0x6b   : > { %1864 = vmatprep.mubr.bf16.mxu1 %v7857_v58  ;;  %v6927_v58 = vld [vmem:[%s9630_s1 + $0x4b4] ss:$8 sps:$4 sm:$0xff]  }
  0x6c   : > { %1401 = vmatpush1.bf16.msra.mxu0 %v6910_v52  ;;  %v7005_v52 = vld [vmem:[%s9630_s1 + $0x584] ss:$8 sps:$4 sm:$0xff]  }
  0x6d   : > { %1835 = vmatpush1.bf16.msra.mxu1 %v6913_v53  ;;  %1402 = vmatprep.subr.bf16.mxu0 %v6918_v54  ;;  %v7000_v53 = vld [vmem:[%s9630_s1 + $0x400] ss:$8 sps:$4 sm:$0xff]  }
  0x6e   : > { %1836 = vmatprep.subr.bf16.mxu1 %v6921_v55  ;;  %v7003_v54 = vld [vmem:[%s9630_s1 + $0x580] ss:$8 sps:$4 sm:$0xff]   ;;  %v7008_v55 = vld [vmem:[%s9630_s1 + $0x414] ss:$8 sps:$4 sm:$0xff]  }
  0x70   : > { %1403 = vmatpush1.bf16.msra.mxu0 %v6916_v56  ;;  %v7011_v56 = vld [vmem:[%s9630_s1 + $0x594] ss:$8 sps:$4 sm:$0xff]  }
  0x71   : > { %1837 = vmatpush1.bf16.msra.mxu1 %v6919_v57  ;;  %1404 = vmatprep.subr.bf16.mxu0 %v6924_v59  ;;  %v7006_v57 = vld [vmem:[%s9630_s1 + $0x410] ss:$8 sps:$4 sm:$0xff]  }
  0x72   : > { %1838 = vmatprep.subr.bf16.mxu1 %v6927_v58  ;;  %v7009_v59 = vld [vmem:[%s9630_s1 + $0x590] ss:$8 sps:$4 sm:$0xff]   ;;  %v7014_v58 = vld [vmem:[%s9630_s1 + $0x424] ss:$8 sps:$4 sm:$0xff]  }
  0x74   : > { %1405 = vmatpush1.bf16.msra.mxu0 %v6922_v60  ;;  %v7012_v60 = vld [vmem:[%s9630_s1 + $0x420] ss:$8 sps:$4 sm:$0xff]  }
  0x75   : > { %1839 = vmatpush1.bf16.msra.mxu1 %v6925_v61  ;;  %1406 = vmatprep.subr.bf16.mxu0 %v6930_v62  ;;  %v7015_v61 = vld [vmem:[%s9630_s1 + $0x5a0] ss:$8 sps:$4 sm:$0xff]   ;;  %v7020_v62 = vld [vmem:[%s9630_s1 + $0x434] ss:$8 sps:$4 sm:$0xff]  }
  0x76   : > { %1840 = vmatprep.subr.bf16.mxu1 %v6933_v63  ;;  %v7023_v63 = vld [vmem:[%s9630_s1 + $0x5b4] ss:$8 sps:$4 sm:$0xff]  }
  0x78   : > { %1407 = vmatpush1.bf16.msra.mxu0 %v6928_v0  ;;  %v7018_v0 = vld [vmem:[%s9630_s1 + $0x430] ss:$8 sps:$4 sm:$0xff]  }
  0x79   : > { %1841 = vmatpush1.bf16.msra.mxu1 %v6931_v1  ;;  %1408 = vmatprep.subr.bf16.mxu0 %v6936_v2  ;;  %v7021_v1 = vld [vmem:[%s9630_s1 + $0x5b0] ss:$8 sps:$4 sm:$0xff]   ;;  %v7026_v2 = vld [vmem:[%s9630_s1 + $0x444] ss:$8 sps:$4 sm:$0xff]  }
  0x7a   : > { %1842 = vmatprep.subr.bf16.mxu1 %v6939_v3  ;;  %v7029_v3 = vld [vmem:[%s9630_s1 + $0x5c4] ss:$8 sps:$4 sm:$0xff]  }
  0x7c   : > { %1409 = vmatpush1.bf16.msra.mxu0 %v6934_v4  ;;  %v7024_v4 = vld [vmem:[%s9630_s1 + $0x440] ss:$8 sps:$4 sm:$0xff]  }
  0x7d   : > { %1843 = vmatpush1.bf16.msra.mxu1 %v6937_v5  ;;  %1410 = vmatprep.subr.bf16.mxu0 %v6942_v6  ;;  %v7027_v5 = vld [vmem:[%s9630_s1 + $0x5c0] ss:$8 sps:$4 sm:$0xff]   ;;  %v7032_v6 = vld [vmem:[%s9630_s1 + $0x454] ss:$8 sps:$4 sm:$0xff]  }
  0x7e   : > { %1844 = vmatprep.subr.bf16.mxu1 %v6945_v7  ;;  %v7035_v7 = vld [vmem:[%s9630_s1 + $0x5d4] ss:$8 sps:$4 sm:$0xff]  }
  0x80   : > { %1411 = vmatpush1.bf16.msra.mxu0 %v6940_v8  ;;  %v7030_v8 = vld [vmem:[%s9630_s1 + $0x450] ss:$8 sps:$4 sm:$0xff]  }
  0x81   : > { %1845 = vmatpush1.bf16.msra.mxu1 %v6943_v9  ;;  %1412 = vmatprep.subr.bf16.mxu0 %v6948_v10  ;;  %v7033_v9 = vld [vmem:[%s9630_s1 + $0x5d0] ss:$8 sps:$4 sm:$0xff]   ;;  %v7038_v10 = vld [vmem:[%s9630_s1 + $0x464] ss:$8 sps:$4 sm:$0xff]  }
  0x82   : > { %1846 = vmatprep.subr.bf16.mxu1 %v6951_v11  ;;  %v7041_v11 = vld [vmem:[%s9630_s1 + $0x5e4] ss:$8 sps:$4 sm:$0xff]  }
  0x84   : > { %1413 = vmatpush1.bf16.msra.mxu0 %v6946_v13  ;;  %v7036_v13 = vld [vmem:[%s9630_s1 + $0x460] ss:$8 sps:$4 sm:$0xff]  }
  0x85   : > { %1847 = vmatpush1.bf16.msra.mxu1 %v6949_v14  ;;  %1414 = vmatprep.subr.bf16.mxu0 %v6954_v15  ;;  %v7039_v14 = vld [vmem:[%s9630_s1 + $0x5e0] ss:$8 sps:$4 sm:$0xff]   ;;  %v7044_v15 = vld [vmem:[%s9630_s1 + $0x474] ss:$8 sps:$4 sm:$0xff]  }
  0x86   : > { %1848 = vmatprep.subr.bf16.mxu1 %v6957_v16  ;;  %v7047_v16 = vld [vmem:[%s9630_s1 + $0x5f4] ss:$8 sps:$4 sm:$0xff]  }
  0x88   : > { %1415 = vmatpush1.bf16.msra.mxu0 %v6952_v17  ;;  %v8301_v17 = vld.sshfl [vmem:[%s7835_s17] sm:$0x13 pattern:$0x75316420] }
  0x89   : > { %1849 = vmatpush1.bf16.msra.mxu1 %v6955_v18  ;;  %1416 = vmatprep.subr.bf16.mxu0 %v6960_v19  ;;  %v7042_v18 = vld [vmem:[%s9630_s1 + $0x470] ss:$8 sps:$4 sm:$0xff]  }
  0x8a   : > { %1850 = vmatprep.subr.bf16.mxu1 %v6963_v21  ;;  %v7045_v19 = vld [vmem:[%s9630_s1 + $0x5f0] ss:$8 sps:$4 sm:$0xff]   ;;  %v7050_v21 = vld [vmem:[%s9630_s1 + $0x604] ss:$8 sps:$4 sm:$0xff]  }
  0x8c   : > { %1417 = vmatpush1.bf16.msra.mxu0 %v6958_v22  ;;  %v7053_v22 = vld [vmem:[%s9630_s1 + $0x784] ss:$8 sps:$4 sm:$0xff]  }
  0x8d   : > { %1851 = vmatpush1.bf16.msra.mxu1 %v6961_v23  ;;  %1418 = vmatprep.subr.bf16.mxu0 %v6966_v24  ;;  %v2007_v23 = vcombine.high %v8301_v17, %v8301_v17  ;;  %v7048_v24 = vld [vmem:[%s9630_s1 + $0x600] ss:$8 sps:$4 sm:$0xff]  }
  0x8e   : > { %1852 = vmatprep.subr.bf16.mxu1 %v6969_v25  ;;  %v7051_v25 = vld [vmem:[%s9630_s1 + $0x780] ss:$8 sps:$4 sm:$0xff]  }
  0x90   : > { %1419 = vmatpush1.bf16.msra.mxu0 %v6964_v26  ;;  %v7056_v26 = vld [vmem:[%s9630_s1 + $0x614] ss:$8 sps:$4 sm:$0xff]  }
  0x91   : > { %1853 = vmatpush1.bf16.msra.mxu1 %v6967_v27  ;;  %1420 = vmatprep.subr.bf16.mxu0 %v6972_v28  ;;  %v7059_v27 = vld [vmem:[%s9630_s1 + $0x794] ss:$8 sps:$4 sm:$0xff]   ;;  %v8330_v28 = vrot.slane %v2007_v23, %v7841_v51 }
  0x92   : > { %1854 = vmatprep.subr.bf16.mxu1 %v6975_v29  ;;  %v7054_v29 = vld [vmem:[%s9630_s1 + $0x610] ss:$8 sps:$4 sm:$0xff]   ;;  %v7140_v23 = vld [vmem:[%s9630_s1 + $0x6f4] ss:$8 sps:$4 sm:$0xff]  }
  0x94   : > { %1421 = vmatpush1.bf16.msra.mxu0 %v6970_v30  ;;  %v7057_v30 = vld [vmem:[%s9630_s1 + $0x790] ss:$8 sps:$4 sm:$0xff]  }
  0x95   : > { %1855 = vmatpush1.bf16.msra.mxu1 %v6973_v31  ;;  %1422 = vmatprep.subr.bf16.mxu0 %v6978_v32  ;;  %v7062_v31 = vld [vmem:[%s9630_s1 + $0x624] ss:$8 sps:$4 sm:$0xff]   ;;  %v7060_v32 = vld [vmem:[%s9630_s1 + $0x620] ss:$8 sps:$4 sm:$0xff]  }
  0x96   : > { %1856 = vmatprep.subr.bf16.mxu1 %v6981_v33  ;;  %v7063_v33 = vld [vmem:[%s9630_s1 + $0x7a0] ss:$8 sps:$4 sm:$0xff]  }
  0x98   : > { %1423 = vmatpush1.bf16.msra.mxu0 %v6976_v34  ;;  %v7068_v34 = vld [vmem:[%s9630_s1 + $0x634] ss:$8 sps:$4 sm:$0xff]  }
  0x99   : > { %1857 = vmatpush1.bf16.msra.mxu1 %v6979_v35  ;;  %1424 = vmatprep.subr.bf16.mxu0 %v6984_v36  ;;  %v7071_v35 = vld [vmem:[%s9630_s1 + $0x7b4] ss:$8 sps:$4 sm:$0xff]   ;;  %v7066_v36 = vld [vmem:[%s9630_s1 + $0x630] ss:$8 sps:$4 sm:$0xff]  }
  0x9a   : > { %1858 = vmatprep.subr.bf16.mxu1 %v6987_v37  ;;  %v7069_v37 = vld [vmem:[%s9630_s1 + $0x7b0] ss:$8 sps:$4 sm:$0xff]  }
  0x9c   : > { %1425 = vmatpush1.bf16.msra.mxu0 %v6982_v38  ;;  %v7074_v38 = vld [vmem:[%s9630_s1 + $0x644] ss:$8 sps:$4 sm:$0xff]  }
  0x9d   : > { %1859 = vmatpush1.bf16.msra.mxu1 %v6985_v39  ;;  %1426 = vmatprep.subr.bf16.mxu0 %v6990_v40  ;;  %v7077_v39 = vld [vmem:[%s9630_s1 + $0x7c4] ss:$8 sps:$4 sm:$0xff]   ;;  %v7072_v40 = vld [vmem:[%s9630_s1 + $0x640] ss:$8 sps:$4 sm:$0xff]  }
  0x9e   : > { %1860 = vmatprep.subr.bf16.mxu1 %v6993_v41  ;;  %v7075_v41 = vld [vmem:[%s9630_s1 + $0x7c0] ss:$8 sps:$4 sm:$0xff]  }
  0xa0   : > { %1427 = vmatpush1.bf16.msra.mxu0 %v6988_v42  ;;  %v7080_v42 = vld [vmem:[%s9630_s1 + $0x654] ss:$8 sps:$4 sm:$0xff]  }
  0xa1   : > { %1861 = vmatpush1.bf16.msra.mxu1 %v6991_v43  ;;  %1428 = vmatprep.subr.bf16.mxu0 %v6996_v44  ;;  %v7083_v43 = vld [vmem:[%s9630_s1 + $0x7d4] ss:$8 sps:$4 sm:$0xff]   ;;  %v7078_v44 = vld [vmem:[%s9630_s1 + $0x650] ss:$8 sps:$4 sm:$0xff]  }
  0xa2   : > { %1862 = vmatprep.subr.bf16.mxu1 %v6999_v47  ;;  %v7081_v47 = vld [vmem:[%s9630_s1 + $0x7d0] ss:$8 sps:$4 sm:$0xff]  }
  0xa4   : > { %1429 = vmatpush1.bf16.msra.mxu0 %v6994_v48  ;;  %v7086_v48 = vld [vmem:[%s9630_s1 + $0x664] ss:$8 sps:$4 sm:$0xff]  }
  0xa5   : > { %1863 = vmatpush1.bf16.msra.mxu1 %v6997_v49  ;;  %1439 = vmatprep.subr.bf16.mxu0 %v7002_v50  ;;  %v7089_v49 = vld [vmem:[%s9630_s1 + $0x7e4] ss:$8 sps:$4 sm:$0xff]   ;;  %v7084_v50 = vld [vmem:[%s9630_s1 + $0x660] ss:$8 sps:$4 sm:$0xff]  }
  0xa6   : > { %1873 = vmatprep.subr.bf16.mxu1 %v7005_v52  ;;  %v7087_v52 = vld [vmem:[%s9630_s1 + $0x7e0] ss:$8 sps:$4 sm:$0xff]  }
  0xa7   : > { %1431 = vmatmul.mubr.bf16.vlgmr.msra.gmra.mrb[4].mxu0 %v7913_v12 }
  0xa8   : > { %1865 = vmatmul.mubr.bf16.vlgmr.msra.gmra.mrb[4].mxu1 %v7913_v12  ;;  %1440 = vmatpush1.bf16.msra.mxu0 %v7000_v53  ;;  %v7017_v12 = vld [vmem:[%s9630_s1 + $0x5a4] ss:$8 sps:$4 sm:$0xff]   ;;  %v7092_v53 = vld [vmem:[%s9630_s1 + $0x674] ss:$8 sps:$4 sm:$0xff]  }
  0xa9   : > { %1874 = vmatpush1.bf16.msra.mxu1 %v7003_v54  ;;  %1441 = vmatprep.subr.bf16.mxu0 %v7008_v55  ;;  %v7095_v54 = vld [vmem:[%s9630_s1 + $0x7f4] ss:$8 sps:$4 sm:$0xff]   ;;  %v7090_v55 = vld [vmem:[%s9630_s1 + $0x670] ss:$8 sps:$4 sm:$0xff]  }
  0xaa   : > { %1875 = vmatprep.subr.bf16.mxu1 %v7011_v56  ;;  %1471 = vmatprep.mubr.bf16.mxu0 %v7649_v20  ;;  %v7093_v56 = vld [vmem:[%s9630_s1 + $0x7f0] ss:$8 sps:$4 sm:$0xff]  }
  0xab   : > { %1905 = vmatprep.mubr.bf16.mxu1 %v7649_v20 }
  0xac   : > { %1442 = vmatpush1.bf16.msra.mxu0 %v7006_v57  ;;  %v7098_v57 = vld [vmem:[%s9630_s1 + $0x684] ss:$8 sps:$4 sm:$0xff]  }
  0xad   : > { %1876 = vmatpush1.bf16.msra.mxu1 %v7009_v59  ;;  %1443 = vmatprep.subr.bf16.mxu0 %v7014_v58  ;;  %v7101_v59 = vld [vmem:[%s9630_s1 + $0x804] ss:$8 sps:$4 sm:$0xff]   ;;  %v7096_v58 = vld [vmem:[%s9630_s1 + $0x680] ss:$8 sps:$4 sm:$0xff]  }
  0xae   : > { %1877 = vmatprep.subr.bf16.mxu1 %v7017_v12  ;;  %v7099_v12 = vld [vmem:[%s9630_s1 + $0x800] ss:$8 sps:$4 sm:$0xff]  }
  0xb0   : > { %1444 = vmatpush1.bf16.msra.mxu0 %v7012_v60  ;;  %v7104_v60 = vld [vmem:[%s9630_s1 + $0x694] ss:$8 sps:$4 sm:$0xff]  }
  0xb1   : > { %1878 = vmatpush1.bf16.msra.mxu1 %v7015_v61  ;;  %1445 = vmatprep.subr.bf16.mxu0 %v7020_v62  ;;  %v7107_v61 = vld [vmem:[%s9630_s1 + $0x814] ss:$8 sps:$4 sm:$0xff]   ;;  %v7102_v62 = vld [vmem:[%s9630_s1 + $0x690] ss:$8 sps:$4 sm:$0xff]  }
  0xb2   : > { %1879 = vmatprep.subr.bf16.mxu1 %v7023_v63  ;;  %v7105_v63 = vld [vmem:[%s9630_s1 + $0x810] ss:$8 sps:$4 sm:$0xff]  }
  0xb4   : > { %1446 = vmatpush1.bf16.msra.mxu0 %v7018_v0  ;;  %v7110_v0 = vld [vmem:[%s9630_s1 + $0x6a4] ss:$8 sps:$4 sm:$0xff]  }
  0xb5   : > { %1880 = vmatpush1.bf16.msra.mxu1 %v7021_v1  ;;  %1447 = vmatprep.subr.bf16.mxu0 %v7026_v2  ;;  %v7113_v1 = vld [vmem:[%s9630_s1 + $0x824] ss:$8 sps:$4 sm:$0xff]   ;;  %v7108_v2 = vld [vmem:[%s9630_s1 + $0x6a0] ss:$8 sps:$4 sm:$0xff]  }
  0xb6   : > { %1881 = vmatprep.subr.bf16.mxu1 %v7029_v3  ;;  %v7111_v3 = vld [vmem:[%s9630_s1 + $0x820] ss:$8 sps:$4 sm:$0xff]  }
  0xb8   : > { %1448 = vmatpush1.bf16.msra.mxu0 %v7024_v4  ;;  %v7116_v4 = vld [vmem:[%s9630_s1 + $0x6b4] ss:$8 sps:$4 sm:$0xff]  }
  0xb9   : > { %1882 = vmatpush1.bf16.msra.mxu1 %v7027_v5  ;;  %1449 = vmatprep.subr.bf16.mxu0 %v7032_v6  ;;  %v7119_v5 = vld [vmem:[%s9630_s1 + $0x834] ss:$8 sps:$4 sm:$0xff]   ;;  %v7114_v6 = vld [vmem:[%s9630_s1 + $0x6b0] ss:$8 sps:$4 sm:$0xff]  }
  0xba   : > { %1883 = vmatprep.subr.bf16.mxu1 %v7035_v7  ;;  %v7117_v7 = vld [vmem:[%s9630_s1 + $0x830] ss:$8 sps:$4 sm:$0xff]  }
  0xbc   : > { %1450 = vmatpush1.bf16.msra.mxu0 %v7030_v8  ;;  %v7122_v8 = vld [vmem:[%s9630_s1 + $0x6c4] ss:$8 sps:$4 sm:$0xff]  }
  0xbd   : > { %1884 = vmatpush1.bf16.msra.mxu1 %v7033_v9  ;;  %1451 = vmatprep.subr.bf16.mxu0 %v7038_v10  ;;  %v7125_v9 = vld [vmem:[%s9630_s1 + $0x844] ss:$8 sps:$4 sm:$0xff]   ;;  %v7120_v10 = vld [vmem:[%s9630_s1 + $0x6c0] ss:$8 sps:$4 sm:$0xff]  }
  0xbe   : > { %1885 = vmatprep.subr.bf16.mxu1 %v7041_v11  ;;  %v7123_v11 = vld [vmem:[%s9630_s1 + $0x840] ss:$8 sps:$4 sm:$0xff]  }
  0xc0   : > { %1452 = vmatpush1.bf16.msra.mxu0 %v7036_v13  ;;  %v7128_v13 = vld [vmem:[%s9630_s1 + $0x6d4] ss:$8 sps:$4 sm:$0xff]  }
  0xc1   : > { %1886 = vmatpush1.bf16.msra.mxu1 %v7039_v14  ;;  %1453 = vmatprep.subr.bf16.mxu0 %v7044_v15  ;;  %v7131_v14 = vld [vmem:[%s9630_s1 + $0x854] ss:$8 sps:$4 sm:$0xff]   ;;  %v7126_v15 = vld [vmem:[%s9630_s1 + $0x6d0] ss:$8 sps:$4 sm:$0xff]  }
  0xc2   : > { %1887 = vmatprep.subr.bf16.mxu1 %v7047_v16  ;;  %v7129_v16 = vld [vmem:[%s9630_s1 + $0x850] ss:$8 sps:$4 sm:$0xff]  }
  0xc4   : > { %1454 = vmatpush1.bf16.msra.mxu0 %v7042_v18  ;;  %v7134_v18 = vld [vmem:[%s9630_s1 + $0x6e4] ss:$8 sps:$4 sm:$0xff]  }
  0xc5   : > { %1888 = vmatpush1.bf16.msra.mxu1 %v7045_v19  ;;  %2266 = vmatprep.subr.bf16.mxu0 %v7050_v21  ;;  %v7137_v19 = vld [vmem:[%s9630_s1 + $0x864] ss:$8 sps:$4 sm:$0xff]   ;;  %v7132_v21 = vld [vmem:[%s9630_s1 + $0x6e0] ss:$8 sps:$4 sm:$0xff]  }
  0xc6   : > { %2700 = vmatprep.subr.bf16.mxu1 %v7053_v22  ;;  %v7135_v22 = vld [vmem:[%s9630_s1 + $0x860] ss:$8 sps:$4 sm:$0xff]  }
  0xc7   : > { %1472 = vmatmul.mubr.bf16.vlgmr.msra.gmra.mrb[4].mxu0 %v8014_v46 }
  0xc8   : > { %1906 = vmatmul.mubr.bf16.vlgmr.msra.gmra.mrb[4].mxu1 %v8014_v46  ;;  %2267 = vmatpush1.bf16.msra.mxu0 %v7048_v24  ;;  %v7065_v46 = vld [vmem:[%s9630_s1 + $0x7a4] ss:$8 sps:$4 sm:$0xff]   ;;  %v7143_v24 = vld [vmem:[%s9630_s1 + $0x874] ss:$8 sps:$4 sm:$0xff]  }
  0xc9   : > { %2701 = vmatpush1.bf16.msra.mxu1 %v7051_v25  ;;  %2268 = vmatprep.subr.bf16.mxu0 %v7056_v26  ;;  %v7138_v25 = vld [vmem:[%s9630_s1 + $0x6f0] ss:$8 sps:$4 sm:$0xff]  }
  0xca   : > { %2702 = vmatprep.subr.bf16.mxu1 %v7059_v27  ;;  %2298 = vmatprep.mubr.bf16.mxu0 %v8330_v28  ;;  %v7141_v26 = vld [vmem:[%s9630_s1 + $0x870] ss:$8 sps:$4 sm:$0xff]   ;;  %v7146_v27 = vld [vmem:[%s9630_s1 + $0x704] ss:$8 sps:$4 sm:$0xff]  }
  0xcb   : > { %2732 = vmatprep.mubr.bf16.mxu1 %v8330_v28 }
  0xcc   : > { %2269 = vmatpush1.bf16.msra.mxu0 %v7054_v29  ;;  %v7149_v29 = vld [vmem:[%s9630_s1 + $0x884] ss:$8 sps:$4 sm:$0xff]  }
  0xcd   : > { %2703 = vmatpush1.bf16.msra.mxu1 %v7057_v30  ;;  %2270 = vmatprep.subr.bf16.mxu0 %v7062_v31  ;;  %v7144_v30 = vld [vmem:[%s9630_s1 + $0x700] ss:$8 sps:$4 sm:$0xff]  }
  0xce   : > { %2704 = vmatprep.subr.bf16.mxu1 %v7065_v46  ;;  %v7147_v31 = vld [vmem:[%s9630_s1 + $0x880] ss:$8 sps:$4 sm:$0xff]   ;;  %v8524_v46 = vrot.slane %v8301_v17, %v7841_v51  ;;  %v7150_v17 = vld [vmem:[%s9630_s1 + $0x710] ss:$8 sps:$4 sm:$0xff]  }
  0xd0   : > { %2271 = vmatpush1.bf16.msra.mxu0 %v7060_v32  ;;  %v7152_v32 = vld [vmem:[%s9630_s1 + $0x714] ss:$8 sps:$4 sm:$0xff]  }
  0xd1   : > { %2705 = vmatpush1.bf16.msra.mxu1 %v7063_v33  ;;  %2272 = vmatprep.subr.bf16.mxu0 %v7068_v34  ;;  %v7155_v33 = vld [vmem:[%s9630_s1 + $0x894] ss:$8 sps:$4 sm:$0xff]   ;;  %v7153_v34 = vld [vmem:[%s9630_s1 + $0x890] ss:$8 sps:$4 sm:$0xff]  }
  0xd2   : > { %2706 = vmatprep.subr.bf16.mxu1 %v7071_v35  ;;  %v7158_v35 = vld [vmem:[%s9630_s1 + $0x724] ss:$8 sps:$4 sm:$0xff]  }
  0xd4   : > { %2273 = vmatpush1.bf16.msra.mxu0 %v7066_v36  ;;  %v7161_v36 = vld [vmem:[%s9630_s1 + $0x8a4] ss:$8 sps:$4 sm:$0xff]  }
  0xd5   : > { %2707 = vmatpush1.bf16.msra.mxu1 %v7069_v37  ;;  %2274 = vmatprep.subr.bf16.mxu0 %v7074_v38  ;;  %v7156_v37 = vld [vmem:[%s9630_s1 + $0x720] ss:$8 sps:$4 sm:$0xff]  }
  0xd6   : > { %2708 = vmatprep.subr.bf16.mxu1 %v7077_v39  ;;  %v7159_v38 = vld [vmem:[%s9630_s1 + $0x8a0] ss:$8 sps:$4 sm:$0xff]   ;;  %v7164_v39 = vld [vmem:[%s9630_s1 + $0x734] ss:$8 sps:$4 sm:$0xff]  }
  0xd8   : > { %2275 = vmatpush1.bf16.msra.mxu0 %v7072_v40  ;;  %v7167_v40 = vld [vmem:[%s9630_s1 + $0x8b4] ss:$8 sps:$4 sm:$0xff]  }
  0xd9   : > { %2709 = vmatpush1.bf16.msra.mxu1 %v7075_v41  ;;  %2276 = vmatprep.subr.bf16.mxu0 %v7080_v42  ;;  %v7162_v41 = vld [vmem:[%s9630_s1 + $0x730] ss:$8 sps:$4 sm:$0xff]  }
  0xda   : > { %2710 = vmatprep.subr.bf16.mxu1 %v7083_v43  ;;  %v7165_v42 = vld [vmem:[%s9630_s1 + $0x8b0] ss:$8 sps:$4 sm:$0xff]   ;;  %v7170_v43 = vld [vmem:[%s9630_s1 + $0x744] ss:$8 sps:$4 sm:$0xff]  }
  0xdc   : > { %2277 = vmatpush1.bf16.msra.mxu0 %v7078_v44  ;;  %v7173_v44 = vld [vmem:[%s9630_s1 + $0x8c4] ss:$8 sps:$4 sm:$0xff]  }
  0xdd   : > { %2711 = vmatpush1.bf16.msra.mxu1 %v7081_v47  ;;  %2278 = vmatprep.subr.bf16.mxu0 %v7086_v48  ;;  %v7168_v47 = vld [vmem:[%s9630_s1 + $0x740] ss:$8 sps:$4 sm:$0xff]  }
  0xde   : > { %2712 = vmatprep.subr.bf16.mxu1 %v7089_v49  ;;  %v7171_v48 = vld [vmem:[%s9630_s1 + $0x8c0] ss:$8 sps:$4 sm:$0xff]   ;;  %v7176_v49 = vld [vmem:[%s9630_s1 + $0x754] ss:$8 sps:$4 sm:$0xff]  }
  0xe0   : > { %2279 = vmatpush1.bf16.msra.mxu0 %v7084_v50  ;;  %v7179_v50 = vld [vmem:[%s9630_s1 + $0x8d4] ss:$8 sps:$4 sm:$0xff]  }
  0xe1   : > { %2713 = vmatpush1.bf16.msra.mxu1 %v7087_v52  ;;  %2280 = vmatprep.subr.bf16.mxu0 %v7092_v53  ;;  %v7174_v52 = vld [vmem:[%s9630_s1 + $0x750] ss:$8 sps:$4 sm:$0xff]  }
  0xe2   : > { %2714 = vmatprep.subr.bf16.mxu1 %v7095_v54  ;;  %v7177_v53 = vld [vmem:[%s9630_s1 + $0x8d0] ss:$8 sps:$4 sm:$0xff]   ;;  %v7182_v54 = vld [vmem:[%s9630_s1 + $0x764] ss:$8 sps:$4 sm:$0xff]  }
  0xe4   : > { %2281 = vmatpush1.bf16.msra.mxu0 %v7090_v55  ;;  %v7185_v55 = vld [vmem:[%s9630_s1 + $0x8e4] ss:$8 sps:$4 sm:$0xff]  }
  0xe5   : > { %2715 = vmatpush1.bf16.msra.mxu1 %v7093_v56  ;;  %2282 = vmatprep.subr.bf16.mxu0 %v7098_v57  ;;  %v7180_v56 = vld [vmem:[%s9630_s1 + $0x760] ss:$8 sps:$4 sm:$0xff]  }
  0xe6   : > { %2716 = vmatprep.subr.bf16.mxu1 %v7101_v59  ;;  %v7183_v57 = vld [vmem:[%s9630_s1 + $0x8e0] ss:$8 sps:$4 sm:$0xff]   ;;  %v7188_v59 = vld [vmem:[%s9630_s1 + $0x774] ss:$8 sps:$4 sm:$0xff]  }
  0xe8   : > { %2283 = vmatpush1.bf16.msra.mxu0 %v7096_v58  ;;  %v7191_v58 = vld [vmem:[%s9630_s1 + $0x8f4] ss:$8 sps:$4 sm:$0xff]  }
  0xe9   : > { %2717 = vmatpush1.bf16.msra.mxu1 %v7099_v12  ;;  %2284 = vmatprep.subr.bf16.mxu0 %v7104_v60  ;;  %v7186_v12 = vld [vmem:[%s9630_s1 + $0x770] ss:$8 sps:$4 sm:$0xff]  }
  0xea   : > { %2718 = vmatprep.subr.bf16.mxu1 %v7107_v61  ;;  %v7189_v60 = vld [vmem:[%s9630_s1 + $0x8f0] ss:$8 sps:$4 sm:$0xff]   ;;  %v7194_v61 = vld [vmem:[%s9630_s1 + $0x904] ss:$8 sps:$4 sm:$0xff]  }
  0xec   : > { %2285 = vmatpush1.bf16.msra.mxu0 %v7102_v62  ;;  %v7197_v62 = vld [vmem:[%s9630_s1 + $0xa84] ss:$8 sps:$4 sm:$0xff]  }
  0xed   : > { %2719 = vmatpush1.bf16.msra.mxu1 %v7105_v63  ;;  %2286 = vmatprep.subr.bf16.mxu0 %v7110_v0  ;;  %v8622_v63 = vcombine.high %v8524_v46, %v8524_v46  ;;  %v7192_v0 = vld [vmem:[%s9630_s1 + $0x900] ss:$8 sps:$4 sm:$0xff]  }
  0xee   : > { %2720 = vmatprep.subr.bf16.mxu1 %v7113_v1  ;;  %v7195_v1 = vld [vmem:[%s9630_s1 + $0xa80] ss:$8 sps:$4 sm:$0xff]  }
  0xf0   : > { %2287 = vmatpush1.bf16.msra.mxu0 %v7108_v2  ;;  %v7200_v2 = vld [vmem:[%s9630_s1 + $0x914] ss:$8 sps:$4 sm:$0xff]  }
  0xf1   : > { %2721 = vmatpush1.bf16.msra.mxu1 %v7111_v3  ;;  %2288 = vmatprep.subr.bf16.mxu0 %v7116_v4  ;;  %v7203_v3 = vld [vmem:[%s9630_s1 + $0xa94] ss:$8 sps:$4 sm:$0xff]   ;;  %v7198_v4 = vld [vmem:[%s9630_s1 + $0x910] ss:$8 sps:$4 sm:$0xff]  }
  0xf2   : > { %2722 = vmatprep.subr.bf16.mxu1 %v7119_v5  ;;  %v7201_v5 = vld [vmem:[%s9630_s1 + $0xa90] ss:$8 sps:$4 sm:$0xff]  }
  0xf4   : > { %2289 = vmatpush1.bf16.msra.mxu0 %v7114_v6  ;;  %v7206_v6 = vld [vmem:[%s9630_s1 + $0x924] ss:$8 sps:$4 sm:$0xff]  }
  0xf5   : > { %2723 = vmatpush1.bf16.msra.mxu1 %v7117_v7  ;;  %2290 = vmatprep.subr.bf16.mxu0 %v7122_v8  ;;  %v7209_v7 = vld [vmem:[%s9630_s1 + $0xaa4] ss:$8 sps:$4 sm:$0xff]   ;;  %v7204_v8 = vld [vmem:[%s9630_s1 + $0x920] ss:$8 sps:$4 sm:$0xff]  }
  0xf6   : > { %2724 = vmatprep.subr.bf16.mxu1 %v7125_v9  ;;  %v7207_v9 = vld [vmem:[%s9630_s1 + $0xaa0] ss:$8 sps:$4 sm:$0xff]  }
  0xf8   : > { %2291 = vmatpush1.bf16.msra.mxu0 %v7120_v10  ;;  %v7212_v10 = vld [vmem:[%s9630_s1 + $0x934] ss:$8 sps:$4 sm:$0xff]  }
  0xf9   : > { %2725 = vmatpush1.bf16.msra.mxu1 %v7123_v11  ;;  %2292 = vmatprep.subr.bf16.mxu0 %v7128_v13  ;;  %v7210_v11 = vld [vmem:[%s9630_s1 + $0x930] ss:$8 sps:$4 sm:$0xff]  }
  0xfa   : > { %2726 = vmatprep.subr.bf16.mxu1 %v7131_v14  ;;  %v7213_v13 = vld [vmem:[%s9630_s1 + $0xab0] ss:$8 sps:$4 sm:$0xff]   ;;  %v7218_v14 = vld [vmem:[%s9630_s1 + $0x944] ss:$8 sps:$4 sm:$0xff]  }
  0xfc   : > { %2293 = vmatpush1.bf16.msra.mxu0 %v7126_v15  ;;  %v7221_v15 = vld [vmem:[%s9630_s1 + $0xac4] ss:$8 sps:$4 sm:$0xff]  }
  0xfd   : > { %2727 = vmatpush1.bf16.msra.mxu1 %v7129_v16  ;;  %2294 = vmatprep.subr.bf16.mxu0 %v7134_v18  ;;  %v7216_v16 = vld [vmem:[%s9630_s1 + $0x940] ss:$8 sps:$4 sm:$0xff]  }
  0xfe   : > { %2728 = vmatprep.subr.bf16.mxu1 %v7137_v19  ;;  %v7219_v18 = vld [vmem:[%s9630_s1 + $0xac0] ss:$8 sps:$4 sm:$0xff]   ;;  %v8683_v19 = vsub.s32 0, %v7821_v45 }
 0x100   : > { %2295 = vmatpush1.bf16.msra.mxu0 %v7132_v21  ;;  %v252_v21 = vld [vmem:[%s9631_s2] sm:$0x3] }
 0x101   : > { %2729 = vmatpush1.bf16.msra.mxu1 %v7135_v22  ;;  %2296 = vmatprep.subr.bf16.mxu0 %v7140_v23  ;;  %v5595_v22 = vld [vmem:[%s9631_s2 + $0x2] sm:$0x3]  ;;  %v8692_v23 = vsub.s32 1, %v7821_v45 }
 0x102   : > { %2730 = vmatprep.subr.bf16.mxu1 %v7143_v24  ;;  %v7224_v24 = vld [vmem:[%s9630_s1 + $0x954] ss:$8 sps:$4 sm:$0xff]  }
 0x103   : > { %v261_v45 = vrot.slane %v252_v21, %v8692_v23 }
 0x104   : > { %2297 = vmatpush1.bf16.msra.mxu0 %v7138_v25  ;;  %v7227_v25 = vld [vmem:[%s9630_s1 + $0xad4] ss:$8 sps:$4 sm:$0xff]  }
 0x105   : > { %2731 = vmatpush1.bf16.msra.mxu1 %v7141_v26  ;;  %2307 = vmatprep.subr.bf16.mxu0 %v7146_v27  ;;  %v257_v26 = vrot.slane %v252_v21, %v8683_v19  ;;  %v690_v27 = vrot.slane %v5595_v22, %v8683_v19  ;;  %v7278_v21 = vld [vmem:[%s9630_s1 + $0x9e4] ss:$8 sps:$4 sm:$0xff]  }
 0x106   : > { %2741 = vmatprep.subr.bf16.mxu1 %v7149_v29  ;;  %v694_v29 = vrot.slane %v5595_v22, %v8692_v23  ;;  %v7281_v22 = vld [vmem:[%s9630_s1 + $0xb64] ss:$8 sps:$4 sm:$0xff]  }
 0x107   : > { %2299 = vmatmul.mubr.bf16.vlgmr.msra.gmra.mrb[8].mxu0 %v8524_v46 }
 0x108   : > { %2733 = vmatmul.mubr.bf16.vlgmr.msra.gmra.mrb[8].mxu1 %v8524_v46  ;;  %2308 = vmatpush1.bf16.msra.mxu0 %v7144_v30  ;;  %v7222_v30 = vld [vmem:[%s9630_s1 + $0x950] ss:$8 sps:$4 sm:$0xff]  }
 0x109   : > { %2742 = vmatpush1.bf16.msra.mxu1 %v7147_v31  ;;  %2309 = vmatprep.subr.bf16.mxu0 %v7152_v32  ;;  %v7225_v31 = vld [vmem:[%s9630_s1 + $0xad0] ss:$8 sps:$4 sm:$0xff]   ;;  %v7230_v32 = vld [vmem:[%s9630_s1 + $0x964] ss:$8 sps:$4 sm:$0xff]  }
 0x10a   : > { %2743 = vmatprep.subr.bf16.mxu1 %v7155_v33  ;;  %2339 = vmatprep.mubr.bf16.mxu0 %v7649_v20  ;;  %v7233_v33 = vld [vmem:[%s9630_s1 + $0xae4] ss:$8 sps:$4 sm:$0xff]  }
 0x10b   : > { %2773 = vmatprep.mubr.bf16.mxu1 %v7649_v20 }
 0x10c   : > { %2310 = vmatpush1.bf16.msra.mxu0 %v7150_v17 }
 0x10d   : > { %2744 = vmatpush1.bf16.msra.mxu1 %v7153_v34  ;;  %2311 = vmatprep.subr.bf16.mxu0 %v7158_v35 }
 0x10e   : > { %2745 = vmatprep.subr.bf16.mxu1 %v7161_v36 }
 0x110   : > { %2312 = vmatpush1.bf16.msra.mxu0 %v7156_v37 }
 0x111   : > { %2746 = vmatpush1.bf16.msra.mxu1 %v7159_v38  ;;  %2313 = vmatprep.subr.bf16.mxu0 %v7164_v39 }
 0x112   : > { %2747 = vmatprep.subr.bf16.mxu1 %v7167_v40 }
 0x114   : > { %2314 = vmatpush1.bf16.msra.mxu0 %v7162_v41 }
 0x115   : > { %2748 = vmatpush1.bf16.msra.mxu1 %v7165_v42  ;;  %2315 = vmatprep.subr.bf16.mxu0 %v7170_v43  ;;  %v7228_v43 = vld [vmem:[%s9630_s1 + $0x960] ss:$8 sps:$4 sm:$0xff]  }
 0x116   : > { %2749 = vmatprep.subr.bf16.mxu1 %v7173_v44  ;;  %v7231_v44 = vld [vmem:[%s9630_s1 + $0xae0] ss:$8 sps:$4 sm:$0xff]  }
 0x118   : > { %2316 = vmatpush1.bf16.msra.mxu0 %v7168_v47 }
 0x119   : > { %2750 = vmatpush1.bf16.msra.mxu1 %v7171_v48  ;;  %2317 = vmatprep.subr.bf16.mxu0 %v7176_v49  ;;  %v7236_v49 = vld [vmem:[%s9630_s1 + $0x974] ss:$8 sps:$4 sm:$0xff]  }
 0x11a   : > { %2751 = vmatprep.subr.bf16.mxu1 %v7179_v50  ;;  %v7239_v50 = vld [vmem:[%s9630_s1 + $0xaf4] ss:$8 sps:$4 sm:$0xff]  }
 0x11c   : > { %2318 = vmatpush1.bf16.msra.mxu0 %v7174_v52 }
 0x11d   : > { %2752 = vmatpush1.bf16.msra.mxu1 %v7177_v53  ;;  %2319 = vmatprep.subr.bf16.mxu0 %v7182_v54 }
 0x11e   : > { %2753 = vmatprep.subr.bf16.mxu1 %v7185_v55 }
 0x120   : > { %2320 = vmatpush1.bf16.msra.mxu0 %v7180_v56  ;;  %v7234_v56 = vld [vmem:[%s9630_s1 + $0x970] ss:$8 sps:$4 sm:$0xff]  }
 0x121   : > { %2754 = vmatpush1.bf16.msra.mxu1 %v7183_v57  ;;  %2321 = vmatprep.subr.bf16.mxu0 %v7188_v59  ;;  %v7237_v57 = vld [vmem:[%s9630_s1 + $0xaf0] ss:$8 sps:$4 sm:$0xff]   ;;  %v7242_v59 = vld [vmem:[%s9630_s1 + $0x984] ss:$8 sps:$4 sm:$0xff]  }
 0x122   : > { %2755 = vmatprep.subr.bf16.mxu1 %v7191_v58  ;;  %v7245_v58 = vld [vmem:[%s9630_s1 + $0xb04] ss:$8 sps:$4 sm:$0xff]  }
 0x124   : > { %2322 = vmatpush1.bf16.msra.mxu0 %v7186_v12  ;;  %v7240_v12 = vld [vmem:[%s9630_s1 + $0x980] ss:$8 sps:$4 sm:$0xff]  }
 0x125   : > { %2756 = vmatpush1.bf16.msra.mxu1 %v7189_v60  ;;  %3134 = vmatprep.subr.bf16.mxu0 %v7194_v61  ;;  %v7243_v60 = vld [vmem:[%s9630_s1 + $0xb00] ss:$8 sps:$4 sm:$0xff]   ;;  %v7248_v61 = vld [vmem:[%s9630_s1 + $0x994] ss:$8 sps:$4 sm:$0xff]  }
 0x126   : > { %3568 = vmatprep.subr.bf16.mxu1 %v7197_v62  ;;  %v7251_v62 = vld [vmem:[%s9630_s1 + $0xb14] ss:$8 sps:$4 sm:$0xff]  }
 0x127   : > { %2340 = vmatmul.mubr.bf16.vlgmr.msra.gmra.mrb[8].mxu0 %v8622_v63 }
 0x128   : > { %2774 = vmatmul.mubr.bf16.vlgmr.msra.gmra.mrb[8].mxu1 %v8622_v63  ;;  %3135 = vmatpush1.bf16.msra.mxu0 %v7192_v0  ;;  %v7246_v0 = vld [vmem:[%s9630_s1 + $0x990] ss:$8 sps:$4 sm:$0xff]  }
 0x129   : > { %3569 = vmatpush1.bf16.msra.mxu1 %v7195_v1  ;;  %3136 = vmatprep.subr.bf16.mxu0 %v7200_v2  ;;  %v7249_v1 = vld [vmem:[%s9630_s1 + $0xb10] ss:$8 sps:$4 sm:$0xff]   ;;  %v7254_v2 = vld [vmem:[%s9630_s1 + $0x9a4] ss:$8 sps:$4 sm:$0xff]  }
 0x12a   : > { %3570 = vmatprep.subr.bf16.mxu1 %v7203_v3  ;;  %3166 = vmatprep.mubr.bf16.mxu0 %v8330_v28  ;;  %v7257_v3 = vld [vmem:[%s9630_s1 + $0xb24] ss:$8 sps:$4 sm:$0xff]  }
 0x12b   : > { %3600 = vmatprep.mubr.bf16.mxu1 %v8330_v28  ;;  %v7215_v28 = vld [vmem:[%s9630_s1 + $0xab4] ss:$8 sps:$4 sm:$0xff]  }
 0x12c   : > { %3137 = vmatpush1.bf16.msra.mxu0 %v7198_v4  ;;  %v7252_v4 = vld [vmem:[%s9630_s1 + $0x9a0] ss:$8 sps:$4 sm:$0xff]  }
 0x12d   : > { %3571 = vmatpush1.bf16.msra.mxu1 %v7201_v5  ;;  %3138 = vmatprep.subr.bf16.mxu0 %v7206_v6  ;;  %v7255_v5 = vld [vmem:[%s9630_s1 + $0xb20] ss:$8 sps:$4 sm:$0xff]   ;;  %v7260_v6 = vld [vmem:[%s9630_s1 + $0x9b4] ss:$8 sps:$4 sm:$0xff]  }
 0x12e   : > { %3572 = vmatprep.subr.bf16.mxu1 %v7209_v7  ;;  %v7263_v7 = vld [vmem:[%s9630_s1 + $0xb34] ss:$8 sps:$4 sm:$0xff]  }
 0x130   : > { %3139 = vmatpush1.bf16.msra.mxu0 %v7204_v8  ;;  %v7258_v8 = vld [vmem:[%s9630_s1 + $0x9b0] ss:$8 sps:$4 sm:$0xff]  }
 0x131   : > { %3573 = vmatpush1.bf16.msra.mxu1 %v7207_v9  ;;  %3140 = vmatprep.subr.bf16.mxu0 %v7212_v10  ;;  %v7261_v9 = vld [vmem:[%s9630_s1 + $0xb30] ss:$8 sps:$4 sm:$0xff]   ;;  %v7266_v10 = vld [vmem:[%s9630_s1 + $0x9c4] ss:$8 sps:$4 sm:$0xff]  }
 0x132   : > { %3574 = vmatprep.subr.bf16.mxu1 %v7215_v28  ;;  %v7269_v28 = vld [vmem:[%s9630_s1 + $0xb44] ss:$8 sps:$4 sm:$0xff]  }
 0x134   : > { %3141 = vmatpush1.bf16.msra.mxu0 %v7210_v11  ;;  %v7264_v11 = vld [vmem:[%s9630_s1 + $0x9c0] ss:$8 sps:$4 sm:$0xff]  }
 0x135   : > { %3575 = vmatpush1.bf16.msra.mxu1 %v7213_v13  ;;  %3142 = vmatprep.subr.bf16.mxu0 %v7218_v14  ;;  %v7267_v13 = vld [vmem:[%s9630_s1 + $0xb40] ss:$8 sps:$4 sm:$0xff]   ;;  %v7272_v14 = vld [vmem:[%s9630_s1 + $0x9d4] ss:$8 sps:$4 sm:$0xff]  }
 0x136   : > { %3576 = vmatprep.subr.bf16.mxu1 %v7221_v15  ;;  %v7275_v15 = vld [vmem:[%s9630_s1 + $0xb54] ss:$8 sps:$4 sm:$0xff]  }
 0x138   : > { %3143 = vmatpush1.bf16.msra.mxu0 %v7216_v16  ;;  %v7270_v16 = vld [vmem:[%s9630_s1 + $0x9d0] ss:$8 sps:$4 sm:$0xff]  }
 0x139   : > { %3577 = vmatpush1.bf16.msra.mxu1 %v7219_v18  ;;  %3144 = vmatprep.subr.bf16.mxu0 %v7224_v24  ;;  %v7273_v18 = vld [vmem:[%s9630_s1 + $0xb50] ss:$8 sps:$4 sm:$0xff]   ;;  %v7276_v24 = vld [vmem:[%s9630_s1 + $0x9e0] ss:$8 sps:$4 sm:$0xff]  }
 0x13a   : > { %3578 = vmatprep.subr.bf16.mxu1 %v7227_v25  ;;  %v606_v17 = vpop.f32.mrb[0].mxu0  ;;  %v7279_v25 = vld [vmem:[%s9630_s1 + $0xb60] ss:$8 sps:$4 sm:$0xff]  }
 0x13b   : > { %v1039_v34 = vpop.f32.mrb[0].mxu1  ;;  %v6660_v35 = vadd.f32 %v606_v17, %v257_v26  ;;  %v608_v37 = vpop.f32.mrb[1].mxu0  ;;  %v7284_v26 = vld [vmem:[%s9630_s1 + $0x9f4] ss:$8 sps:$4 sm:$0xff]  }
 0x13c   : > { %v6662_v36 = vadd.f32 %v1039_v34, %v690_v27  ;;  %v1041_v38 = vpop.f32.mrb[1].mxu1  ;;  %v6661_v39 = vadd.f32 %v608_v37, %v261_v45  ;;  %v610_v41 = vpop.f32.mrb[2].mxu0  ;;  %3145 = vmatpush1.bf16.msra.mxu0 %v7222_v30  ;;  %v7287_v27 = vld [vmem:[%s9630_s1 + $0xb74] ss:$8 sps:$4 sm:$0xff]   ;;  %v7282_v45 = vld [vmem:[%s9630_s1 + $0x9f0] ss:$8 sps:$4 sm:$0xff]  }
 0x13d   : > { %v6663_v40 = vadd.f32 %v1041_v38, %v694_v29  ;;  %v1043_v42 = vpop.f32.mrb[2].mxu1  ;;  %3579 = vmatpush1.bf16.msra.mxu1 %v7225_v31  ;;  %v611_v47 = vpop.f32.mrb[3].mxu0  ;;  %3146 = vmatprep.subr.bf16.mxu0 %v7230_v32  ;;  %v7285_v29 = vld [vmem:[%s9630_s1 + $0xb70] ss:$8 sps:$4 sm:$0xff]   ;;  %v7290_v30 = vld [vmem:[%s9630_s1 + $0xa04] ss:$8 sps:$4 sm:$0xff]  }
 0x13e   : > { %v1044_v48 = vpop.f32.mrb[3].mxu1  ;;  %3580 = vmatprep.subr.bf16.mxu1 %v7233_v33  ;;  %v5545_v52 = vpack.c.bf16 %v6661_v39, %v6660_v35  ;;  %v7293_v31 = vld [vmem:[%s9630_s1 + $0xb84] ss:$8 sps:$4 sm:$0xff]   ;;  %v7288_v32 = vld [vmem:[%s9630_s1 + $0xa00] ss:$8 sps:$4 sm:$0xff]  }
 0x13f   : > { %v5645_v53 = vpack.c.bf16 %v6663_v40, %v6662_v36  ;;  %v7291_v33 = vld [vmem:[%s9630_s1 + $0xb80] ss:$8 sps:$4 sm:$0xff]   ;;  %v7296_v17 = vld [vmem:[%s9630_s1 + $0xa14] ss:$8 sps:$4 sm:$0xff]   ;;  %v7294_v35 = vld [vmem:[%s9630_s1 + $0xa10] ss:$8 sps:$4 sm:$0xff]  }
 0x140   : > { %v624_v54 = vrot.slane %v5545_v52, %v7841_v51  ;;  %3147 = vmatpush1.bf16.msra.mxu0 %v7228_v43  ;;  %v7299_v34 = vld [vmem:[%s9630_s1 + $0xb94] ss:$8 sps:$4 sm:$0xff]   ;;  %v7297_v36 = vld [vmem:[%s9630_s1 + $0xb90] ss:$8 sps:$4 sm:$0xff]   ;;  %v7302_v37 = vld [vmem:[%s9630_s1 + $0xa24] ss:$8 sps:$4 sm:$0xff]  }
 0x141   : > { %v1057_v55 = vrot.slane %v5645_v53, %v7841_v51  ;;  %3581 = vmatpush1.bf16.msra.mxu1 %v7231_v44  ;;  %3148 = vmatprep.subr.bf16.mxu0 %v7236_v49  ;;  %v7300_v38 = vld [vmem:[%s9630_s1 + $0xa20] ss:$8 sps:$4 sm:$0xff]   ;;  %v7308_v40 = vld [vmem:[%s9630_s1 + $0xa34] ss:$8 sps:$4 sm:$0xff]   ;;  %v7306_v42 = vld [vmem:[%s9630_s1 + $0xa30] ss:$8 sps:$4 sm:$0xff]  }
 0x142   : > { %3582 = vmatprep.subr.bf16.mxu1 %v7239_v50  ;;  %5546 = vst.sshfl [vmem:[%s8732_s20] sm:$0x5 pattern:$0x73625140] %v624_v54  ;;  %v7303_v39 = vld [vmem:[%s9630_s1 + $0xba0] ss:$8 sps:$4 sm:$0xff]  }
 0x143   : > { %6649 = vst.sshfl [vmem:[%s8732_s20 + $0x2] sm:$0x5 pattern:$0x73625140] %v1057_v55  ;;  %v7311_v41 = vld [vmem:[%s9630_s1 + $0xbb4] ss:$8 sps:$4 sm:$0xff]  }
 0x144   : > { %3149 = vmatpush1.bf16.msra.mxu0 %v7234_v56  ;;  %v7309_v43 = vld [vmem:[%s9630_s1 + $0xbb0] ss:$8 sps:$4 sm:$0xff]   ;;  %v7314_v44 = vld [vmem:[%s9630_s1 + $0xa44] ss:$8 sps:$4 sm:$0xff]   ;;  %v7312_v48 = vld [vmem:[%s9630_s1 + $0xa40] ss:$8 sps:$4 sm:$0xff]  }
 0x145   : > { %3583 = vmatpush1.bf16.msra.mxu1 %v7237_v57  ;;  %3150 = vmatprep.subr.bf16.mxu0 %v7242_v59  ;;  %v7317_v47 = vld [vmem:[%s9630_s1 + $0xbc4] ss:$8 sps:$4 sm:$0xff]   ;;  %v7315_v49 = vld [vmem:[%s9630_s1 + $0xbc0] ss:$8 sps:$4 sm:$0xff]   ;;  %v7320_v50 = vld [vmem:[%s9630_s1 + $0xa54] ss:$8 sps:$4 sm:$0xff]  }
 0x146   : > { %3584 = vmatprep.subr.bf16.mxu1 %v7245_v58  ;;  %v7323_v52 = vld [vmem:[%s9630_s1 + $0xbd4] ss:$8 sps:$4 sm:$0xff]   ;;  %v7318_v53 = vld [vmem:[%s9630_s1 + $0xa50] ss:$8 sps:$4 sm:$0xff]   ;;  %v7326_v55 = vld [vmem:[%s9630_s1 + $0xa64] ss:$8 sps:$4 sm:$0xff]  }
 0x147   : > { %v7321_v54 = vld [vmem:[%s9630_s1 + $0xbd0] ss:$8 sps:$4 sm:$0xff]   ;;  %v7329_v56 = vld [vmem:[%s9630_s1 + $0xbe4] ss:$8 sps:$4 sm:$0xff]   ;;  %v7324_v57 = vld [vmem:[%s9630_s1 + $0xa60] ss:$8 sps:$4 sm:$0xff]  }
 0x148   : > { %3151 = vmatpush1.bf16.msra.mxu0 %v7240_v12  ;;  %v7327_v59 = vld [vmem:[%s9630_s1 + $0xbe0] ss:$8 sps:$4 sm:$0xff]   ;;  %v7332_v58 = vld [vmem:[%s9630_s1 + $0xa74] ss:$8 sps:$4 sm:$0xff]  }
 0x149   : > { %3585 = vmatpush1.bf16.msra.mxu1 %v7243_v60  ;;  %3152 = vmatprep.subr.bf16.mxu0 %v7248_v61  ;;  %v7335_v12 = vld [vmem:[%s9630_s1 + $0xbf4] ss:$8 sps:$4 sm:$0xff]   ;;  %v8935_v60 = vld.sshfl [vmem:[%s7835_s17] sm:$0x13 pattern:$0x75316420] }
 0x14a   : > { %3586 = vmatprep.subr.bf16.mxu1 %v7251_v62  ;;  %v7330_v61 = vld [vmem:[%s9630_s1 + $0xa70] ss:$8 sps:$4 sm:$0xff]  }
 0x14b   : > { %v7333_v62 = vld [vmem:[%s9630_s1 + $0xbf0] ss:$8 sps:$4 sm:$0xff]  }
 0x14c   : > { %3153 = vmatpush1.bf16.msra.mxu0 %v7246_v0  ;;  %v7338_v0 = vld [vmem:[%s9630_s1 + $0xc04] ss:$8 sps:$4 sm:$0xff]  }
 0x14d   : > { %3587 = vmatpush1.bf16.msra.mxu1 %v7249_v1  ;;  %3154 = vmatprep.subr.bf16.mxu0 %v7254_v2  ;;  %v7341_v1 = vld [vmem:[%s9630_s1 + $0xd84] ss:$8 sps:$4 sm:$0xff]   ;;  %v3743_v2 = vcombine.high %v8935_v60, %v8935_v60 }
 0x14e   : > { %3588 = vmatprep.subr.bf16.mxu1 %v7257_v3  ;;  %v7336_v3 = vld [vmem:[%s9630_s1 + $0xc00] ss:$8 sps:$4 sm:$0xff]  }
 0x150   : > { %3155 = vmatpush1.bf16.msra.mxu0 %v7252_v4  ;;  %v7339_v4 = vld [vmem:[%s9630_s1 + $0xd80] ss:$8 sps:$4 sm:$0xff]  }
 0x151   : > { %3589 = vmatpush1.bf16.msra.mxu1 %v7255_v5  ;;  %3156 = vmatprep.subr.bf16.mxu0 %v7260_v6  ;;  %v7344_v5 = vld [vmem:[%s9630_s1 + $0xc14] ss:$8 sps:$4 sm:$0xff]  }
 0x152   : > { %3590 = vmatprep.subr.bf16.mxu1 %v7263_v7  ;;  %v7347_v6 = vld [vmem:[%s9630_s1 + $0xd94] ss:$8 sps:$4 sm:$0xff]   ;;  %v8964_v7 = vrot.slane %v3743_v2, %v7841_v51 }
 0x153   : > { %v7395_v2 = vld [vmem:[%s9630_s1 + $0xe14] ss:$8 sps:$4 sm:$0xff]  }
 0x154   : > { %3157 = vmatpush1.bf16.msra.mxu0 %v7258_v8  ;;  %v7342_v8 = vld [vmem:[%s9630_s1 + $0xc10] ss:$8 sps:$4 sm:$0xff]  }
 0x155   : > { %3591 = vmatpush1.bf16.msra.mxu1 %v7261_v9  ;;  %3158 = vmatprep.subr.bf16.mxu0 %v7266_v10  ;;  %v7345_v9 = vld [vmem:[%s9630_s1 + $0xd90] ss:$8 sps:$4 sm:$0xff]   ;;  %v7350_v10 = vld [vmem:[%s9630_s1 + $0xc24] ss:$8 sps:$4 sm:$0xff]  }
 0x156   : > { %3592 = vmatprep.subr.bf16.mxu1 %v7269_v28  ;;  %v7348_v28 = vld [vmem:[%s9630_s1 + $0xc20] ss:$8 sps:$4 sm:$0xff]  }
 0x158   : > { %3159 = vmatpush1.bf16.msra.mxu0 %v7264_v11  ;;  %v7351_v11 = vld [vmem:[%s9630_s1 + $0xda0] ss:$8 sps:$4 sm:$0xff]  }
 0x159   : > { %3593 = vmatpush1.bf16.msra.mxu1 %v7267_v13  ;;  %3160 = vmatprep.subr.bf16.mxu0 %v7272_v14  ;;  %v7356_v13 = vld [vmem:[%s9630_s1 + $0xc34] ss:$8 sps:$4 sm:$0xff]  }
 0x15a   : > { %3594 = vmatprep.subr.bf16.mxu1 %v7275_v15  ;;  %v7359_v14 = vld [vmem:[%s9630_s1 + $0xdb4] ss:$8 sps:$4 sm:$0xff]   ;;  %v7354_v15 = vld [vmem:[%s9630_s1 + $0xc30] ss:$8 sps:$4 sm:$0xff]  }
 0x15c   : > { %3161 = vmatpush1.bf16.msra.mxu0 %v7270_v16  ;;  %v7357_v16 = vld [vmem:[%s9630_s1 + $0xdb0] ss:$8 sps:$4 sm:$0xff]  }
 0x15d   : > { %3595 = vmatpush1.bf16.msra.mxu1 %v7273_v18  ;;  %3162 = vmatprep.subr.bf16.mxu0 %v7278_v21  ;;  %v7362_v18 = vld [vmem:[%s9630_s1 + $0xc44] ss:$8 sps:$4 sm:$0xff]  }
 0x15e   : > { %3596 = vmatprep.subr.bf16.mxu1 %v7281_v22  ;;  %v7365_v21 = vld [vmem:[%s9630_s1 + $0xdc4] ss:$8 sps:$4 sm:$0xff]   ;;  %v7360_v22 = vld [vmem:[%s9630_s1 + $0xc40] ss:$8 sps:$4 sm:$0xff]  }
 0x160   : > { %3163 = vmatpush1.bf16.msra.mxu0 %v7276_v24  ;;  %v7363_v24 = vld [vmem:[%s9630_s1 + $0xdc0] ss:$8 sps:$4 sm:$0xff]  }
 0x161   : > { %3597 = vmatpush1.bf16.msra.mxu1 %v7279_v25  ;;  %3164 = vmatprep.subr.bf16.mxu0 %v7284_v26  ;;  %v5695_v25 = vld [vmem:[%s9631_s2 + $0x4] sm:$0x3]  ;;  %v5795_v26 = vld [vmem:[%s9631_s2 + $0x6] sm:$0x3] }
 0x162   : > { %3598 = vmatprep.subr.bf16.mxu1 %v7287_v27  ;;  %v7368_v27 = vld [vmem:[%s9630_s1 + $0xc54] ss:$8 sps:$4 sm:$0xff]  }
 0x164   : > { %3165 = vmatpush1.bf16.msra.mxu0 %v7282_v45  ;;  %v7371_v45 = vld [vmem:[%s9630_s1 + $0xdd4] ss:$8 sps:$4 sm:$0xff]  }
 0x165   : > { %3599 = vmatpush1.bf16.msra.mxu1 %v7285_v29  ;;  %3175 = vmatprep.subr.bf16.mxu0 %v7290_v30  ;;  %v1124_v29 = vrot.slane %v5695_v25, %v8683_v19  ;;  %v1558_v30 = vrot.slane %v5795_v26, %v8683_v19 }
 0x166   : > { %3609 = vmatprep.subr.bf16.mxu1 %v7293_v31  ;;  %v1128_v31 = vrot.slane %v5695_v25, %v8692_v23  ;;  %v7422_v25 = vld [vmem:[%s9630_s1 + $0xce4] ss:$8 sps:$4 sm:$0xff]  }
 0x167   : > { %3167 = vmatmul.mubr.bf16.vlgmr.msra.gmra.mrb[12].mxu0 %v8524_v46 }
 0x168   : > { %3601 = vmatmul.mubr.bf16.vlgmr.msra.gmra.mrb[12].mxu1 %v8524_v46  ;;  %3176 = vmatpush1.bf16.msra.mxu0 %v7288_v32  ;;  %v7305_v46 = vld [vmem:[%s9630_s1 + $0xba4] ss:$8 sps:$4 sm:$0xff]   ;;  %v1562_v32 = vrot.slane %v5795_v26, %v8692_v23 }
 0x169   : > { %3610 = vmatpush1.bf16.msra.mxu1 %v7291_v33  ;;  %3177 = vmatprep.subr.bf16.mxu0 %v7296_v17  ;;  %v7366_v33 = vld [vmem:[%s9630_s1 + $0xc50] ss:$8 sps:$4 sm:$0xff]   ;;  %v7425_v26 = vld [vmem:[%s9630_s1 + $0xe64] ss:$8 sps:$4 sm:$0xff]  }
 0x16a   : > { %3611 = vmatprep.subr.bf16.mxu1 %v7299_v34  ;;  %3207 = vmatprep.mubr.bf16.mxu0 %v7649_v20  ;;  %v7369_v17 = vld [vmem:[%s9630_s1 + $0xdd0] ss:$8 sps:$4 sm:$0xff]   ;;  %v7374_v34 = vld [vmem:[%s9630_s1 + $0xc64] ss:$8 sps:$4 sm:$0xff]  }
 0x16b   : > { %3641 = vmatprep.mubr.bf16.mxu1 %v7649_v20 }
 0x16c   : > { %3178 = vmatpush1.bf16.msra.mxu0 %v7294_v35  ;;  %v7377_v35 = vld [vmem:[%s9630_s1 + $0xde4] ss:$8 sps:$4 sm:$0xff]  }
 0x16d   : > { %3612 = vmatpush1.bf16.msra.mxu1 %v7297_v36  ;;  %3179 = vmatprep.subr.bf16.mxu0 %v7302_v37 }
 0x16e   : > { %3613 = vmatprep.subr.bf16.mxu1 %v7305_v46 }
 0x170   : > { %3180 = vmatpush1.bf16.msra.mxu0 %v7300_v38 }
 0x171   : > { %3614 = vmatpush1.bf16.msra.mxu1 %v7303_v39  ;;  %3181 = vmatprep.subr.bf16.mxu0 %v7308_v40 }
 0x172   : > { %3615 = vmatprep.subr.bf16.mxu1 %v7311_v41 }
 0x174   : > { %3182 = vmatpush1.bf16.msra.mxu0 %v7306_v42 }
 0x175   : > { %3616 = vmatpush1.bf16.msra.mxu1 %v7309_v43  ;;  %3183 = vmatprep.subr.bf16.mxu0 %v7314_v44 }
 0x176   : > { %3617 = vmatprep.subr.bf16.mxu1 %v7317_v47  ;;  %v7372_v47 = vld [vmem:[%s9630_s1 + $0xc60] ss:$8 sps:$4 sm:$0xff]  }
 0x178   : > { %3184 = vmatpush1.bf16.msra.mxu0 %v7312_v48  ;;  %v7375_v48 = vld [vmem:[%s9630_s1 + $0xde0] ss:$8 sps:$4 sm:$0xff]  }
 0x179   : > { %3618 = vmatpush1.bf16.msra.mxu1 %v7315_v49  ;;  %3185 = vmatprep.subr.bf16.mxu0 %v7320_v50 }
 0x17a   : > { %3619 = vmatprep.subr.bf16.mxu1 %v7323_v52  ;;  %v7380_v52 = vld [vmem:[%s9630_s1 + $0xc74] ss:$8 sps:$4 sm:$0xff]  }
 0x17c   : > { %3186 = vmatpush1.bf16.msra.mxu0 %v7318_v53  ;;  %v7383_v53 = vld [vmem:[%s9630_s1 + $0xdf4] ss:$8 sps:$4 sm:$0xff]  }
 0x17d   : > { %3620 = vmatpush1.bf16.msra.mxu1 %v7321_v54  ;;  %3187 = vmatprep.subr.bf16.mxu0 %v7326_v55 }
 0x17e   : > { %3621 = vmatprep.subr.bf16.mxu1 %v7329_v56 }
 0x180   : > { %3188 = vmatpush1.bf16.msra.mxu0 %v7324_v57 }
 0x181   : > { %3622 = vmatpush1.bf16.msra.mxu1 %v7327_v59  ;;  %3189 = vmatprep.subr.bf16.mxu0 %v7332_v58  ;;  %v7378_v59 = vld [vmem:[%s9630_s1 + $0xc70] ss:$8 sps:$4 sm:$0xff]  }
 0x182   : > { %3623 = vmatprep.subr.bf16.mxu1 %v7335_v12  ;;  %v7381_v58 = vld [vmem:[%s9630_s1 + $0xdf0] ss:$8 sps:$4 sm:$0xff]   ;;  %v7386_v12 = vld [vmem:[%s9630_s1 + $0xc84] ss:$8 sps:$4 sm:$0xff]  }
 0x184   : > { %3190 = vmatpush1.bf16.msra.mxu0 %v7330_v61  ;;  %v7389_v61 = vld [vmem:[%s9630_s1 + $0xe04] ss:$8 sps:$4 sm:$0xff]  }
 0x185   : > { %3624 = vmatpush1.bf16.msra.mxu1 %v7333_v62  ;;  %4002 = vmatprep.subr.bf16.mxu0 %v7338_v0  ;;  %v7384_v62 = vld [vmem:[%s9630_s1 + $0xc80] ss:$8 sps:$4 sm:$0xff]  }
 0x186   : > { %4436 = vmatprep.subr.bf16.mxu1 %v7341_v1  ;;  %v7387_v0 = vld [vmem:[%s9630_s1 + $0xe00] ss:$8 sps:$4 sm:$0xff]   ;;  %v7392_v1 = vld [vmem:[%s9630_s1 + $0xc94] ss:$8 sps:$4 sm:$0xff]  }
 0x187   : > { %3208 = vmatmul.mubr.bf16.vlgmr.msra.gmra.mrb[12].mxu0 %v8622_v63 }
 0x188   : > { %3642 = vmatmul.mubr.bf16.vlgmr.msra.gmra.mrb[12].mxu1 %v8622_v63  ;;  %4003 = vmatpush1.bf16.msra.mxu0 %v7336_v3  ;;  %v7353_v63 = vld [vmem:[%s9630_s1 + $0xda4] ss:$8 sps:$4 sm:$0xff]   ;;  %v7390_v3 = vld [vmem:[%s9630_s1 + $0xc90] ss:$8 sps:$4 sm:$0xff]  }
 0x189   : > { %4437 = vmatpush1.bf16.msra.mxu1 %v7339_v4  ;;  %4004 = vmatprep.subr.bf16.mxu0 %v7344_v5  ;;  %v7393_v4 = vld [vmem:[%s9630_s1 + $0xe10] ss:$8 sps:$4 sm:$0xff]   ;;  %v7398_v5 = vld [vmem:[%s9630_s1 + $0xca4] ss:$8 sps:$4 sm:$0xff]  }
 0x18a   : > { %4438 = vmatprep.subr.bf16.mxu1 %v7347_v6  ;;  %4034 = vmatprep.mubr.bf16.mxu0 %v8964_v7  ;;  %v7401_v6 = vld [vmem:[%s9630_s1 + $0xe24] ss:$8 sps:$4 sm:$0xff]  }
 0x18b   : > { %4468 = vmatprep.mubr.bf16.mxu1 %v8964_v7 }
 0x18c   : > { %4005 = vmatpush1.bf16.msra.mxu0 %v7342_v8  ;;  %v7396_v8 = vld [vmem:[%s9630_s1 + $0xca0] ss:$8 sps:$4 sm:$0xff]  }
 0x18d   : > { %4439 = vmatpush1.bf16.msra.mxu1 %v7345_v9  ;;  %4006 = vmatprep.subr.bf16.mxu0 %v7350_v10  ;;  %v7399_v9 = vld [vmem:[%s9630_s1 + $0xe20] ss:$8 sps:$4 sm:$0xff]   ;;  %v7404_v10 = vld [vmem:[%s9630_s1 + $0xcb4] ss:$8 sps:$4 sm:$0xff]  }
 0x18e   : > { %4440 = vmatprep.subr.bf16.mxu1 %v7353_v63  ;;  %v7407_v63 = vld [vmem:[%s9630_s1 + $0xe34] ss:$8 sps:$4 sm:$0xff]  }
 0x190   : > { %4007 = vmatpush1.bf16.msra.mxu0 %v7348_v28  ;;  %v7402_v28 = vld [vmem:[%s9630_s1 + $0xcb0] ss:$8 sps:$4 sm:$0xff]  }
 0x191   : > { %4441 = vmatpush1.bf16.msra.mxu1 %v7351_v11  ;;  %4008 = vmatprep.subr.bf16.mxu0 %v7356_v13  ;;  %v7405_v11 = vld [vmem:[%s9630_s1 + $0xe30] ss:$8 sps:$4 sm:$0xff]   ;;  %v7410_v13 = vld [vmem:[%s9630_s1 + $0xcc4] ss:$8 sps:$4 sm:$0xff]  }
 0x192   : > { %4442 = vmatprep.subr.bf16.mxu1 %v7359_v14  ;;  %v7413_v14 = vld [vmem:[%s9630_s1 + $0xe44] ss:$8 sps:$4 sm:$0xff]  }
 0x194   : > { %4009 = vmatpush1.bf16.msra.mxu0 %v7354_v15  ;;  %v7408_v15 = vld [vmem:[%s9630_s1 + $0xcc0] ss:$8 sps:$4 sm:$0xff]  }
 0x195   : > { %4443 = vmatpush1.bf16.msra.mxu1 %v7357_v16  ;;  %4010 = vmatprep.subr.bf16.mxu0 %v7362_v18  ;;  %v7411_v16 = vld [vmem:[%s9630_s1 + $0xe40] ss:$8 sps:$4 sm:$0xff]   ;;  %v7416_v18 = vld [vmem:[%s9630_s1 + $0xcd4] ss:$8 sps:$4 sm:$0xff]  }
 0x196   : > { %4444 = vmatprep.subr.bf16.mxu1 %v7365_v21  ;;  %v7419_v21 = vld [vmem:[%s9630_s1 + $0xe54] ss:$8 sps:$4 sm:$0xff]  }
 0x198   : > { %4011 = vmatpush1.bf16.msra.mxu0 %v7360_v22  ;;  %v7414_v22 = vld [vmem:[%s9630_s1 + $0xcd0] ss:$8 sps:$4 sm:$0xff]  }
 0x199   : > { %4445 = vmatpush1.bf16.msra.mxu1 %v7363_v24  ;;  %4012 = vmatprep.subr.bf16.mxu0 %v7368_v27  ;;  %v7417_v24 = vld [vmem:[%s9630_s1 + $0xe50] ss:$8 sps:$4 sm:$0xff]   ;;  %v7420_v27 = vld [vmem:[%s9630_s1 + $0xce0] ss:$8 sps:$4 sm:$0xff]  }
 0x19a   : > { %4446 = vmatprep.subr.bf16.mxu1 %v7371_v45  ;;  %v1473_v36 = vpop.f32.mrb[4].mxu0  ;;  %v7423_v45 = vld [vmem:[%s9630_s1 + $0xe60] ss:$8 sps:$4 sm:$0xff]  }
 0x19b   : > { %v1907_v37 = vpop.f32.mrb[4].mxu1  ;;  %v6664_v46 = vadd.f32 %v1473_v36, %v1124_v29  ;;  %v1475_v39 = vpop.f32.mrb[5].mxu0  ;;  %v7428_v29 = vld [vmem:[%s9630_s1 + $0xcf4] ss:$8 sps:$4 sm:$0xff]   ;;  %v7435_v36 = vld [vmem:[%s9630_s1 + $0xe80] ss:$8 sps:$4 sm:$0xff]  }
 0x19c   : > { %v6666_v38 = vadd.f32 %v1907_v37, %v1558_v30  ;;  %v1909_v40 = vpop.f32.mrb[5].mxu1  ;;  %v6665_v41 = vadd.f32 %v1475_v39, %v1128_v31  ;;  %v1477_v43 = vpop.f32.mrb[6].mxu0  ;;  %4013 = vmatpush1.bf16.msra.mxu0 %v7366_v33  ;;  %v7431_v30 = vld [vmem:[%s9630_s1 + $0xe74] ss:$8 sps:$4 sm:$0xff]   ;;  %v7426_v31 = vld [vmem:[%s9630_s1 + $0xcf0] ss:$8 sps:$4 sm:$0xff]  }
 0x19d   : > { %v6667_v42 = vadd.f32 %v1909_v40, %v1562_v32  ;;  %v1911_v44 = vpop.f32.mrb[6].mxu1  ;;  %4447 = vmatpush1.bf16.msra.mxu1 %v7369_v17  ;;  %v1478_v49 = vpop.f32.mrb[7].mxu0  ;;  %4014 = vmatprep.subr.bf16.mxu0 %v7374_v34  ;;  %v7429_v32 = vld [vmem:[%s9630_s1 + $0xe70] ss:$8 sps:$4 sm:$0xff]   ;;  %v7434_v33 = vld [vmem:[%s9630_s1 + $0xd04] ss:$8 sps:$4 sm:$0xff]   ;;  %v9166_v34 = vrot.slane %v8935_v60, %v7841_v51 }
 0x19e   : > { %v1912_v50 = vpop.f32.mrb[7].mxu1  ;;  %4448 = vmatprep.subr.bf16.mxu1 %v7377_v35  ;;  %v5745_v54 = vpack.c.bf16 %v6665_v41, %v6664_v46  ;;  %v7437_v17 = vld [vmem:[%s9630_s1 + $0xe84] ss:$8 sps:$4 sm:$0xff]   ;;  %v7432_v35 = vld [vmem:[%s9630_s1 + $0xd00] ss:$8 sps:$4 sm:$0xff]  }
 0x19f   : > { %v5845_v55 = vpack.c.bf16 %v6667_v42, %v6666_v38  ;;  %v7440_v37 = vld [vmem:[%s9630_s1 + $0xd14] ss:$8 sps:$4 sm:$0xff]   ;;  %v7438_v46 = vld [vmem:[%s9630_s1 + $0xd10] ss:$8 sps:$4 sm:$0xff]   ;;  %v7446_v39 = vld [vmem:[%s9630_s1 + $0xd24] ss:$8 sps:$4 sm:$0xff]  }
 0x1a0   : > { %v1491_v56 = vrot.slane %v5745_v54, %v7841_v51  ;;  %4015 = vmatpush1.bf16.msra.mxu0 %v7372_v47  ;;  %v7443_v60 = vld [vmem:[%s9630_s1 + $0xe94] ss:$8 sps:$4 sm:$0xff]   ;;  %v7441_v38 = vld [vmem:[%s9630_s1 + $0xe90] ss:$8 sps:$4 sm:$0xff]   ;;  %v7449_v40 = vld [vmem:[%s9630_s1 + $0xea4] ss:$8 sps:$4 sm:$0xff]  }
 0x1a1   : > { %v1925_v57 = vrot.slane %v5845_v55, %v7841_v51  ;;  %4449 = vmatpush1.bf16.msra.mxu1 %v7375_v48  ;;  %4016 = vmatprep.subr.bf16.mxu0 %v7380_v52  ;;  %v7444_v41 = vld [vmem:[%s9630_s1 + $0xd20] ss:$8 sps:$4 sm:$0xff]   ;;  %v7452_v43 = vld [vmem:[%s9630_s1 + $0xd34] ss:$8 sps:$4 sm:$0xff]   ;;  %v7450_v47 = vld [vmem:[%s9630_s1 + $0xd30] ss:$8 sps:$4 sm:$0xff]  }
 0x1a2   : > { %4450 = vmatprep.subr.bf16.mxu1 %v7383_v53  ;;  %6650 = vst.sshfl [vmem:[%s8732_s20 + $0x4] sm:$0x5 pattern:$0x73625140] %v1491_v56  ;;  %v7447_v42 = vld [vmem:[%s9630_s1 + $0xea0] ss:$8 sps:$4 sm:$0xff]  }
 0x1a3   : > { %6651 = vst.sshfl [vmem:[%s8732_s20 + $0x6] sm:$0x5 pattern:$0x73625140] %v1925_v57  ;;  %v7455_v44 = vld [vmem:[%s9630_s1 + $0xeb4] ss:$8 sps:$4 sm:$0xff]  }
 0x1a4   : > { %4017 = vmatpush1.bf16.msra.mxu0 %v7378_v59  ;;  %v7453_v48 = vld [vmem:[%s9630_s1 + $0xeb0] ss:$8 sps:$4 sm:$0xff]   ;;  %v7458_v49 = vld [vmem:[%s9630_s1 + $0xd44] ss:$8 sps:$4 sm:$0xff]   ;;  %v7456_v52 = vld [vmem:[%s9630_s1 + $0xd40] ss:$8 sps:$4 sm:$0xff]  }
 0x1a5   : > { %4451 = vmatpush1.bf16.msra.mxu1 %v7381_v58  ;;  %4018 = vmatprep.subr.bf16.mxu0 %v7386_v12  ;;  %v7461_v50 = vld [vmem:[%s9630_s1 + $0xec4] ss:$8 sps:$4 sm:$0xff]   ;;  %v7459_v53 = vld [vmem:[%s9630_s1 + $0xec0] ss:$8 sps:$4 sm:$0xff]   ;;  %v7464_v54 = vld [vmem:[%s9630_s1 + $0xd54] ss:$8 sps:$4 sm:$0xff]  }
 0x1a6   : > { %4452 = vmatprep.subr.bf16.mxu1 %v7389_v61  ;;  %v7467_v55 = vld [vmem:[%s9630_s1 + $0xed4] ss:$8 sps:$4 sm:$0xff]   ;;  %v7462_v56 = vld [vmem:[%s9630_s1 + $0xd50] ss:$8 sps:$4 sm:$0xff]   ;;  %v7470_v59 = vld [vmem:[%s9630_s1 + $0xd64] ss:$8 sps:$4 sm:$0xff]  }
 0x1a7   : > { %v7465_v57 = vld [vmem:[%s9630_s1 + $0xed0] ss:$8 sps:$4 sm:$0xff]   ;;  %v7473_v58 = vld [vmem:[%s9630_s1 + $0xee4] ss:$8 sps:$4 sm:$0xff]   ;;  %v7468_v12 = vld [vmem:[%s9630_s1 + $0xd60] ss:$8 sps:$4 sm:$0xff]  }
 0x1a8   : > { %4019 = vmatpush1.bf16.msra.mxu0 %v7384_v62  ;;  %v7471_v61 = vld [vmem:[%s9630_s1 + $0xee0] ss:$8 sps:$4 sm:$0xff]   ;;  %v7476_v62 = vld [vmem:[%s9630_s1 + $0xd74] ss:$8 sps:$4 sm:$0xff]  }
 0x1a9   : > { %4453 = vmatpush1.bf16.msra.mxu1 %v7387_v0  ;;  %4020 = vmatprep.subr.bf16.mxu0 %v7392_v1  ;;  %v7479_v0 = vld [vmem:[%s9630_s1 + $0xef4] ss:$8 sps:$4 sm:$0xff]   ;;  %v7474_v1 = vld [vmem:[%s9630_s1 + $0xd70] ss:$8 sps:$4 sm:$0xff]  }
 0x1aa   : > { %4454 = vmatprep.subr.bf16.mxu1 %v7395_v2  ;;  %v7477_v2 = vld [vmem:[%s9630_s1 + $0xef0] ss:$8 sps:$4 sm:$0xff]  }
 0x1ac   : > { %4021 = vmatpush1.bf16.msra.mxu0 %v7390_v3  ;;  %v7482_v3 = vld [vmem:[%s9630_s1 + $0xf04] ss:$8 sps:$4 sm:$0xff]  }
 0x1ad   : > { %4455 = vmatpush1.bf16.msra.mxu1 %v7393_v4  ;;  %4022 = vmatprep.subr.bf16.mxu0 %v7398_v5  ;;  %v7485_v4 = vld [vmem:[%s9630_s1 + $0x1084] ss:$8 sps:$4 sm:$0xff]   ;;  %v9270_v5 = vcombine.high %v9166_v34, %v9166_v34 }
 0x1ae   : > { %4456 = vmatprep.subr.bf16.mxu1 %v7401_v6  ;;  %v7480_v6 = vld [vmem:[%s9630_s1 + $0xf00] ss:$8 sps:$4 sm:$0xff]  }
 0x1b0   : > { %4023 = vmatpush1.bf16.msra.mxu0 %v7396_v8  ;;  %v7483_v8 = vld [vmem:[%s9630_s1 + $0x1080] ss:$8 sps:$4 sm:$0xff]  }
 0x1b1   : > { %4457 = vmatpush1.bf16.msra.mxu1 %v7399_v9  ;;  %4024 = vmatprep.subr.bf16.mxu0 %v7404_v10  ;;  %v7488_v9 = vld [vmem:[%s9630_s1 + $0xf14] ss:$8 sps:$4 sm:$0xff]  }
 0x1b2   : > { %4458 = vmatprep.subr.bf16.mxu1 %v7407_v63  ;;  %v7491_v10 = vld [vmem:[%s9630_s1 + $0x1094] ss:$8 sps:$4 sm:$0xff]   ;;  %v7486_v63 = vld [vmem:[%s9630_s1 + $0xf10] ss:$8 sps:$4 sm:$0xff]  }
 0x1b4   : > { %4025 = vmatpush1.bf16.msra.mxu0 %v7402_v28  ;;  %v7489_v28 = vld [vmem:[%s9630_s1 + $0x1090] ss:$8 sps:$4 sm:$0xff]  }
 0x1b5   : > { %4459 = vmatpush1.bf16.msra.mxu1 %v7405_v11  ;;  %4026 = vmatprep.subr.bf16.mxu0 %v7410_v13  ;;  %v7494_v11 = vld [vmem:[%s9630_s1 + $0xf24] ss:$8 sps:$4 sm:$0xff]  }
 0x1b6   : > { %4460 = vmatprep.subr.bf16.mxu1 %v7413_v14  ;;  %v7497_v13 = vld [vmem:[%s9630_s1 + $0x10a4] ss:$8 sps:$4 sm:$0xff]   ;;  %v7492_v14 = vld [vmem:[%s9630_s1 + $0xf20] ss:$8 sps:$4 sm:$0xff]  }
 0x1b8   : > { %4027 = vmatpush1.bf16.msra.mxu0 %v7408_v15  ;;  %v7495_v15 = vld [vmem:[%s9630_s1 + $0x10a0] ss:$8 sps:$4 sm:$0xff]  }
 0x1b9   : > { %4461 = vmatpush1.bf16.msra.mxu1 %v7411_v16  ;;  %4028 = vmatprep.subr.bf16.mxu0 %v7416_v18  ;;  %v7500_v16 = vld [vmem:[%s9630_s1 + $0xf34] ss:$8 sps:$4 sm:$0xff]   ;;  %v7498_v18 = vld [vmem:[%s9630_s1 + $0xf30] ss:$8 sps:$4 sm:$0xff]  }
 0x1ba   : > { %4462 = vmatprep.subr.bf16.mxu1 %v7419_v21  ;;  %v7501_v21 = vld [vmem:[%s9630_s1 + $0x10b0] ss:$8 sps:$4 sm:$0xff]  }
 0x1bc   : > { %4029 = vmatpush1.bf16.msra.mxu0 %v7414_v22  ;;  %v7506_v22 = vld [vmem:[%s9630_s1 + $0xf44] ss:$8 sps:$4 sm:$0xff]  }
 0x1bd   : > { %4463 = vmatpush1.bf16.msra.mxu1 %v7417_v24  ;;  %4030 = vmatprep.subr.bf16.mxu0 %v7422_v25  ;;  %v7509_v24 = vld [vmem:[%s9630_s1 + $0x10c4] ss:$8 sps:$4 sm:$0xff]   ;;  %v7504_v25 = vld [vmem:[%s9630_s1 + $0xf40] ss:$8 sps:$4 sm:$0xff]  }
 0x1be   : > { %4464 = vmatprep.subr.bf16.mxu1 %v7425_v26  ;;  %v7507_v26 = vld [vmem:[%s9630_s1 + $0x10c0] ss:$8 sps:$4 sm:$0xff]  }
 0x1c0   : > { %4031 = vmatpush1.bf16.msra.mxu0 %v7420_v27  ;;  %v5895_v27 = vld [vmem:[%s9631_s2 + $0x8] sm:$0x3] }
 0x1c1   : > { %4465 = vmatpush1.bf16.msra.mxu1 %v7423_v45  ;;  %4032 = vmatprep.subr.bf16.mxu0 %v7428_v29  ;;  %v5995_v45 = vld [vmem:[%s9631_s2 + $0xa] sm:$0x3]  ;;  %v7512_v29 = vld [vmem:[%s9630_s1 + $0xf54] ss:$8 sps:$4 sm:$0xff]  }
 0x1c2   : > { %4466 = vmatprep.subr.bf16.mxu1 %v7431_v30  ;;  %v7515_v30 = vld [vmem:[%s9630_s1 + $0x10d4] ss:$8 sps:$4 sm:$0xff]  }
 0x1c4   : > { %4033 = vmatpush1.bf16.msra.mxu0 %v7426_v31  ;;  %v1992_v31 = vrot.slane %v5895_v27, %v8683_v19 }
 0x1c5   : > { %4467 = vmatpush1.bf16.msra.mxu1 %v7429_v32  ;;  %4043 = vmatprep.subr.bf16.mxu0 %v7434_v33  ;;  %v2426_v32 = vrot.slane %v5995_v45, %v8683_v19  ;;  %v1996_v33 = vrot.slane %v5895_v27, %v8692_v23  ;;  %v7566_v27 = vld [vmem:[%s9630_s1 + $0xfe4] ss:$8 sps:$4 sm:$0xff]  }
 0x1c6   : > { %4477 = vmatprep.subr.bf16.mxu1 %v7437_v17  ;;  %v2430_v17 = vrot.slane %v5995_v45, %v8692_v23  ;;  %v7569_v45 = vld [vmem:[%s9630_s1 + $0x1164] ss:$8 sps:$4 sm:$0xff]  }
 0x1c7   : > { %4035 = vmatmul.mubr.bf16.vlgmr.msra.gmra.mrb[16].mxu0 %v9166_v34 }
 0x1c8   : > { %4469 = vmatmul.mubr.bf16.vlgmr.msra.gmra.mrb[16].mxu1 %v9166_v34  ;;  %4044 = vmatpush1.bf16.msra.mxu0 %v7432_v35  ;;  %v7510_v35 = vld [vmem:[%s9630_s1 + $0xf50] ss:$8 sps:$4 sm:$0xff]  }
 0x1c9   : > { %4478 = vmatpush1.bf16.msra.mxu1 %v7435_v36  ;;  %4045 = vmatprep.subr.bf16.mxu0 %v7440_v37  ;;  %v7513_v36 = vld [vmem:[%s9630_s1 + $0x10d0] ss:$8 sps:$4 sm:$0xff]   ;;  %v7518_v37 = vld [vmem:[%s9630_s1 + $0xf64] ss:$8 sps:$4 sm:$0xff]  }
 0x1ca   : > { %4479 = vmatprep.subr.bf16.mxu1 %v7443_v60  ;;  %4075 = vmatprep.mubr.bf16.mxu0 %v7649_v20  ;;  %v7521_v60 = vld [vmem:[%s9630_s1 + $0x10e4] ss:$8 sps:$4 sm:$0xff]  }
 0x1cb   : > { %4509 = vmatprep.mubr.bf16.mxu1 %v7649_v20 }
 0x1cc   : > { %4046 = vmatpush1.bf16.msra.mxu0 %v7438_v46 }
 0x1cd   : > { %4480 = vmatpush1.bf16.msra.mxu1 %v7441_v38  ;;  %4047 = vmatprep.subr.bf16.mxu0 %v7446_v39 }
 0x1ce   : > { %4481 = vmatprep.subr.bf16.mxu1 %v7449_v40 }
 0x1d0   : > { %4048 = vmatpush1.bf16.msra.mxu0 %v7444_v41 }
 0x1d1   : > { %4482 = vmatpush1.bf16.msra.mxu1 %v7447_v42  ;;  %4049 = vmatprep.subr.bf16.mxu0 %v7452_v43 }
 0x1d2   : > { %4483 = vmatprep.subr.bf16.mxu1 %v7455_v44 }
 0x1d4   : > { %4050 = vmatpush1.bf16.msra.mxu0 %v7450_v47 }
 0x1d5   : > { %4484 = vmatpush1.bf16.msra.mxu1 %v7453_v48  ;;  %4051 = vmatprep.subr.bf16.mxu0 %v7458_v49  ;;  %v7516_v49 = vld [vmem:[%s9630_s1 + $0xf60] ss:$8 sps:$4 sm:$0xff]  }
 0x1d6   : > { %4485 = vmatprep.subr.bf16.mxu1 %v7461_v50  ;;  %v7519_v50 = vld [vmem:[%s9630_s1 + $0x10e0] ss:$8 sps:$4 sm:$0xff]  }
 0x1d8   : > { %4052 = vmatpush1.bf16.msra.mxu0 %v7456_v52 }
 0x1d9   : > { %4486 = vmatpush1.bf16.msra.mxu1 %v7459_v53  ;;  %4053 = vmatprep.subr.bf16.mxu0 %v7464_v54  ;;  %v7524_v54 = vld [vmem:[%s9630_s1 + $0xf74] ss:$8 sps:$4 sm:$0xff]  }
 0x1da   : > { %4487 = vmatprep.subr.bf16.mxu1 %v7467_v55  ;;  %v7527_v55 = vld [vmem:[%s9630_s1 + $0x10f4] ss:$8 sps:$4 sm:$0xff]  }
 0x1dc   : > { %4054 = vmatpush1.bf16.msra.mxu0 %v7462_v56 }
 0x1dd   : > { %4488 = vmatpush1.bf16.msra.mxu1 %v7465_v57  ;;  %4055 = vmatprep.subr.bf16.mxu0 %v7470_v59 }
 0x1de   : > { %4489 = vmatprep.subr.bf16.mxu1 %v7473_v58 }
 0x1e0   : > { %4056 = vmatpush1.bf16.msra.mxu0 %v7468_v12  ;;  %v7522_v12 = vld [vmem:[%s9630_s1 + $0xf70] ss:$8 sps:$4 sm:$0xff]  }
 0x1e1   : > { %4490 = vmatpush1.bf16.msra.mxu1 %v7471_v61  ;;  %4057 = vmatprep.subr.bf16.mxu0 %v7476_v62  ;;  %v7525_v61 = vld [vmem:[%s9630_s1 + $0x10f0] ss:$8 sps:$4 sm:$0xff]   ;;  %v7530_v62 = vld [vmem:[%s9630_s1 + $0xf84] ss:$8 sps:$4 sm:$0xff]  }
 0x1e2   : > { %4491 = vmatprep.subr.bf16.mxu1 %v7479_v0  ;;  %v7533_v0 = vld [vmem:[%s9630_s1 + $0x1104] ss:$8 sps:$4 sm:$0xff]  }
 0x1e4   : > { %4058 = vmatpush1.bf16.msra.mxu0 %v7474_v1  ;;  %v7528_v1 = vld [vmem:[%s9630_s1 + $0xf80] ss:$8 sps:$4 sm:$0xff]  }
 0x1e5   : > { %4492 = vmatpush1.bf16.msra.mxu1 %v7477_v2  ;;  %4870 = vmatprep.subr.bf16.mxu0 %v7482_v3  ;;  %v7531_v2 = vld [vmem:[%s9630_s1 + $0x1100] ss:$8 sps:$4 sm:$0xff]   ;;  %v7536_v3 = vld [vmem:[%s9630_s1 + $0xf94] ss:$8 sps:$4 sm:$0xff]  }
 0x1e6   : > { %5304 = vmatprep.subr.bf16.mxu1 %v7485_v4  ;;  %v7539_v4 = vld [vmem:[%s9630_s1 + $0x1114] ss:$8 sps:$4 sm:$0xff]  }
 0x1e7   : > { %4076 = vmatmul.mubr.bf16.vlgmr.msra.gmra.mrb[16].mxu0 %v9270_v5 }
 0x1e8   : > { %4510 = vmatmul.mubr.bf16.vlgmr.msra.gmra.mrb[16].mxu1 %v9270_v5  ;;  %4871 = vmatpush1.bf16.msra.mxu0 %v7480_v6  ;;  %v7534_v6 = vld [vmem:[%s9630_s1 + $0xf90] ss:$8 sps:$4 sm:$0xff]  }
 0x1e9   : > { %5305 = vmatpush1.bf16.msra.mxu1 %v7483_v8  ;;  %4872 = vmatprep.subr.bf16.mxu0 %v7488_v9  ;;  %v7537_v8 = vld [vmem:[%s9630_s1 + $0x1110] ss:$8 sps:$4 sm:$0xff]   ;;  %v7542_v9 = vld [vmem:[%s9630_s1 + $0xfa4] ss:$8 sps:$4 sm:$0xff]  }
 0x1ea   : > { %5306 = vmatprep.subr.bf16.mxu1 %v7491_v10  ;;  %4902 = vmatprep.mubr.bf16.mxu0 %v8964_v7  ;;  %v7545_v10 = vld [vmem:[%s9630_s1 + $0x1124] ss:$8 sps:$4 sm:$0xff]  }
 0x1eb   : > { %5336 = vmatprep.mubr.bf16.mxu1 %v8964_v7  ;;  %v7503_v7 = vld [vmem:[%s9630_s1 + $0x10b4] ss:$8 sps:$4 sm:$0xff]  }
 0x1ec   : > { %4873 = vmatpush1.bf16.msra.mxu0 %v7486_v63  ;;  %v7540_v63 = vld [vmem:[%s9630_s1 + $0xfa0] ss:$8 sps:$4 sm:$0xff]  }
 0x1ed   : > { %5307 = vmatpush1.bf16.msra.mxu1 %v7489_v28  ;;  %4874 = vmatprep.subr.bf16.mxu0 %v7494_v11  ;;  %v7543_v28 = vld [vmem:[%s9630_s1 + $0x1120] ss:$8 sps:$4 sm:$0xff]   ;;  %v7548_v11 = vld [vmem:[%s9630_s1 + $0xfb4] ss:$8 sps:$4 sm:$0xff]  }
 0x1ee   : > { %5308 = vmatprep.subr.bf16.mxu1 %v7497_v13  ;;  %v7551_v13 = vld [vmem:[%s9630_s1 + $0x1134] ss:$8 sps:$4 sm:$0xff]  }
 0x1f0   : > { %4875 = vmatpush1.bf16.msra.mxu0 %v7492_v14  ;;  %v7546_v14 = vld [vmem:[%s9630_s1 + $0xfb0] ss:$8 sps:$4 sm:$0xff]  }
 0x1f1   : > { %5309 = vmatpush1.bf16.msra.mxu1 %v7495_v15  ;;  %4876 = vmatprep.subr.bf16.mxu0 %v7500_v16  ;;  %v7549_v15 = vld [vmem:[%s9630_s1 + $0x1130] ss:$8 sps:$4 sm:$0xff]   ;;  %v7554_v16 = vld [vmem:[%s9630_s1 + $0xfc4] ss:$8 sps:$4 sm:$0xff]  }
 0x1f2   : > { %5310 = vmatprep.subr.bf16.mxu1 %v7503_v7  ;;  %v7557_v7 = vld [vmem:[%s9630_s1 + $0x1144] ss:$8 sps:$4 sm:$0xff]  }
 0x1f4   : > { %4877 = vmatpush1.bf16.msra.mxu0 %v7498_v18  ;;  %v7552_v18 = vld [vmem:[%s9630_s1 + $0xfc0] ss:$8 sps:$4 sm:$0xff]  }
 0x1f5   : > { %5311 = vmatpush1.bf16.msra.mxu1 %v7501_v21  ;;  %4878 = vmatprep.subr.bf16.mxu0 %v7506_v22  ;;  %v7555_v21 = vld [vmem:[%s9630_s1 + $0x1140] ss:$8 sps:$4 sm:$0xff]   ;;  %v7560_v22 = vld [vmem:[%s9630_s1 + $0xfd4] ss:$8 sps:$4 sm:$0xff]  }
 0x1f6   : > { %5312 = vmatprep.subr.bf16.mxu1 %v7509_v24  ;;  %v7563_v24 = vld [vmem:[%s9630_s1 + $0x1154] ss:$8 sps:$4 sm:$0xff]  }
 0x1f8   : > { %4879 = vmatpush1.bf16.msra.mxu0 %v7504_v25  ;;  %v7558_v25 = vld [vmem:[%s9630_s1 + $0xfd0] ss:$8 sps:$4 sm:$0xff]  }
 0x1f9   : > { %5313 = vmatpush1.bf16.msra.mxu1 %v7507_v26  ;;  %4880 = vmatprep.subr.bf16.mxu0 %v7512_v29  ;;  %v7561_v26 = vld [vmem:[%s9630_s1 + $0x1150] ss:$8 sps:$4 sm:$0xff]   ;;  %v7564_v29 = vld [vmem:[%s9630_s1 + $0xfe0] ss:$8 sps:$4 sm:$0xff]  }
 0x1fa   : > { %5314 = vmatprep.subr.bf16.mxu1 %v7515_v30  ;;  %v2341_v46 = vpop.f32.mrb[8].mxu0  ;;  %v7567_v30 = vld [vmem:[%s9630_s1 + $0x1160] ss:$8 sps:$4 sm:$0xff]  }
 0x1fb   : > { %v2775_v38 = vpop.f32.mrb[8].mxu1  ;;  %v6668_v39 = vadd.f32 %v2341_v46, %v1992_v31  ;;  %v2343_v41 = vpop.f32.mrb[9].mxu0  ;;  %v7572_v31 = vld [vmem:[%s9630_s1 + $0xff4] ss:$8 sps:$4 sm:$0xff]  }
 0x1fc   : > { %v6670_v40 = vadd.f32 %v2775_v38, %v2426_v32  ;;  %v2777_v42 = vpop.f32.mrb[9].mxu1  ;;  %v6669_v43 = vadd.f32 %v2343_v41, %v1996_v33  ;;  %v2345_v47 = vpop.f32.mrb[10].mxu0  ;;  %4881 = vmatpush1.bf16.msra.mxu0 %v7510_v35  ;;  %v7575_v32 = vld [vmem:[%s9630_s1 + $0x1174] ss:$8 sps:$4 sm:$0xff]   ;;  %v7570_v33 = vld [vmem:[%s9630_s1 + $0xff0] ss:$8 sps:$4 sm:$0xff]  }
 0x1fd   : > { %v6671_v44 = vadd.f32 %v2777_v42, %v2430_v17  ;;  %v2779_v48 = vpop.f32.mrb[10].mxu1  ;;  %5315 = vmatpush1.bf16.msra.mxu1 %v7513_v36  ;;  %v2346_v52 = vpop.f32.mrb[11].mxu0  ;;  %4882 = vmatprep.subr.bf16.mxu0 %v7518_v37  ;;  %v7573_v17 = vld [vmem:[%s9630_s1 + $0x1170] ss:$8 sps:$4 sm:$0xff]   ;;  %v7578_v35 = vld [vmem:[%s9630_s1 + $0x1004] ss:$8 sps:$4 sm:$0xff]  }
 0x1fe   : > { %v2780_v53 = vpop.f32.mrb[11].mxu1  ;;  %5316 = vmatprep.subr.bf16.mxu1 %v7521_v60  ;;  %v5945_v56 = vpack.c.bf16 %v6669_v43, %v6668_v39  ;;  %v7581_v36 = vld [vmem:[%s9630_s1 + $0x1184] ss:$8 sps:$4 sm:$0xff]   ;;  %v7576_v37 = vld [vmem:[%s9630_s1 + $0x1000] ss:$8 sps:$4 sm:$0xff]  }
 0x1ff   : > { %v6045_v57 = vpack.c.bf16 %v6671_v44, %v6670_v40  ;;  %v7579_v60 = vld [vmem:[%s9630_s1 + $0x1180] ss:$8 sps:$4 sm:$0xff]   ;;  %v7584_v46 = vld [vmem:[%s9630_s1 + $0x1014] ss:$8 sps:$4 sm:$0xff]   ;;  %v7582_v39 = vld [vmem:[%s9630_s1 + $0x1010] ss:$8 sps:$4 sm:$0xff]  }
 0x200   : > { %v2359_v59 = vrot.slane %v5945_v56, %v7841_v51  ;;  %4883 = vmatpush1.bf16.msra.mxu0 %v7516_v49  ;;  %v7587_v38 = vld [vmem:[%s9630_s1 + $0x1194] ss:$8 sps:$4 sm:$0xff]   ;;  %v7585_v40 = vld [vmem:[%s9630_s1 + $0x1190] ss:$8 sps:$4 sm:$0xff]   ;;  %v7590_v41 = vld [vmem:[%s9630_s1 + $0x1024] ss:$8 sps:$4 sm:$0xff]  }
 0x201   : > { %v2793_v58 = vrot.slane %v6045_v57, %v7841_v51  ;;  %5317 = vmatpush1.bf16.msra.mxu1 %v7519_v50  ;;  %4884 = vmatprep.subr.bf16.mxu0 %v7524_v54  ;;  %v7588_v42 = vld [vmem:[%s9630_s1 + $0x1020] ss:$8 sps:$4 sm:$0xff]   ;;  %v7596_v44 = vld [vmem:[%s9630_s1 + $0x1034] ss:$8 sps:$4 sm:$0xff]   ;;  %v7594_v47 = vld [vmem:[%s9630_s1 + $0x1030] ss:$8 sps:$4 sm:$0xff]  }
 0x202   : > { %5318 = vmatprep.subr.bf16.mxu1 %v7527_v55  ;;  %6652 = vst.sshfl [vmem:[%s8732_s20 + $0x8] sm:$0x5 pattern:$0x73625140] %v2359_v59  ;;  %v7591_v43 = vld [vmem:[%s9630_s1 + $0x11a0] ss:$8 sps:$4 sm:$0xff]  }
 0x203   : > { %6653 = vst.sshfl [vmem:[%s8732_s20 + $0xa] sm:$0x5 pattern:$0x73625140] %v2793_v58  ;;  %v7597_v48 = vld [vmem:[%s9630_s1 + $0x11b0] ss:$8 sps:$4 sm:$0xff]  }
 0x204   : > { %4885 = vmatpush1.bf16.msra.mxu0 %v7522_v12  ;;  %v7602_v49 = vld [vmem:[%s9630_s1 + $0x1044] ss:$8 sps:$4 sm:$0xff]   ;;  %v7600_v52 = vld [vmem:[%s9630_s1 + $0x1040] ss:$8 sps:$4 sm:$0xff]   ;;  %v7608_v54 = vld [vmem:[%s9630_s1 + $0x1054] ss:$8 sps:$4 sm:$0xff]  }
 0x205   : > { %5319 = vmatpush1.bf16.msra.mxu1 %v7525_v61  ;;  %4886 = vmatprep.subr.bf16.mxu0 %v7530_v62  ;;  %v7605_v50 = vld [vmem:[%s9630_s1 + $0x11c4] ss:$8 sps:$4 sm:$0xff]   ;;  %v7603_v53 = vld [vmem:[%s9630_s1 + $0x11c0] ss:$8 sps:$4 sm:$0xff]   ;;  %v7611_v55 = vld [vmem:[%s9630_s1 + $0x11d4] ss:$8 sps:$4 sm:$0xff]  }
 0x206   : > { %5320 = vmatprep.subr.bf16.mxu1 %v7533_v0  ;;  %v7606_v56 = vld [vmem:[%s9630_s1 + $0x1050] ss:$8 sps:$4 sm:$0xff]   ;;  %v7614_v59 = vld [vmem:[%s9630_s1 + $0x1064] ss:$8 sps:$4 sm:$0xff]   ;;  %v7612_v12 = vld [vmem:[%s9630_s1 + $0x1060] ss:$8 sps:$4 sm:$0xff]  }
 0x207   : > { %v7609_v57 = vld [vmem:[%s9630_s1 + $0x11d0] ss:$8 sps:$4 sm:$0xff]   ;;  %v7617_v58 = vld [vmem:[%s9630_s1 + $0x11e4] ss:$8 sps:$4 sm:$0xff]   ;;  %v7615_v61 = vld [vmem:[%s9630_s1 + $0x11e0] ss:$8 sps:$4 sm:$0xff]  }
 0x208   : > { %4887 = vmatpush1.bf16.msra.mxu0 %v7528_v1  ;;  %v7620_v62 = vld [vmem:[%s9630_s1 + $0x1074] ss:$8 sps:$4 sm:$0xff]   ;;  %v7618_v1 = vld [vmem:[%s9630_s1 + $0x1070] ss:$8 sps:$4 sm:$0xff]  }
 0x209   : > { %5321 = vmatpush1.bf16.msra.mxu1 %v7531_v2  ;;  %4888 = vmatprep.subr.bf16.mxu0 %v7536_v3  ;;  %v7623_v0 = vld [vmem:[%s9630_s1 + $0x11f4] ss:$8 sps:$4 sm:$0xff]   ;;  %v7621_v2 = vld [vmem:[%s9630_s1 + $0x11f0] ss:$8 sps:$4 sm:$0xff]   ;;  %v6095_v3 = vld [vmem:[%s9631_s2 + $0xc] sm:$0x3] }
 0x20a   : > { %5322 = vmatprep.subr.bf16.mxu1 %v7539_v4  ;;  %v6195_v4 = vld [vmem:[%s9631_s2 + $0xe] sm:$0x3] }
 0x20c   : > { %4889 = vmatpush1.bf16.msra.mxu0 %v7534_v6  ;;  %v2860_v6 = vrot.slane %v6095_v3, %v8683_v19 }
 0x20d   : > { %5323 = vmatpush1.bf16.msra.mxu1 %v7537_v8  ;;  %4890 = vmatprep.subr.bf16.mxu0 %v7542_v9  ;;  %v3294_v8 = vrot.slane %v6195_v4, %v8683_v19  ;;  %v2864_v9 = vrot.slane %v6095_v3, %v8692_v23 }
 0x20e   : > { %5324 = vmatprep.subr.bf16.mxu1 %v7545_v10  ;;  %v3298_v10 = vrot.slane %v6195_v4, %v8692_v23 }
 0x210   : > { %4891 = vmatpush1.bf16.msra.mxu0 %v7540_v63 }
 0x211   : > { %5325 = vmatpush1.bf16.msra.mxu1 %v7543_v28  ;;  %4892 = vmatprep.subr.bf16.mxu0 %v7548_v11 }
 0x212   : > { %5326 = vmatprep.subr.bf16.mxu1 %v7551_v13 }
 0x214   : > { %4893 = vmatpush1.bf16.msra.mxu0 %v7546_v14 }
 0x215   : > { %5327 = vmatpush1.bf16.msra.mxu1 %v7549_v15  ;;  %4894 = vmatprep.subr.bf16.mxu0 %v7554_v16 }
 0x216   : > { %5328 = vmatprep.subr.bf16.mxu1 %v7557_v7 }
 0x218   : > { %4895 = vmatpush1.bf16.msra.mxu0 %v7552_v18 }
 0x219   : > { %5329 = vmatpush1.bf16.msra.mxu1 %v7555_v21  ;;  %4896 = vmatprep.subr.bf16.mxu0 %v7560_v22 }
 0x21a   : > { %5330 = vmatprep.subr.bf16.mxu1 %v7563_v24 }
 0x21c   : > { %4897 = vmatpush1.bf16.msra.mxu0 %v7558_v25 }
 0x21d   : > { %5331 = vmatpush1.bf16.msra.mxu1 %v7561_v26  ;;  %4898 = vmatprep.subr.bf16.mxu0 %v7566_v27 }
 0x21e   : > { %5332 = vmatprep.subr.bf16.mxu1 %v7569_v45  ;;  %v6295_v45 = vld [vmem:[%s9631_s2 + $0x10] sm:$0x3] }
 0x220   : > { %4899 = vmatpush1.bf16.msra.mxu0 %v7564_v29  ;;  %v6395_v29 = vld [vmem:[%s9631_s2 + $0x12] sm:$0x3] }
 0x221   : > { %5333 = vmatpush1.bf16.msra.mxu1 %v7567_v30  ;;  %4900 = vmatprep.subr.bf16.mxu0 %v7572_v31  ;;  %v3728_v30 = vrot.slane %v6295_v45, %v8683_v19  ;;  %v4162_v31 = vrot.slane %v6395_v29, %v8683_v19 }
 0x222   : > { %5334 = vmatprep.subr.bf16.mxu1 %v7575_v32  ;;  %v3732_v32 = vrot.slane %v6295_v45, %v8692_v23 }
 0x224   : > { %4901 = vmatpush1.bf16.msra.mxu0 %v7570_v33  ;;  %v4166_v33 = vrot.slane %v6395_v29, %v8692_v23 }
 0x225   : > { %5335 = vmatpush1.bf16.msra.mxu1 %v7573_v17  ;;  %4911 = vmatprep.subr.bf16.mxu0 %v7578_v35 }
 0x226   : > { %5345 = vmatprep.subr.bf16.mxu1 %v7581_v36 }
 0x227   : > { %4903 = vmatmul.mubr.bf16.vlgmr.msra.gmra.mrb[20].mxu0 %v9166_v34 }
 0x228   : > { %5337 = vmatmul.mubr.bf16.vlgmr.msra.gmra.mrb[20].mxu1 %v9166_v34  ;;  %4912 = vmatpush1.bf16.msra.mxu0 %v7576_v37  ;;  %v7593_v34 = vld [vmem:[%s9630_s1 + $0x11a4] ss:$8 sps:$4 sm:$0xff]  }
 0x229   : > { %5346 = vmatpush1.bf16.msra.mxu1 %v7579_v60  ;;  %4913 = vmatprep.subr.bf16.mxu0 %v7584_v46 }
 0x22a   : > { %5347 = vmatprep.subr.bf16.mxu1 %v7587_v38  ;;  %4943 = vmatprep.mubr.bf16.mxu0 %v7649_v20 }
 0x22b   : > { %5377 = vmatprep.mubr.bf16.mxu1 %v7649_v20  ;;  %v7599_v20 = vld [vmem:[%s9630_s1 + $0x11b4] ss:$8 sps:$4 sm:$0xff]  }
 0x22c   : > { %4914 = vmatpush1.bf16.msra.mxu0 %v7582_v39 }
 0x22d   : > { %5348 = vmatpush1.bf16.msra.mxu1 %v7585_v40  ;;  %4915 = vmatprep.subr.bf16.mxu0 %v7590_v41 }
 0x22e   : > { %5349 = vmatprep.subr.bf16.mxu1 %v7593_v34 }
 0x230   : > { %4916 = vmatpush1.bf16.msra.mxu0 %v7588_v42 }
 0x231   : > { %5350 = vmatpush1.bf16.msra.mxu1 %v7591_v43  ;;  %4917 = vmatprep.subr.bf16.mxu0 %v7596_v44 }
 0x232   : > { %5351 = vmatprep.subr.bf16.mxu1 %v7599_v20 }
 0x234   : > { %4918 = vmatpush1.bf16.msra.mxu0 %v7594_v47 }
 0x235   : > { %5352 = vmatpush1.bf16.msra.mxu1 %v7597_v48  ;;  %4919 = vmatprep.subr.bf16.mxu0 %v7602_v49  ;;  %v6495_v48 = vld [vmem:[%s9631_s2 + $0x14] sm:$0x3]  ;;  %v6595_v49 = vld [vmem:[%s9631_s2 + $0x16] sm:$0x3] }
 0x236   : > { %5353 = vmatprep.subr.bf16.mxu1 %v7605_v50  ;;  %v4596_v50 = vrot.slane %v6495_v48, %v8683_v19 }
 0x238   : > { %4920 = vmatpush1.bf16.msra.mxu0 %v7600_v52  ;;  %v5030_v52 = vrot.slane %v6595_v49, %v8683_v19 }
 0x239   : > { %5354 = vmatpush1.bf16.msra.mxu1 %v7603_v53  ;;  %4921 = vmatprep.subr.bf16.mxu0 %v7608_v54  ;;  %v4600_v53 = vrot.slane %v6495_v48, %v8692_v23  ;;  %v5034_v54 = vrot.slane %v6595_v49, %v8692_v23 }
 0x23a   : > { %5355 = vmatprep.subr.bf16.mxu1 %v7611_v55 }
 0x23c   : > { %4922 = vmatpush1.bf16.msra.mxu0 %v7606_v56 }
 0x23d   : > { %5356 = vmatpush1.bf16.msra.mxu1 %v7609_v57  ;;  %4923 = vmatprep.subr.bf16.mxu0 %v7614_v59 }
 0x23e   : > { %5357 = vmatprep.subr.bf16.mxu1 %v7617_v58 }
 0x240   : > { %4924 = vmatpush1.bf16.msra.mxu0 %v7612_v12 }
 0x241   : > { %5358 = vmatpush1.bf16.msra.mxu1 %v7615_v61  ;;  %4925 = vmatprep.subr.bf16.mxu0 %v7620_v62 }
 0x242   : > { %5359 = vmatprep.subr.bf16.mxu1 %v7623_v0 }
 0x244   : > { %4926 = vmatpush1.bf16.msra.mxu0 %v7618_v1 }
 0x245   : > { %5360 = vmatpush1.bf16.msra.mxu1 %v7621_v2 }
 0x247   : > { %4944 = vmatmul.mubr.bf16.vlgmr.msra.gmra.mrb[20].mxu0 %v9270_v5 }
 0x248   : > { %5378 = vmatmul.mubr.bf16.vlgmr.msra.gmra.mrb[20].mxu1 %v9270_v5 }
 0x25a   : > { %v3209_v63 = vpop.f32.mrb[12].mxu0 }
 0x25b   : > { %v3643_v28 = vpop.f32.mrb[12].mxu1  ;;  %v6672_v5 = vadd.f32 %v3209_v63, %v2860_v6  ;;  %v3211_v13 = vpop.f32.mrb[13].mxu0 }
 0x25c   : > { %v6674_v11 = vadd.f32 %v3643_v28, %v3294_v8  ;;  %v3645_v14 = vpop.f32.mrb[13].mxu1  ;;  %v6673_v15 = vadd.f32 %v3211_v13, %v2864_v9  ;;  %v3213_v7 = vpop.f32.mrb[14].mxu0 }
 0x25d   : > { %v6675_v16 = vadd.f32 %v3645_v14, %v3298_v10  ;;  %v3647_v18 = vpop.f32.mrb[14].mxu1  ;;  %v3214_v21 = vpop.f32.mrb[15].mxu0 }
 0x25e   : > { %v3648_v22 = vpop.f32.mrb[15].mxu1  ;;  %v6145_v24 = vpack.c.bf16 %v6673_v15, %v6672_v5 }
 0x25f   : > { %v6245_v25 = vpack.c.bf16 %v6675_v16, %v6674_v11 }
 0x260   : > { %v3227_v26 = vrot.slane %v6145_v24, %v7841_v51 }
 0x261   : > { %v3661_v27 = vrot.slane %v6245_v25, %v7841_v51 }
 0x262   : > { %6654 = vst.sshfl [vmem:[%s8732_s20 + $0xc] sm:$0x5 pattern:$0x73625140] %v3227_v26 }
 0x263   : > { %6655 = vst.sshfl [vmem:[%s8732_s20 + $0xe] sm:$0x5 pattern:$0x73625140] %v3661_v27 }
 0x2ba   : > { %v4077_v17 = vpop.f32.mrb[16].mxu0 }
 0x2bb   : > { %v4511_v35 = vpop.f32.mrb[16].mxu1  ;;  %v6676_v36 = vadd.f32 %v4077_v17, %v3728_v30  ;;  %v4079_v60 = vpop.f32.mrb[17].mxu0 }
 0x2bc   : > { %v6678_v37 = vadd.f32 %v4511_v35, %v4162_v31  ;;  %v4513_v46 = vpop.f32.mrb[17].mxu1  ;;  %v6677_v38 = vadd.f32 %v4079_v60, %v3732_v32  ;;  %v4081_v40 = vpop.f32.mrb[18].mxu0 }
 0x2bd   : > { %v6679_v39 = vadd.f32 %v4513_v46, %v4166_v33  ;;  %v4515_v41 = vpop.f32.mrb[18].mxu1  ;;  %v4082_v34 = vpop.f32.mrb[19].mxu0 }
 0x2be   : > { %v4516_v42 = vpop.f32.mrb[19].mxu1  ;;  %v6345_v43 = vpack.c.bf16 %v6677_v38, %v6676_v36 }
 0x2bf   : > { %v6445_v44 = vpack.c.bf16 %v6679_v39, %v6678_v37 }
 0x2c0   : > { %v4095_v20 = vrot.slane %v6345_v43, %v7841_v51 }
 0x2c1   : > { %v4529_v47 = vrot.slane %v6445_v44, %v7841_v51 }
 0x2c2   : > { %6656 = vst.sshfl [vmem:[%s8732_s20 + $0x10] sm:$0x5 pattern:$0x73625140] %v4095_v20 }
 0x2c3   : > { %6657 = vst.sshfl [vmem:[%s8732_s20 + $0x12] sm:$0x5 pattern:$0x73625140] %v4529_v47 }
 0x31a   : > { %v4945_v55 = vpop.f32.mrb[20].mxu0 }
 0x31b   : > { %v5379_v56 = vpop.f32.mrb[20].mxu1  ;;  %v6680_v57 = vadd.f32 %v4945_v55, %v4596_v50  ;;  %v4947_v58 = vpop.f32.mrb[21].mxu0 }
 0x31c   : > { %v6682_v59 = vadd.f32 %v5379_v56, %v5030_v52  ;;  %v5381_v12 = vpop.f32.mrb[21].mxu1  ;;  %v6681_v61 = vadd.f32 %v4947_v58, %v4600_v53  ;;  %v4949_v0 = vpop.f32.mrb[22].mxu0 }
 0x31d   : > { %v6683_v62 = vadd.f32 %v5381_v12, %v5034_v54  ;;  %v5383_v1 = vpop.f32.mrb[22].mxu1  ;;  %v4950_v2 = vpop.f32.mrb[23].mxu0 }
 0x31e   : > { %v5384_v3 = vpop.f32.mrb[23].mxu1  ;;  %v6545_v4 = vpack.c.bf16 %v6681_v61, %v6680_v57 }
 0x31f   : > { %v6645_v19 = vpack.c.bf16 %v6683_v62, %v6682_v59 }
 0x320   : > { %v4963_v6 = vrot.slane %v6545_v4, %v7841_v51 }
 0x321   : > { %v5397_v23 = vrot.slane %v6645_v19, %v7841_v51 }
 0x322   : > { %6658 = vst.sshfl [vmem:[%s8732_s20 + $0x14] sm:$0x5 pattern:$0x73625140] %v4963_v6 }
 0x323   : > { %6659 = vst.sshfl [vmem:[%s8732_s20 + $0x16] sm:$0x5 pattern:$0x73625140] %v5397_v23 }
 0x324 PF: > { %s13_s14 = sadd.s32 1, %s7646_s14   ;;  %s9633_s12 = smov %s7642_s13 }
 0x325   : > { %p10_p5 = scmp.ge.s32.totalorder %s13_s14, 4   ;;  %s9634_s13 = smov %s9636_s15 }
 0x327   :  { %12 = sbr.rel (!%p10_p5) target bundleno = 2 (0x2), region = 95 }

</bundles_post_ra>
